<compile_context>
chip_gen: v7x
topology: tpu7x:2x2x1
jax: 0.10.0
libtpu: 0.0.40
codegen_flags: <defaults>
</compile_context>

<pallas_src>
import functools

import jax
import jax.numpy as jnp
from jax.experimental import pallas as pl
from jax.experimental.pallas import tpu as pltpu


# ----------------------------------------------------------------------------
# Single fused kernel: encoder pass + decoder pass + MLP head (no grid).
# ----------------------------------------------------------------------------
def _seq2seq_kernel(x_ref, wih0_ref, b0_ref, whh0_ref, *args,
                    num_layers, hidden, t_src, t_tgt, batch):
    H, L, B = hidden, num_layers, batch
    n_rest = 3 * (L - 1)
    rest = args[:n_rest]                               # (wih_l, whh_l, b_l) l>=1
    w3_ref, b3_ref, w4_ref, b4_ref = args[n_rest:n_rest + 4]
    y_ref = args[n_rest + 4]
    dec_ref = args[n_rest + 5]                         # VMEM scratch (T_tgt,B,H)

    # ---- hoisted invariant loads (outside the 2*L*T-cell unrolled chain) ---
    whh = [whh0_ref[...]]                              # bf16
    wih = [None]                                       # layer-0 proj precomputed
    bias = [None]                                      # layer-0 bias folded in
    for l in range(1, L):
        wih.append(rest[3 * (l - 1) + 0][...])                         # bf16
        whh.append(rest[3 * (l - 1) + 1][...])                         # bf16
        bias.append(jnp.broadcast_to(rest[3 * (l - 1) + 2][...], (B, 4 * H)))

    # ---- layer-0 input projections for BOTH passes: one batched matmul -----
    # x_ref: ((T_src+T_tgt)*B, F) f32 ; wih0: (F, 4H) f32
    x0 = (jnp.dot(x_ref[...], wih0_ref[...], preferred_element_type=jnp.float32)
          + b0_ref[...])                               # ((T_src+T_tgt)*B, 4H)

    def gates_to_hc(gates, c):
        # Gate columns permuted wrapper-side to [i | f | o | g]:
        sig = jax.nn.sigmoid(gates[:, :3 * H])         # one EUP pass (i, f, o)
        g = jnp.tanh(gates[:, 3 * H:])                 # one EUP pass (g)
        i, f, o = sig[:, :H], sig[:, H:2 * H], sig[:, 2 * H:3 * H]
        c_new = f * c + i * g
        h_new = o * jnp.tanh(c_new)
        return h_new, c_new

    def cell0(t, h, c):
        # Layer 0: input projection precomputed; only h @ W_hh0 on the chain.
        gates = x0[t * B:(t + 1) * B] + jnp.dot(
            h.astype(jnp.bfloat16), whh[0], preferred_element_type=jnp.float32)
        return gates_to_hc(gates, c)

    def cell(l, x, h, c):
        # No lane concat: two independent MXU pushes, f32 accumulation.
        gates = (jnp.dot(x.astype(jnp.bfloat16), wih[l],
                         preferred_element_type=jnp.float32)
                 + jnp.dot(h.astype(jnp.bfloat16), whh[l],
                           preferred_element_type=jnp.float32)
                 + bias[l])
        return gates_to_hc(gates, c)

    hs = [jnp.zeros((B, H), jnp.float32) for _ in range(L)]
    cs = [jnp.zeros((B, H), jnp.float32) for _ in range(L)]

    # ---- encoder pass (module reuses decoder_lstm weights; h0 = zeros) -----
    for t in range(t_src):
        hs[0], cs[0] = cell0(t, hs[0], cs[0])
        x = hs[0]
        for l in range(1, L):
            hs[l], cs[l] = cell(l, x, hs[l], cs[l])
            x = hs[l]
        # TODO(synk): nn.LSTM inter-layer dropout is train-only; identity here.

    # ---- decoder pass (initialized with encoder final states) --------------
    for t in range(t_tgt):
        hs[0], cs[0] = cell0(t_src + t, hs[0], cs[0])
        x = hs[0]
        for l in range(1, L):
            hs[l], cs[l] = cell(l, x, hs[l], cs[l])
            x = hs[l]
        dec_ref[t] = x                                 # top-layer h_t -> VMEM

    # ---- fused head: linear3 -> relu -> (eval dropout = identity) -> linear4
    h2d = dec_ref[...].reshape(t_tgt * B, H)
    z = jnp.dot(h2d, w3_ref[...], preferred_element_type=jnp.float32) + b3_ref[...]
    z = jnp.maximum(z, 0.0)
    y_ref[...] = (jnp.dot(z, w4_ref[...], preferred_element_type=jnp.float32)
                  + b4_ref[...])                       # (T_tgt*B, P)


def lstm_seq2seq_forward(src, tgt, params):
    """src, tgt: (B, T, F) batch-first. Returns (B, T_tgt, num_features_pred)."""
    B, T_src, F = src.shape
    T_tgt = tgt.shape[1]
    L = len(params["lstm"])
    H = params["lstm"][0][1].shape[0]                  # W_hh: (H, 4H)
    P = params["w4"].shape[1]

    # Gate-column permutation: PyTorch [i, f, g, o] -> kernel [i, f, o, g].
    perm = jnp.concatenate([jnp.arange(0, 2 * H),      # i, f
                            jnp.arange(3 * H, 4 * H),  # o
                            jnp.arange(2 * H, 3 * H)]) # g

    # Stack encoder + decoder inputs time-major and flatten to rows so the
    # kernel can do ONE batched layer-0 input projection for both passes.
    src_tm = jnp.transpose(src, (1, 0, 2)).astype(jnp.float32)
    tgt_tm = jnp.transpose(tgt, (1, 0, 2)).astype(jnp.float32)
    x_all = jnp.concatenate([src_tm, tgt_tm], axis=0).reshape((T_src + T_tgt) * B, F)

    wih0, whh0, b0 = params["lstm"][0]
    flat = [x_all,
            wih0[:, perm].astype(jnp.float32),          # used once (batched)
            b0[:, perm].astype(jnp.float32),
            whh0[:, perm].astype(jnp.bfloat16)]          # recurrent: bf16 operands
    for (wih, whh, b) in params["lstm"][1:]:
        flat += [wih[:, perm].astype(jnp.bfloat16),
                 whh[:, perm].astype(jnp.bfloat16),
                 b[:, perm].astype(jnp.float32)]
    flat += [params["w3"], params["b3"], params["w4"], params["b4"]]

    kernel = functools.partial(_seq2seq_kernel, num_layers=L, hidden=H,
                               t_src=T_src, t_tgt=T_tgt, batch=B)
    n_in = len(flat)
    y2d = pl.pallas_call(
        kernel,
        out_shape=jax.ShapeDtypeStruct((T_tgt * B, P), jnp.float32),
        # Explicit whole-array VMEM placement (no grid): weights staged once.
        in_specs=[pl.BlockSpec(memory_space=pltpu.MemorySpace.VMEM)] * n_in,
        out_specs=pl.BlockSpec(memory_space=pltpu.MemorySpace.VMEM),
        scratch_shapes=[pltpu.VMEM((T_tgt, B, H), jnp.float32)],
        # Working set here is <1 MiB; 32 MiB cap is safe on v5e/v6e/v7x.
        compiler_params=pltpu.CompilerParams(
            vmem_limit_bytes=32 * 1024 * 1024),
    )(*flat)

    return jnp.transpose(y2d.reshape(T_tgt, B, P), (1, 0, 2))    # (B, T, P)


# ----------------------------------------------------------------------------
# Pure-JAX reference (f32 everywhere, PyTorch [i,f,g,o] gate order)
# ----------------------------------------------------------------------------
def _ref_forward(src, tgt, params):
    B = src.shape[0]
    L = len(params["lstm"])
    H = params["lstm"][0][1].shape[0]

    def layer(x_tm, h0, c0, wih, whh, b):
        def step(carry, x_t):
            h, c = carry
            gates = x_t @ wih + h @ whh + b[0]
            i = jax.nn.sigmoid(gates[:, 0:H])
            f = jax.nn.sigmoid(gates[:, H:2 * H])
            g = jnp.tanh(gates[:, 2 * H:3 * H])
            o = jax.nn.sigmoid(gates[:, 3 * H:4 * H])
            c = f * c + i * g
            h = o * jnp.tanh(c)
            return (h, c), h

        (hf, cf), hseq = jax.lax.scan(step, (h0, c0), x_tm)
        return hseq, hf, cf

    def run(x_bt, h_in, c_in):
        seq = jnp.transpose(x_bt, (1, 0, 2))
        h_out, c_out = [], []
        for l, (wih, whh, b) in enumerate(params["lstm"]):
            seq, hf, cf = layer(seq, h_in[l], c_in[l], wih, whh, b)
            h_out.append(hf)
            c_out.append(cf)
        return seq, h_out, c_out

    zeros = [jnp.zeros((B, H), jnp.float32) for _ in range(L)]
    _, he, ce = run(src, list(zeros), list(zeros))
    dec_tm, _, _ = run(tgt, he, ce)
    dec = jnp.transpose(dec_tm, (1, 0, 2))
    z = jnp.maximum(dec @ params["w3"] + params["b3"][0], 0.0)
    return z @ params["w4"] + params["b4"][0]


# ----------------------------------------------------------------------------
# Deterministic parameter construction (PyTorch-style uniform init).
# Per-layer LSTM params kept in PyTorch layout: W_ih (in,4H), W_hh (H,4H),
# b = (b_ih + b_hh)[None,:], gate order [i,f,g,o]. The wrapper does the
# gate permutation / dtype casting for the kernel.
# ----------------------------------------------------------------------------
def make_params(key, num_features, hidden_size, num_layers, num_features_pred):
    bound = 1.0 / jnp.sqrt(hidden_size)
    lstm_params = []
    for l in range(num_layers):
        in_size = num_features if l == 0 else hidden_size
        key, k1, k2, k3, k4 = jax.random.split(key, 5)
        wih = jax.random.uniform(k1, (in_size, 4 * hidden_size),
                                 jnp.float32, -bound, bound)
        whh = jax.random.uniform(k2, (hidden_size, 4 * hidden_size),
                                 jnp.float32, -bound, bound)
        b_ih = jax.random.uniform(k3, (4 * hidden_size,), jnp.float32, -bound, bound)
        b_hh = jax.random.uniform(k4, (4 * hidden_size,), jnp.float32, -bound, bound)
        lstm_params.append((wih, whh, (b_ih + b_hh)[None, :]))

    key, k5, k6, k7, k8 = jax.random.split(key, 5)
    b3s = 1.0 / jnp.sqrt(hidden_size)
    b4s = 1.0 / jnp.sqrt(1024.0)
    w3 = jax.random.uniform(k5, (hidden_size, 1024), jnp.float32, -b3s, b3s)
    b3 = jax.random.uniform(k6, (1, 1024), jnp.float32, -b3s, b3s)
    w4 = jax.random.uniform(k7, (1024, num_features_pred), jnp.float32, -b4s, b4s)
    b4 = jax.random.uniform(k8, (1, num_features_pred), jnp.float32, -b4s, b4s)
    return {"lstm": lstm_params, "w3": w3, "b3": b3, "w4": w4, "b4": b4}


if __name__ == "__main__":
    # Small shapes consistent with the module's forward:
    # src/tgt: (batch, seq_len, num_features)
    batch, seq_len = 2, 8
    num_features, hidden_size, num_layers, num_features_pred = 8, 32, 2, 4

    key = jax.random.PRNGKey(0)
    kp, ks, kt = jax.random.split(key, 3)
    params = make_params(kp, num_features, hidden_size, num_layers, num_features_pred)
    src = jax.random.normal(ks, (batch, seq_len, num_features), jnp.float32)
    tgt = jax.random.normal(kt, (batch, seq_len, num_features), jnp.float32)

    out = lstm_seq2seq_forward(src, tgt, params)
    out = jax.block_until_ready(out)

    ref = _ref_forward(src, tgt, params)
    assert out.shape == (batch, seq_len, num_features_pred), out.shape
    # Tolerance widened vs f32-only version: recurrent matmul operands are bf16
    # (f32 accumulation / elementwise); reference is pure f32.
    max_err = float(jnp.abs(out - ref).max())
    assert jnp.allclose(out, ref, rtol=3e-2, atol=3e-2), max_err

    print("KERNEL_OK")
</pallas_src>

<mosaic_0001>
module attributes {stable_mosaic.version = 11 : i64} {
  func.func @_seq2seq_kernel(%arg0: memref<32x8xf32, #tpu.memory_space<vmem>>, %arg1: memref<8x128xf32, #tpu.memory_space<vmem>>, %arg2: memref<1x128xf32, #tpu.memory_space<vmem>>, %arg3: memref<32x128xbf16, #tpu.memory_space<vmem>>, %arg4: memref<32x128xbf16, #tpu.memory_space<vmem>>, %arg5: memref<32x128xbf16, #tpu.memory_space<vmem>>, %arg6: memref<1x128xf32, #tpu.memory_space<vmem>>, %arg7: memref<32x1024xf32, #tpu.memory_space<vmem>>, %arg8: memref<1x1024xf32, #tpu.memory_space<vmem>>, %arg9: memref<1024x4xf32, #tpu.memory_space<vmem>>, %arg10: memref<1x4xf32, #tpu.memory_space<vmem>>, %arg11: memref<16x4xf32, #tpu.memory_space<vmem>>, %arg12: memref<8x2x32xf32, #tpu.memory_space<vmem>>) attributes {dimension_semantics = [], scalar_prefetch = 0 : i64, scratch_operands = 1 : i64, tpu.core_type = #tpu.core_type<tc>} {
    %c0 = arith.constant 0 : index
    %c0_0 = arith.constant 0 : index
    %0 = vector.load %arg3[%c0, %c0_0] : memref<32x128xbf16, #tpu.memory_space<vmem>>, vector<32x128xbf16>
    %c0_1 = arith.constant 0 : index
    %c0_2 = arith.constant 0 : index
    %1 = vector.load %arg4[%c0_1, %c0_2] : memref<32x128xbf16, #tpu.memory_space<vmem>>, vector<32x128xbf16>
    %c0_3 = arith.constant 0 : index
    %c0_4 = arith.constant 0 : index
    %2 = vector.load %arg5[%c0_3, %c0_4] : memref<32x128xbf16, #tpu.memory_space<vmem>>, vector<32x128xbf16>
    %c0_5 = arith.constant 0 : index
    %c0_6 = arith.constant 0 : index
    %3 = vector.load %arg6[%c0_5, %c0_6] : memref<1x128xf32, #tpu.memory_space<vmem>>, vector<1x128xf32>
    %4 = vector.shape_cast %3 : vector<1x128xf32> to vector<1x128xf32>
    %5 = vector.broadcast %4 : vector<1x128xf32> to vector<2x128xf32>
    %c0_7 = arith.constant 0 : index
    %c0_8 = arith.constant 0 : index
    %6 = vector.load %arg0[%c0_7, %c0_8] : memref<32x8xf32, #tpu.memory_space<vmem>>, vector<32x8xf32>
    %c0_9 = arith.constant 0 : index
    %c0_10 = arith.constant 0 : index
    %7 = vector.load %arg1[%c0_9, %c0_10] : memref<8x128xf32, #tpu.memory_space<vmem>>, vector<8x128xf32>
    %cst = arith.constant dense<0.000000e+00> : vector<32x128xf32>
    %8 = tpu.matmul %6, %7, %cst {dimension_numbers = #tpu.dot_dimension_numbers<[1], [0], [0], [1], [0, 0, 1, 1], [], []>} : vector<32x8xf32>, vector<8x128xf32>, vector<32x128xf32> -> vector<32x128xf32>
    %c0_11 = arith.constant 0 : index
    %c0_12 = arith.constant 0 : index
    %9 = vector.load %arg2[%c0_11, %c0_12] : memref<1x128xf32, #tpu.memory_space<vmem>>, vector<1x128xf32>
    %10 = vector.broadcast %9 : vector<1x128xf32> to vector<32x128xf32>
    %11 = arith.addf %8, %10 : vector<32x128xf32>
    %cst_13 = arith.constant 0.000000e+00 : f32
    %12 = vector.broadcast %cst_13 : f32 to vector<2x32xf32>
    %cst_14 = arith.constant 0.000000e+00 : f32
    %13 = vector.broadcast %cst_14 : f32 to vector<2x32xf32>
    %cst_15 = arith.constant 0.000000e+00 : f32
    %14 = vector.broadcast %cst_15 : f32 to vector<2x32xf32>
    %cst_16 = arith.constant 0.000000e+00 : f32
    %15 = vector.broadcast %cst_16 : f32 to vector<2x32xf32>
    %16 = vector.extract_strided_slice %11 {offsets = [0, 0], sizes = [2, 128], strides = [1, 1]} : vector<32x128xf32> to vector<2x128xf32>
    %17 = arith.truncf %12 : vector<2x32xf32> to vector<2x32xbf16>
    %cst_17 = arith.constant dense<0.000000e+00> : vector<2x128xf32>
    %18 = tpu.matmul %17, %0, %cst_17 {dimension_numbers = #tpu.dot_dimension_numbers<[1], [0], [0], [1], [0, 0, 1, 1], [], []>} : vector<2x32xbf16>, vector<32x128xbf16>, vector<2x128xf32> -> vector<2x128xf32>
    %19 = arith.addf %16, %18 : vector<2x128xf32>
    %20 = vector.extract_strided_slice %19 {offsets = [0, 0], sizes = [2, 96], strides = [1, 1]} : vector<2x128xf32> to vector<2x96xf32>
    %21 = arith.negf %20 : vector<2x96xf32>
    %22 = math.exp %21 : vector<2x96xf32>
    %cst_18 = arith.constant 1.000000e+00 : f32
    %23 = vector.broadcast %cst_18 : f32 to vector<2x96xf32>
    %24 = arith.addf %23, %22 : vector<2x96xf32>
    %25 = arith.divf %23, %24 : vector<2x96xf32>
    %26 = vector.extract_strided_slice %19 {offsets = [0, 96], sizes = [2, 32], strides = [1, 1]} : vector<2x128xf32> to vector<2x32xf32>
    %27 = math.tanh %26 : vector<2x32xf32>
    %28 = vector.extract_strided_slice %25 {offsets = [0, 0], sizes = [2, 32], strides = [1, 1]} : vector<2x96xf32> to vector<2x32xf32>
    %29 = vector.extract_strided_slice %25 {offsets = [0, 32], sizes = [2, 32], strides = [1, 1]} : vector<2x96xf32> to vector<2x32xf32>
    %30 = vector.extract_strided_slice %25 {offsets = [0, 64], sizes = [2, 32], strides = [1, 1]} : vector<2x96xf32> to vector<2x32xf32>
    %31 = arith.mulf %29, %14 : vector<2x32xf32>
    %32 = arith.mulf %28, %27 : vector<2x32xf32>
    %33 = arith.addf %31, %32 : vector<2x32xf32>
    %34 = math.tanh %33 : vector<2x32xf32>
    %35 = arith.mulf %30, %34 : vector<2x32xf32>
    %36 = arith.truncf %35 : vector<2x32xf32> to vector<2x32xbf16>
    %cst_19 = arith.constant dense<0.000000e+00> : vector<2x128xf32>
    %37 = tpu.matmul %36, %1, %cst_19 {dimension_numbers = #tpu.dot_dimension_numbers<[1], [0], [0], [1], [0, 0, 1, 1], [], []>} : vector<2x32xbf16>, vector<32x128xbf16>, vector<2x128xf32> -> vector<2x128xf32>
    %38 = arith.truncf %13 : vector<2x32xf32> to vector<2x32xbf16>
    %cst_20 = arith.constant dense<0.000000e+00> : vector<2x128xf32>
    %39 = tpu.matmul %38, %2, %cst_20 {dimension_numbers = #tpu.dot_dimension_numbers<[1], [0], [0], [1], [0, 0, 1, 1], [], []>} : vector<2x32xbf16>, vector<32x128xbf16>, vector<2x128xf32> -> vector<2x128xf32>
    %40 = arith.addf %37, %39 : vector<2x128xf32>
    %41 = arith.addf %40, %5 : vector<2x128xf32>
    %42 = vector.extract_strided_slice %41 {offsets = [0, 0], sizes = [2, 96], strides = [1, 1]} : vector<2x128xf32> to vector<2x96xf32>
    %43 = arith.negf %42 : vector<2x96xf32>
    %44 = math.exp %43 : vector<2x96xf32>
    %cst_21 = arith.constant 1.000000e+00 : f32
    %45 = vector.broadcast %cst_21 : f32 to vector<2x96xf32>
    %46 = arith.addf %45, %44 : vector<2x96xf32>
    %47 = arith.divf %45, %46 : vector<2x96xf32>
    %48 = vector.extract_strided_slice %41 {offsets = [0, 96], sizes = [2, 32], strides = [1, 1]} : vector<2x128xf32> to vector<2x32xf32>
    %49 = math.tanh %48 : vector<2x32xf32>
    %50 = vector.extract_strided_slice %47 {offsets = [0, 0], sizes = [2, 32], strides = [1, 1]} : vector<2x96xf32> to vector<2x32xf32>
    %51 = vector.extract_strided_slice %47 {offsets = [0, 32], sizes = [2, 32], strides = [1, 1]} : vector<2x96xf32> to vector<2x32xf32>
    %52 = vector.extract_strided_slice %47 {offsets = [0, 64], sizes = [2, 32], strides = [1, 1]} : vector<2x96xf32> to vector<2x32xf32>
    %53 = arith.mulf %51, %15 : vector<2x32xf32>
    %54 = arith.mulf %50, %49 : vector<2x32xf32>
    %55 = arith.addf %53, %54 : vector<2x32xf32>
    %56 = math.tanh %55 : vector<2x32xf32>
    %57 = arith.mulf %52, %56 : vector<2x32xf32>
    %58 = vector.extract_strided_slice %11 {offsets = [2, 0], sizes = [2, 128], strides = [1, 1]} : vector<32x128xf32> to vector<2x128xf32>
    %59 = arith.truncf %35 : vector<2x32xf32> to vector<2x32xbf16>
    %cst_22 = arith.constant dense<0.000000e+00> : vector<2x128xf32>
    %60 = tpu.matmul %59, %0, %cst_22 {dimension_numbers = #tpu.dot_dimension_numbers<[1], [0], [0], [1], [0, 0, 1, 1], [], []>} : vector<2x32xbf16>, vector<32x128xbf16>, vector<2x128xf32> -> vector<2x128xf32>
    %61 = arith.addf %58, %60 : vector<2x128xf32>
    %62 = vector.extract_strided_slice %61 {offsets = [0, 0], sizes = [2, 96], strides = [1, 1]} : vector<2x128xf32> to vector<2x96xf32>
    %63 = arith.negf %62 : vector<2x96xf32>
    %64 = math.exp %63 : vector<2x96xf32>
    %cst_23 = arith.constant 1.000000e+00 : f32
    %65 = vector.broadcast %cst_23 : f32 to vector<2x96xf32>
    %66 = arith.addf %65, %64 : vector<2x96xf32>
    %67 = arith.divf %65, %66 : vector<2x96xf32>
    %68 = vector.extract_strided_slice %61 {offsets = [0, 96], sizes = [2, 32], strides = [1, 1]} : vector<2x128xf32> to vector<2x32xf32>
    %69 = math.tanh %68 : vector<2x32xf32>
    %70 = vector.extract_strided_slice %67 {offsets = [0, 0], sizes = [2, 32], strides = [1, 1]} : vector<2x96xf32> to vector<2x32xf32>
    %71 = vector.extract_strided_slice %67 {offsets = [0, 32], sizes = [2, 32], strides = [1, 1]} : vector<2x96xf32> to vector<2x32xf32>
    %72 = vector.extract_strided_slice %67 {offsets = [0, 64], sizes = [2, 32], strides = [1, 1]} : vector<2x96xf32> to vector<2x32xf32>
    %73 = arith.mulf %71, %33 : vector<2x32xf32>
    %74 = arith.mulf %70, %69 : vector<2x32xf32>
    %75 = arith.addf %73, %74 : vector<2x32xf32>
    %76 = math.tanh %75 : vector<2x32xf32>
    %77 = arith.mulf %72, %76 : vector<2x32xf32>
    %78 = arith.truncf %77 : vector<2x32xf32> to vector<2x32xbf16>
    %cst_24 = arith.constant dense<0.000000e+00> : vector<2x128xf32>
    %79 = tpu.matmul %78, %1, %cst_24 {dimension_numbers = #tpu.dot_dimension_numbers<[1], [0], [0], [1], [0, 0, 1, 1], [], []>} : vector<2x32xbf16>, vector<32x128xbf16>, vector<2x128xf32> -> vector<2x128xf32>
    %80 = arith.truncf %57 : vector<2x32xf32> to vector<2x32xbf16>
    %cst_25 = arith.constant dense<0.000000e+00> : vector<2x128xf32>
    %81 = tpu.matmul %80, %2, %cst_25 {dimension_numbers = #tpu.dot_dimension_numbers<[1], [0], [0], [1], [0, 0, 1, 1], [], []>} : vector<2x32xbf16>, vector<32x128xbf16>, vector<2x128xf32> -> vector<2x128xf32>
    %82 = arith.addf %79, %81 : vector<2x128xf32>
    %83 = arith.addf %82, %5 : vector<2x128xf32>
    %84 = vector.extract_strided_slice %83 {offsets = [0, 0], sizes = [2, 96], strides = [1, 1]} : vector<2x128xf32> to vector<2x96xf32>
    %85 = arith.negf %84 : vector<2x96xf32>
    %86 = math.exp %85 : vector<2x96xf32>
    %cst_26 = arith.constant 1.000000e+00 : f32
    %87 = vector.broadcast %cst_26 : f32 to vector<2x96xf32>
    %88 = arith.addf %87, %86 : vector<2x96xf32>
    %89 = arith.divf %87, %88 : vector<2x96xf32>
    %90 = vector.extract_strided_slice %83 {offsets = [0, 96], sizes = [2, 32], strides = [1, 1]} : vector<2x128xf32> to vector<2x32xf32>
    %91 = math.tanh %90 : vector<2x32xf32>
    %92 = vector.extract_strided_slice %89 {offsets = [0, 0], sizes = [2, 32], strides = [1, 1]} : vector<2x96xf32> to vector<2x32xf32>
    %93 = vector.extract_strided_slice %89 {offsets = [0, 32], sizes = [2, 32], strides = [1, 1]} : vector<2x96xf32> to vector<2x32xf32>
    %94 = vector.extract_strided_slice %89 {offsets = [0, 64], sizes = [2, 32], strides = [1, 1]} : vector<2x96xf32> to vector<2x32xf32>
    %95 = arith.mulf %93, %55 : vector<2x32xf32>
    %96 = arith.mulf %92, %91 : vector<2x32xf32>
    %97 = arith.addf %95, %96 : vector<2x32xf32>
    %98 = math.tanh %97 : vector<2x32xf32>
    %99 = arith.mulf %94, %98 : vector<2x32xf32>
    %100 = vector.extract_strided_slice %11 {offsets = [4, 0], sizes = [2, 128], strides = [1, 1]} : vector<32x128xf32> to vector<2x128xf32>
    %101 = arith.truncf %77 : vector<2x32xf32> to vector<2x32xbf16>
    %cst_27 = arith.constant dense<0.000000e+00> : vector<2x128xf32>
    %102 = tpu.matmul %101, %0, %cst_27 {dimension_numbers = #tpu.dot_dimension_numbers<[1], [0], [0], [1], [0, 0, 1, 1], [], []>} : vector<2x32xbf16>, vector<32x128xbf16>, vector<2x128xf32> -> vector<2x128xf32>
    %103 = arith.addf %100, %102 : vector<2x128xf32>
    %104 = vector.extract_strided_slice %103 {offsets = [0, 0], sizes = [2, 96], strides = [1, 1]} : vector<2x128xf32> to vector<2x96xf32>
    %105 = arith.negf %104 : vector<2x96xf32>
    %106 = math.exp %105 : vector<2x96xf32>
    %cst_28 = arith.constant 1.000000e+00 : f32
    %107 = vector.broadcast %cst_28 : f32 to vector<2x96xf32>
    %108 = arith.addf %107, %106 : vector<2x96xf32>
    %109 = arith.divf %107, %108 : vector<2x96xf32>
    %110 = vector.extract_strided_slice %103 {offsets = [0, 96], sizes = [2, 32], strides = [1, 1]} : vector<2x128xf32> to vector<2x32xf32>
    %111 = math.tanh %110 : vector<2x32xf32>
    %112 = vector.extract_strided_slice %109 {offsets = [0, 0], sizes = [2, 32], strides = [1, 1]} : vector<2x96xf32> to vector<2x32xf32>
    %113 = vector.extract_strided_slice %109 {offsets = [0, 32], sizes = [2, 32], strides = [1, 1]} : vector<2x96xf32> to vector<2x32xf32>
    %114 = vector.extract_strided_slice %109 {offsets = [0, 64], sizes = [2, 32], strides = [1, 1]} : vector<2x96xf32> to vector<2x32xf32>
    %115 = arith.mulf %113, %75 : vector<2x32xf32>
    %116 = arith.mulf %112, %111 : vector<2x32xf32>
    %117 = arith.addf %115, %116 : vector<2x32xf32>
    %118 = math.tanh %117 : vector<2x32xf32>
    %119 = arith.mulf %114, %118 : vector<2x32xf32>
    %120 = arith.truncf %119 : vector<2x32xf32> to vector<2x32xbf16>
    %cst_29 = arith.constant dense<0.000000e+00> : vector<2x128xf32>
    %121 = tpu.matmul %120, %1, %cst_29 {dimension_numbers = #tpu.dot_dimension_numbers<[1], [0], [0], [1], [0, 0, 1, 1], [], []>} : vector<2x32xbf16>, vector<32x128xbf16>, vector<2x128xf32> -> vector<2x128xf32>
    %122 = arith.truncf %99 : vector<2x32xf32> to vector<2x32xbf16>
    %cst_30 = arith.constant dense<0.000000e+00> : vector<2x128xf32>
    %123 = tpu.matmul %122, %2, %cst_30 {dimension_numbers = #tpu.dot_dimension_numbers<[1], [0], [0], [1], [0, 0, 1, 1], [], []>} : vector<2x32xbf16>, vector<32x128xbf16>, vector<2x128xf32> -> vector<2x128xf32>
    %124 = arith.addf %121, %123 : vector<2x128xf32>
    %125 = arith.addf %124, %5 : vector<2x128xf32>
    %126 = vector.extract_strided_slice %125 {offsets = [0, 0], sizes = [2, 96], strides = [1, 1]} : vector<2x128xf32> to vector<2x96xf32>
    %127 = arith.negf %126 : vector<2x96xf32>
    %128 = math.exp %127 : vector<2x96xf32>
    %cst_31 = arith.constant 1.000000e+00 : f32
    %129 = vector.broadcast %cst_31 : f32 to vector<2x96xf32>
    %130 = arith.addf %129, %128 : vector<2x96xf32>
    %131 = arith.divf %129, %130 : vector<2x96xf32>
    %132 = vector.extract_strided_slice %125 {offsets = [0, 96], sizes = [2, 32], strides = [1, 1]} : vector<2x128xf32> to vector<2x32xf32>
    %133 = math.tanh %132 : vector<2x32xf32>
    %134 = vector.extract_strided_slice %131 {offsets = [0, 0], sizes = [2, 32], strides = [1, 1]} : vector<2x96xf32> to vector<2x32xf32>
    %135 = vector.extract_strided_slice %131 {offsets = [0, 32], sizes = [2, 32], strides = [1, 1]} : vector<2x96xf32> to vector<2x32xf32>
    %136 = vector.extract_strided_slice %131 {offsets = [0, 64], sizes = [2, 32], strides = [1, 1]} : vector<2x96xf32> to vector<2x32xf32>
    %137 = arith.mulf %135, %97 : vector<2x32xf32>
    %138 = arith.mulf %134, %133 : vector<2x32xf32>
    %139 = arith.addf %137, %138 : vector<2x32xf32>
    %140 = math.tanh %139 : vector<2x32xf32>
    %141 = arith.mulf %136, %140 : vector<2x32xf32>
    %142 = vector.extract_strided_slice %11 {offsets = [6, 0], sizes = [2, 128], strides = [1, 1]} : vector<32x128xf32> to vector<2x128xf32>
    %143 = arith.truncf %119 : vector<2x32xf32> to vector<2x32xbf16>
    %cst_32 = arith.constant dense<0.000000e+00> : vector<2x128xf32>
    %144 = tpu.matmul %143, %0, %cst_32 {dimension_numbers = #tpu.dot_dimension_numbers<[1], [0], [0], [1], [0, 0, 1, 1], [], []>} : vector<2x32xbf16>, vector<32x128xbf16>, vector<2x128xf32> -> vector<2x128xf32>
    %145 = arith.addf %142, %144 : vector<2x128xf32>
    %146 = vector.extract_strided_slice %145 {offsets = [0, 0], sizes = [2, 96], strides = [1, 1]} : vector<2x128xf32> to vector<2x96xf32>
    %147 = arith.negf %146 : vector<2x96xf32>
    %148 = math.exp %147 : vector<2x96xf32>
    %cst_33 = arith.constant 1.000000e+00 : f32
    %149 = vector.broadcast %cst_33 : f32 to vector<2x96xf32>
    %150 = arith.addf %149, %148 : vector<2x96xf32>
    %151 = arith.divf %149, %150 : vector<2x96xf32>
    %152 = vector.extract_strided_slice %145 {offsets = [0, 96], sizes = [2, 32], strides = [1, 1]} : vector<2x128xf32> to vector<2x32xf32>
    %153 = math.tanh %152 : vector<2x32xf32>
    %154 = vector.extract_strided_slice %151 {offsets = [0, 0], sizes = [2, 32], strides = [1, 1]} : vector<2x96xf32> to vector<2x32xf32>
    %155 = vector.extract_strided_slice %151 {offsets = [0, 32], sizes = [2, 32], strides = [1, 1]} : vector<2x96xf32> to vector<2x32xf32>
    %156 = vector.extract_strided_slice %151 {offsets = [0, 64], sizes = [2, 32], strides = [1, 1]} : vector<2x96xf32> to vector<2x32xf32>
    %157 = arith.mulf %155, %117 : vector<2x32xf32>
    %158 = arith.mulf %154, %153 : vector<2x32xf32>
    %159 = arith.addf %157, %158 : vector<2x32xf32>
    %160 = math.tanh %159 : vector<2x32xf32>
    %161 = arith.mulf %156, %160 : vector<2x32xf32>
    %162 = arith.truncf %161 : vector<2x32xf32> to vector<2x32xbf16>
    %cst_34 = arith.constant dense<0.000000e+00> : vector<2x128xf32>
    %163 = tpu.matmul %162, %1, %cst_34 {dimension_numbers = #tpu.dot_dimension_numbers<[1], [0], [0], [1], [0, 0, 1, 1], [], []>} : vector<2x32xbf16>, vector<32x128xbf16>, vector<2x128xf32> -> vector<2x128xf32>
    %164 = arith.truncf %141 : vector<2x32xf32> to vector<2x32xbf16>
    %cst_35 = arith.constant dense<0.000000e+00> : vector<2x128xf32>
    %165 = tpu.matmul %164, %2, %cst_35 {dimension_numbers = #tpu.dot_dimension_numbers<[1], [0], [0], [1], [0, 0, 1, 1], [], []>} : vector<2x32xbf16>, vector<32x128xbf16>, vector<2x128xf32> -> vector<2x128xf32>
    %166 = arith.addf %163, %165 : vector<2x128xf32>
    %167 = arith.addf %166, %5 : vector<2x128xf32>
    %168 = vector.extract_strided_slice %167 {offsets = [0, 0], sizes = [2, 96], strides = [1, 1]} : vector<2x128xf32> to vector<2x96xf32>
    %169 = arith.negf %168 : vector<2x96xf32>
    %170 = math.exp %169 : vector<2x96xf32>
    %cst_36 = arith.constant 1.000000e+00 : f32
    %171 = vector.broadcast %cst_36 : f32 to vector<2x96xf32>
    %172 = arith.addf %171, %170 : vector<2x96xf32>
    %173 = arith.divf %171, %172 : vector<2x96xf32>
    %174 = vector.extract_strided_slice %167 {offsets = [0, 96], sizes = [2, 32], strides = [1, 1]} : vector<2x128xf32> to vector<2x32xf32>
    %175 = math.tanh %174 : vector<2x32xf32>
    %176 = vector.extract_strided_slice %173 {offsets = [0, 0], sizes = [2, 32], strides = [1, 1]} : vector<2x96xf32> to vector<2x32xf32>
    %177 = vector.extract_strided_slice %173 {offsets = [0, 32], sizes = [2, 32], strides = [1, 1]} : vector<2x96xf32> to vector<2x32xf32>
    %178 = vector.extract_strided_slice %173 {offsets = [0, 64], sizes = [2, 32], strides = [1, 1]} : vector<2x96xf32> to vector<2x32xf32>
    %179 = arith.mulf %177, %139 : vector<2x32xf32>
    %180 = arith.mulf %176, %175 : vector<2x32xf32>
    %181 = arith.addf %179, %180 : vector<2x32xf32>
    %182 = math.tanh %181 : vector<2x32xf32>
    %183 = arith.mulf %178, %182 : vector<2x32xf32>
    %184 = vector.extract_strided_slice %11 {offsets = [8, 0], sizes = [2, 128], strides = [1, 1]} : vector<32x128xf32> to vector<2x128xf32>
    %185 = arith.truncf %161 : vector<2x32xf32> to vector<2x32xbf16>
    %cst_37 = arith.constant dense<0.000000e+00> : vector<2x128xf32>
    %186 = tpu.matmul %185, %0, %cst_37 {dimension_numbers = #tpu.dot_dimension_numbers<[1], [0], [0], [1], [0, 0, 1, 1], [], []>} : vector<2x32xbf16>, vector<32x128xbf16>, vector<2x128xf32> -> vector<2x128xf32>
    %187 = arith.addf %184, %186 : vector<2x128xf32>
    %188 = vector.extract_strided_slice %187 {offsets = [0, 0], sizes = [2, 96], strides = [1, 1]} : vector<2x128xf32> to vector<2x96xf32>
    %189 = arith.negf %188 : vector<2x96xf32>
    %190 = math.exp %189 : vector<2x96xf32>
    %cst_38 = arith.constant 1.000000e+00 : f32
    %191 = vector.broadcast %cst_38 : f32 to vector<2x96xf32>
    %192 = arith.addf %191, %190 : vector<2x96xf32>
    %193 = arith.divf %191, %192 : vector<2x96xf32>
    %194 = vector.extract_strided_slice %187 {offsets = [0, 96], sizes = [2, 32], strides = [1, 1]} : vector<2x128xf32> to vector<2x32xf32>
    %195 = math.tanh %194 : vector<2x32xf32>
    %196 = vector.extract_strided_slice %193 {offsets = [0, 0], sizes = [2, 32], strides = [1, 1]} : vector<2x96xf32> to vector<2x32xf32>
    %197 = vector.extract_strided_slice %193 {offsets = [0, 32], sizes = [2, 32], strides = [1, 1]} : vector<2x96xf32> to vector<2x32xf32>
    %198 = vector.extract_strided_slice %193 {offsets = [0, 64], sizes = [2, 32], strides = [1, 1]} : vector<2x96xf32> to vector<2x32xf32>
    %199 = arith.mulf %197, %159 : vector<2x32xf32>
    %200 = arith.mulf %196, %195 : vector<2x32xf32>
    %201 = arith.addf %199, %200 : vector<2x32xf32>
    %202 = math.tanh %201 : vector<2x32xf32>
    %203 = arith.mulf %198, %202 : vector<2x32xf32>
    %204 = arith.truncf %203 : vector<2x32xf32> to vector<2x32xbf16>
    %cst_39 = arith.constant dense<0.000000e+00> : vector<2x128xf32>
    %205 = tpu.matmul %204, %1, %cst_39 {dimension_numbers = #tpu.dot_dimension_numbers<[1], [0], [0], [1], [0, 0, 1, 1], [], []>} : vector<2x32xbf16>, vector<32x128xbf16>, vector<2x128xf32> -> vector<2x128xf32>
    %206 = arith.truncf %183 : vector<2x32xf32> to vector<2x32xbf16>
    %cst_40 = arith.constant dense<0.000000e+00> : vector<2x128xf32>
    %207 = tpu.matmul %206, %2, %cst_40 {dimension_numbers = #tpu.dot_dimension_numbers<[1], [0], [0], [1], [0, 0, 1, 1], [], []>} : vector<2x32xbf16>, vector<32x128xbf16>, vector<2x128xf32> -> vector<2x128xf32>
    %208 = arith.addf %205, %207 : vector<2x128xf32>
    %209 = arith.addf %208, %5 : vector<2x128xf32>
    %210 = vector.extract_strided_slice %209 {offsets = [0, 0], sizes = [2, 96], strides = [1, 1]} : vector<2x128xf32> to vector<2x96xf32>
    %211 = arith.negf %210 : vector<2x96xf32>
    %212 = math.exp %211 : vector<2x96xf32>
    %cst_41 = arith.constant 1.000000e+00 : f32
    %213 = vector.broadcast %cst_41 : f32 to vector<2x96xf32>
    %214 = arith.addf %213, %212 : vector<2x96xf32>
    %215 = arith.divf %213, %214 : vector<2x96xf32>
    %216 = vector.extract_strided_slice %209 {offsets = [0, 96], sizes = [2, 32], strides = [1, 1]} : vector<2x128xf32> to vector<2x32xf32>
    %217 = math.tanh %216 : vector<2x32xf32>
    %218 = vector.extract_strided_slice %215 {offsets = [0, 0], sizes = [2, 32], strides = [1, 1]} : vector<2x96xf32> to vector<2x32xf32>
    %219 = vector.extract_strided_slice %215 {offsets = [0, 32], sizes = [2, 32], strides = [1, 1]} : vector<2x96xf32> to vector<2x32xf32>
    %220 = vector.extract_strided_slice %215 {offsets = [0, 64], sizes = [2, 32], strides = [1, 1]} : vector<2x96xf32> to vector<2x32xf32>
    %221 = arith.mulf %219, %181 : vector<2x32xf32>
    %222 = arith.mulf %218, %217 : vector<2x32xf32>
    %223 = arith.addf %221, %222 : vector<2x32xf32>
    %224 = math.tanh %223 : vector<2x32xf32>
    %225 = arith.mulf %220, %224 : vector<2x32xf32>
    %226 = vector.extract_strided_slice %11 {offsets = [10, 0], sizes = [2, 128], strides = [1, 1]} : vector<32x128xf32> to vector<2x128xf32>
    %227 = arith.truncf %203 : vector<2x32xf32> to vector<2x32xbf16>
    %cst_42 = arith.constant dense<0.000000e+00> : vector<2x128xf32>
    %228 = tpu.matmul %227, %0, %cst_42 {dimension_numbers = #tpu.dot_dimension_numbers<[1], [0], [0], [1], [0, 0, 1, 1], [], []>} : vector<2x32xbf16>, vector<32x128xbf16>, vector<2x128xf32> -> vector<2x128xf32>
    %229 = arith.addf %226, %228 : vector<2x128xf32>
    %230 = vector.extract_strided_slice %229 {offsets = [0, 0], sizes = [2, 96], strides = [1, 1]} : vector<2x128xf32> to vector<2x96xf32>
    %231 = arith.negf %230 : vector<2x96xf32>
    %232 = math.exp %231 : vector<2x96xf32>
    %cst_43 = arith.constant 1.000000e+00 : f32
    %233 = vector.broadcast %cst_43 : f32 to vector<2x96xf32>
    %234 = arith.addf %233, %232 : vector<2x96xf32>
    %235 = arith.divf %233, %234 : vector<2x96xf32>
    %236 = vector.extract_strided_slice %229 {offsets = [0, 96], sizes = [2, 32], strides = [1, 1]} : vector<2x128xf32> to vector<2x32xf32>
    %237 = math.tanh %236 : vector<2x32xf32>
    %238 = vector.extract_strided_slice %235 {offsets = [0, 0], sizes = [2, 32], strides = [1, 1]} : vector<2x96xf32> to vector<2x32xf32>
    %239 = vector.extract_strided_slice %235 {offsets = [0, 32], sizes = [2, 32], strides = [1, 1]} : vector<2x96xf32> to vector<2x32xf32>
    %240 = vector.extract_strided_slice %235 {offsets = [0, 64], sizes = [2, 32], strides = [1, 1]} : vector<2x96xf32> to vector<2x32xf32>
    %241 = arith.mulf %239, %201 : vector<2x32xf32>
    %242 = arith.mulf %238, %237 : vector<2x32xf32>
    %243 = arith.addf %241, %242 : vector<2x32xf32>
    %244 = math.tanh %243 : vector<2x32xf32>
    %245 = arith.mulf %240, %244 : vector<2x32xf32>
    %246 = arith.truncf %245 : vector<2x32xf32> to vector<2x32xbf16>
    %cst_44 = arith.constant dense<0.000000e+00> : vector<2x128xf32>
    %247 = tpu.matmul %246, %1, %cst_44 {dimension_numbers = #tpu.dot_dimension_numbers<[1], [0], [0], [1], [0, 0, 1, 1], [], []>} : vector<2x32xbf16>, vector<32x128xbf16>, vector<2x128xf32> -> vector<2x128xf32>
    %248 = arith.truncf %225 : vector<2x32xf32> to vector<2x32xbf16>
    %cst_45 = arith.constant dense<0.000000e+00> : vector<2x128xf32>
    %249 = tpu.matmul %248, %2, %cst_45 {dimension_numbers = #tpu.dot_dimension_numbers<[1], [0], [0], [1], [0, 0, 1, 1], [], []>} : vector<2x32xbf16>, vector<32x128xbf16>, vector<2x128xf32> -> vector<2x128xf32>
    %250 = arith.addf %247, %249 : vector<2x128xf32>
    %251 = arith.addf %250, %5 : vector<2x128xf32>
    %252 = vector.extract_strided_slice %251 {offsets = [0, 0], sizes = [2, 96], strides = [1, 1]} : vector<2x128xf32> to vector<2x96xf32>
    %253 = arith.negf %252 : vector<2x96xf32>
    %254 = math.exp %253 : vector<2x96xf32>
    %cst_46 = arith.constant 1.000000e+00 : f32
    %255 = vector.broadcast %cst_46 : f32 to vector<2x96xf32>
    %256 = arith.addf %255, %254 : vector<2x96xf32>
    %257 = arith.divf %255, %256 : vector<2x96xf32>
    %258 = vector.extract_strided_slice %251 {offsets = [0, 96], sizes = [2, 32], strides = [1, 1]} : vector<2x128xf32> to vector<2x32xf32>
    %259 = math.tanh %258 : vector<2x32xf32>
    %260 = vector.extract_strided_slice %257 {offsets = [0, 0], sizes = [2, 32], strides = [1, 1]} : vector<2x96xf32> to vector<2x32xf32>
    %261 = vector.extract_strided_slice %257 {offsets = [0, 32], sizes = [2, 32], strides = [1, 1]} : vector<2x96xf32> to vector<2x32xf32>
    %262 = vector.extract_strided_slice %257 {offsets = [0, 64], sizes = [2, 32], strides = [1, 1]} : vector<2x96xf32> to vector<2x32xf32>
    %263 = arith.mulf %261, %223 : vector<2x32xf32>
    %264 = arith.mulf %260, %259 : vector<2x32xf32>
    %265 = arith.addf %263, %264 : vector<2x32xf32>
    %266 = math.tanh %265 : vector<2x32xf32>
    %267 = arith.mulf %262, %266 : vector<2x32xf32>
    %268 = vector.extract_strided_slice %11 {offsets = [12, 0], sizes = [2, 128], strides = [1, 1]} : vector<32x128xf32> to vector<2x128xf32>
    %269 = arith.truncf %245 : vector<2x32xf32> to vector<2x32xbf16>
    %cst_47 = arith.constant dense<0.000000e+00> : vector<2x128xf32>
    %270 = tpu.matmul %269, %0, %cst_47 {dimension_numbers = #tpu.dot_dimension_numbers<[1], [0], [0], [1], [0, 0, 1, 1], [], []>} : vector<2x32xbf16>, vector<32x128xbf16>, vector<2x128xf32> -> vector<2x128xf32>
    %271 = arith.addf %268, %270 : vector<2x128xf32>
    %272 = vector.extract_strided_slice %271 {offsets = [0, 0], sizes = [2, 96], strides = [1, 1]} : vector<2x128xf32> to vector<2x96xf32>
    %273 = arith.negf %272 : vector<2x96xf32>
    %274 = math.exp %273 : vector<2x96xf32>
    %cst_48 = arith.constant 1.000000e+00 : f32
    %275 = vector.broadcast %cst_48 : f32 to vector<2x96xf32>
    %276 = arith.addf %275, %274 : vector<2x96xf32>
    %277 = arith.divf %275, %276 : vector<2x96xf32>
    %278 = vector.extract_strided_slice %271 {offsets = [0, 96], sizes = [2, 32], strides = [1, 1]} : vector<2x128xf32> to vector<2x32xf32>
    %279 = math.tanh %278 : vector<2x32xf32>
    %280 = vector.extract_strided_slice %277 {offsets = [0, 0], sizes = [2, 32], strides = [1, 1]} : vector<2x96xf32> to vector<2x32xf32>
    %281 = vector.extract_strided_slice %277 {offsets = [0, 32], sizes = [2, 32], strides = [1, 1]} : vector<2x96xf32> to vector<2x32xf32>
    %282 = vector.extract_strided_slice %277 {offsets = [0, 64], sizes = [2, 32], strides = [1, 1]} : vector<2x96xf32> to vector<2x32xf32>
    %283 = arith.mulf %281, %243 : vector<2x32xf32>
    %284 = arith.mulf %280, %279 : vector<2x32xf32>
    %285 = arith.addf %283, %284 : vector<2x32xf32>
    %286 = math.tanh %285 : vector<2x32xf32>
    %287 = arith.mulf %282, %286 : vector<2x32xf32>
    %288 = arith.truncf %287 : vector<2x32xf32> to vector<2x32xbf16>
    %cst_49 = arith.constant dense<0.000000e+00> : vector<2x128xf32>
    %289 = tpu.matmul %288, %1, %cst_49 {dimension_numbers = #tpu.dot_dimension_numbers<[1], [0], [0], [1], [0, 0, 1, 1], [], []>} : vector<2x32xbf16>, vector<32x128xbf16>, vector<2x128xf32> -> vector<2x128xf32>
    %290 = arith.truncf %267 : vector<2x32xf32> to vector<2x32xbf16>
    %cst_50 = arith.constant dense<0.000000e+00> : vector<2x128xf32>
    %291 = tpu.matmul %290, %2, %cst_50 {dimension_numbers = #tpu.dot_dimension_numbers<[1], [0], [0], [1], [0, 0, 1, 1], [], []>} : vector<2x32xbf16>, vector<32x128xbf16>, vector<2x128xf32> -> vector<2x128xf32>
    %292 = arith.addf %289, %291 : vector<2x128xf32>
    %293 = arith.addf %292, %5 : vector<2x128xf32>
    %294 = vector.extract_strided_slice %293 {offsets = [0, 0], sizes = [2, 96], strides = [1, 1]} : vector<2x128xf32> to vector<2x96xf32>
    %295 = arith.negf %294 : vector<2x96xf32>
    %296 = math.exp %295 : vector<2x96xf32>
    %cst_51 = arith.constant 1.000000e+00 : f32
    %297 = vector.broadcast %cst_51 : f32 to vector<2x96xf32>
    %298 = arith.addf %297, %296 : vector<2x96xf32>
    %299 = arith.divf %297, %298 : vector<2x96xf32>
    %300 = vector.extract_strided_slice %293 {offsets = [0, 96], sizes = [2, 32], strides = [1, 1]} : vector<2x128xf32> to vector<2x32xf32>
    %301 = math.tanh %300 : vector<2x32xf32>
    %302 = vector.extract_strided_slice %299 {offsets = [0, 0], sizes = [2, 32], strides = [1, 1]} : vector<2x96xf32> to vector<2x32xf32>
    %303 = vector.extract_strided_slice %299 {offsets = [0, 32], sizes = [2, 32], strides = [1, 1]} : vector<2x96xf32> to vector<2x32xf32>
    %304 = vector.extract_strided_slice %299 {offsets = [0, 64], sizes = [2, 32], strides = [1, 1]} : vector<2x96xf32> to vector<2x32xf32>
    %305 = arith.mulf %303, %265 : vector<2x32xf32>
    %306 = arith.mulf %302, %301 : vector<2x32xf32>
    %307 = arith.addf %305, %306 : vector<2x32xf32>
    %308 = math.tanh %307 : vector<2x32xf32>
    %309 = arith.mulf %304, %308 : vector<2x32xf32>
    %310 = vector.extract_strided_slice %11 {offsets = [14, 0], sizes = [2, 128], strides = [1, 1]} : vector<32x128xf32> to vector<2x128xf32>
    %311 = arith.truncf %287 : vector<2x32xf32> to vector<2x32xbf16>
    %cst_52 = arith.constant dense<0.000000e+00> : vector<2x128xf32>
    %312 = tpu.matmul %311, %0, %cst_52 {dimension_numbers = #tpu.dot_dimension_numbers<[1], [0], [0], [1], [0, 0, 1, 1], [], []>} : vector<2x32xbf16>, vector<32x128xbf16>, vector<2x128xf32> -> vector<2x128xf32>
    %313 = arith.addf %310, %312 : vector<2x128xf32>
    %314 = vector.extract_strided_slice %313 {offsets = [0, 0], sizes = [2, 96], strides = [1, 1]} : vector<2x128xf32> to vector<2x96xf32>
    %315 = arith.negf %314 : vector<2x96xf32>
    %316 = math.exp %315 : vector<2x96xf32>
    %cst_53 = arith.constant 1.000000e+00 : f32
    %317 = vector.broadcast %cst_53 : f32 to vector<2x96xf32>
    %318 = arith.addf %317, %316 : vector<2x96xf32>
    %319 = arith.divf %317, %318 : vector<2x96xf32>
    %320 = vector.extract_strided_slice %313 {offsets = [0, 96], sizes = [2, 32], strides = [1, 1]} : vector<2x128xf32> to vector<2x32xf32>
    %321 = math.tanh %320 : vector<2x32xf32>
    %322 = vector.extract_strided_slice %319 {offsets = [0, 0], sizes = [2, 32], strides = [1, 1]} : vector<2x96xf32> to vector<2x32xf32>
    %323 = vector.extract_strided_slice %319 {offsets = [0, 32], sizes = [2, 32], strides = [1, 1]} : vector<2x96xf32> to vector<2x32xf32>
    %324 = vector.extract_strided_slice %319 {offsets = [0, 64], sizes = [2, 32], strides = [1, 1]} : vector<2x96xf32> to vector<2x32xf32>
    %325 = arith.mulf %323, %285 : vector<2x32xf32>
    %326 = arith.mulf %322, %321 : vector<2x32xf32>
    %327 = arith.addf %325, %326 : vector<2x32xf32>
    %328 = math.tanh %327 : vector<2x32xf32>
    %329 = arith.mulf %324, %328 : vector<2x32xf32>
    %330 = arith.truncf %329 : vector<2x32xf32> to vector<2x32xbf16>
    %cst_54 = arith.constant dense<0.000000e+00> : vector<2x128xf32>
    %331 = tpu.matmul %330, %1, %cst_54 {dimension_numbers = #tpu.dot_dimension_numbers<[1], [0], [0], [1], [0, 0, 1, 1], [], []>} : vector<2x32xbf16>, vector<32x128xbf16>, vector<2x128xf32> -> vector<2x128xf32>
    %332 = arith.truncf %309 : vector<2x32xf32> to vector<2x32xbf16>
    %cst_55 = arith.constant dense<0.000000e+00> : vector<2x128xf32>
    %333 = tpu.matmul %332, %2, %cst_55 {dimension_numbers = #tpu.dot_dimension_numbers<[1], [0], [0], [1], [0, 0, 1, 1], [], []>} : vector<2x32xbf16>, vector<32x128xbf16>, vector<2x128xf32> -> vector<2x128xf32>
    %334 = arith.addf %331, %333 : vector<2x128xf32>
    %335 = arith.addf %334, %5 : vector<2x128xf32>
    %336 = vector.extract_strided_slice %335 {offsets = [0, 0], sizes = [2, 96], strides = [1, 1]} : vector<2x128xf32> to vector<2x96xf32>
    %337 = arith.negf %336 : vector<2x96xf32>
    %338 = math.exp %337 : vector<2x96xf32>
    %cst_56 = arith.constant 1.000000e+00 : f32
    %339 = vector.broadcast %cst_56 : f32 to vector<2x96xf32>
    %340 = arith.addf %339, %338 : vector<2x96xf32>
    %341 = arith.divf %339, %340 : vector<2x96xf32>
    %342 = vector.extract_strided_slice %335 {offsets = [0, 96], sizes = [2, 32], strides = [1, 1]} : vector<2x128xf32> to vector<2x32xf32>
    %343 = math.tanh %342 : vector<2x32xf32>
    %344 = vector.extract_strided_slice %341 {offsets = [0, 0], sizes = [2, 32], strides = [1, 1]} : vector<2x96xf32> to vector<2x32xf32>
    %345 = vector.extract_strided_slice %341 {offsets = [0, 32], sizes = [2, 32], strides = [1, 1]} : vector<2x96xf32> to vector<2x32xf32>
    %346 = vector.extract_strided_slice %341 {offsets = [0, 64], sizes = [2, 32], strides = [1, 1]} : vector<2x96xf32> to vector<2x32xf32>
    %347 = arith.mulf %345, %307 : vector<2x32xf32>
    %348 = arith.mulf %344, %343 : vector<2x32xf32>
    %349 = arith.addf %347, %348 : vector<2x32xf32>
    %350 = math.tanh %349 : vector<2x32xf32>
    %351 = arith.mulf %346, %350 : vector<2x32xf32>
    %352 = vector.extract_strided_slice %11 {offsets = [16, 0], sizes = [2, 128], strides = [1, 1]} : vector<32x128xf32> to vector<2x128xf32>
    %353 = arith.truncf %329 : vector<2x32xf32> to vector<2x32xbf16>
    %cst_57 = arith.constant dense<0.000000e+00> : vector<2x128xf32>
    %354 = tpu.matmul %353, %0, %cst_57 {dimension_numbers = #tpu.dot_dimension_numbers<[1], [0], [0], [1], [0, 0, 1, 1], [], []>} : vector<2x32xbf16>, vector<32x128xbf16>, vector<2x128xf32> -> vector<2x128xf32>
    %355 = arith.addf %352, %354 : vector<2x128xf32>
    %356 = vector.extract_strided_slice %355 {offsets = [0, 0], sizes = [2, 96], strides = [1, 1]} : vector<2x128xf32> to vector<2x96xf32>
    %357 = arith.negf %356 : vector<2x96xf32>
    %358 = math.exp %357 : vector<2x96xf32>
    %cst_58 = arith.constant 1.000000e+00 : f32
    %359 = vector.broadcast %cst_58 : f32 to vector<2x96xf32>
    %360 = arith.addf %359, %358 : vector<2x96xf32>
    %361 = arith.divf %359, %360 : vector<2x96xf32>
    %362 = vector.extract_strided_slice %355 {offsets = [0, 96], sizes = [2, 32], strides = [1, 1]} : vector<2x128xf32> to vector<2x32xf32>
    %363 = math.tanh %362 : vector<2x32xf32>
    %364 = vector.extract_strided_slice %361 {offsets = [0, 0], sizes = [2, 32], strides = [1, 1]} : vector<2x96xf32> to vector<2x32xf32>
    %365 = vector.extract_strided_slice %361 {offsets = [0, 32], sizes = [2, 32], strides = [1, 1]} : vector<2x96xf32> to vector<2x32xf32>
    %366 = vector.extract_strided_slice %361 {offsets = [0, 64], sizes = [2, 32], strides = [1, 1]} : vector<2x96xf32> to vector<2x32xf32>
    %367 = arith.mulf %365, %327 : vector<2x32xf32>
    %368 = arith.mulf %364, %363 : vector<2x32xf32>
    %369 = arith.addf %367, %368 : vector<2x32xf32>
    %370 = math.tanh %369 : vector<2x32xf32>
    %371 = arith.mulf %366, %370 : vector<2x32xf32>
    %372 = arith.truncf %371 : vector<2x32xf32> to vector<2x32xbf16>
    %cst_59 = arith.constant dense<0.000000e+00> : vector<2x128xf32>
    %373 = tpu.matmul %372, %1, %cst_59 {dimension_numbers = #tpu.dot_dimension_numbers<[1], [0], [0], [1], [0, 0, 1, 1], [], []>} : vector<2x32xbf16>, vector<32x128xbf16>, vector<2x128xf32> -> vector<2x128xf32>
    %374 = arith.truncf %351 : vector<2x32xf32> to vector<2x32xbf16>
    %cst_60 = arith.constant dense<0.000000e+00> : vector<2x128xf32>
    %375 = tpu.matmul %374, %2, %cst_60 {dimension_numbers = #tpu.dot_dimension_numbers<[1], [0], [0], [1], [0, 0, 1, 1], [], []>} : vector<2x32xbf16>, vector<32x128xbf16>, vector<2x128xf32> -> vector<2x128xf32>
    %376 = arith.addf %373, %375 : vector<2x128xf32>
    %377 = arith.addf %376, %5 : vector<2x128xf32>
    %378 = vector.extract_strided_slice %377 {offsets = [0, 0], sizes = [2, 96], strides = [1, 1]} : vector<2x128xf32> to vector<2x96xf32>
    %379 = arith.negf %378 : vector<2x96xf32>
    %380 = math.exp %379 : vector<2x96xf32>
    %cst_61 = arith.constant 1.000000e+00 : f32
    %381 = vector.broadcast %cst_61 : f32 to vector<2x96xf32>
    %382 = arith.addf %381, %380 : vector<2x96xf32>
    %383 = arith.divf %381, %382 : vector<2x96xf32>
    %384 = vector.extract_strided_slice %377 {offsets = [0, 96], sizes = [2, 32], strides = [1, 1]} : vector<2x128xf32> to vector<2x32xf32>
    %385 = math.tanh %384 : vector<2x32xf32>
    %386 = vector.extract_strided_slice %383 {offsets = [0, 0], sizes = [2, 32], strides = [1, 1]} : vector<2x96xf32> to vector<2x32xf32>
    %387 = vector.extract_strided_slice %383 {offsets = [0, 32], sizes = [2, 32], strides = [1, 1]} : vector<2x96xf32> to vector<2x32xf32>
    %388 = vector.extract_strided_slice %383 {offsets = [0, 64], sizes = [2, 32], strides = [1, 1]} : vector<2x96xf32> to vector<2x32xf32>
    %389 = arith.mulf %387, %349 : vector<2x32xf32>
    %390 = arith.mulf %386, %385 : vector<2x32xf32>
    %391 = arith.addf %389, %390 : vector<2x32xf32>
    %392 = math.tanh %391 : vector<2x32xf32>
    %393 = arith.mulf %388, %392 : vector<2x32xf32>
    %c0_62 = arith.constant 0 : index
    %c0_63 = arith.constant 0 : index
    %c0_64 = arith.constant 0 : index
    %394 = vector.load %arg12[%c0_62, %c0_63, %c0_64] : memref<8x2x32xf32, #tpu.memory_space<vmem>>, vector<1x2x32xf32>
    %395 = vector.shape_cast %394 : vector<1x2x32xf32> to vector<2x32xf32>
    %396 = vector.shape_cast %393 : vector<2x32xf32> to vector<1x2x32xf32>
    tpu.vector_store %arg12[%c0_62, %c0_63, %c0_64], %396 {strides = array<i32>} : memref<8x2x32xf32, #tpu.memory_space<vmem>>, vector<1x2x32xf32>,
    %397 = vector.extract_strided_slice %11 {offsets = [18, 0], sizes = [2, 128], strides = [1, 1]} : vector<32x128xf32> to vector<2x128xf32>
    %398 = arith.truncf %371 : vector<2x32xf32> to vector<2x32xbf16>
    %cst_65 = arith.constant dense<0.000000e+00> : vector<2x128xf32>
    %399 = tpu.matmul %398, %0, %cst_65 {dimension_numbers = #tpu.dot_dimension_numbers<[1], [0], [0], [1], [0, 0, 1, 1], [], []>} : vector<2x32xbf16>, vector<32x128xbf16>, vector<2x128xf32> -> vector<2x128xf32>
    %400 = arith.addf %397, %399 : vector<2x128xf32>
    %401 = vector.extract_strided_slice %400 {offsets = [0, 0], sizes = [2, 96], strides = [1, 1]} : vector<2x128xf32> to vector<2x96xf32>
    %402 = arith.negf %401 : vector<2x96xf32>
    %403 = math.exp %402 : vector<2x96xf32>
    %cst_66 = arith.constant 1.000000e+00 : f32
    %404 = vector.broadcast %cst_66 : f32 to vector<2x96xf32>
    %405 = arith.addf %404, %403 : vector<2x96xf32>
    %406 = arith.divf %404, %405 : vector<2x96xf32>
    %407 = vector.extract_strided_slice %400 {offsets = [0, 96], sizes = [2, 32], strides = [1, 1]} : vector<2x128xf32> to vector<2x32xf32>
    %408 = math.tanh %407 : vector<2x32xf32>
    %409 = vector.extract_strided_slice %406 {offsets = [0, 0], sizes = [2, 32], strides = [1, 1]} : vector<2x96xf32> to vector<2x32xf32>
    %410 = vector.extract_strided_slice %406 {offsets = [0, 32], sizes = [2, 32], strides = [1, 1]} : vector<2x96xf32> to vector<2x32xf32>
    %411 = vector.extract_strided_slice %406 {offsets = [0, 64], sizes = [2, 32], strides = [1, 1]} : vector<2x96xf32> to vector<2x32xf32>
    %412 = arith.mulf %410, %369 : vector<2x32xf32>
    %413 = arith.mulf %409, %408 : vector<2x32xf32>
    %414 = arith.addf %412, %413 : vector<2x32xf32>
    %415 = math.tanh %414 : vector<2x32xf32>
    %416 = arith.mulf %411, %415 : vector<2x32xf32>
    %417 = arith.truncf %416 : vector<2x32xf32> to vector<2x32xbf16>
    %cst_67 = arith.constant dense<0.000000e+00> : vector<2x128xf32>
    %418 = tpu.matmul %417, %1, %cst_67 {dimension_numbers = #tpu.dot_dimension_numbers<[1], [0], [0], [1], [0, 0, 1, 1], [], []>} : vector<2x32xbf16>, vector<32x128xbf16>, vector<2x128xf32> -> vector<2x128xf32>
    %419 = arith.truncf %393 : vector<2x32xf32> to vector<2x32xbf16>
    %cst_68 = arith.constant dense<0.000000e+00> : vector<2x128xf32>
    %420 = tpu.matmul %419, %2, %cst_68 {dimension_numbers = #tpu.dot_dimension_numbers<[1], [0], [0], [1], [0, 0, 1, 1], [], []>} : vector<2x32xbf16>, vector<32x128xbf16>, vector<2x128xf32> -> vector<2x128xf32>
    %421 = arith.addf %418, %420 : vector<2x128xf32>
    %422 = arith.addf %421, %5 : vector<2x128xf32>
    %423 = vector.extract_strided_slice %422 {offsets = [0, 0], sizes = [2, 96], strides = [1, 1]} : vector<2x128xf32> to vector<2x96xf32>
    %424 = arith.negf %423 : vector<2x96xf32>
    %425 = math.exp %424 : vector<2x96xf32>
    %cst_69 = arith.constant 1.000000e+00 : f32
    %426 = vector.broadcast %cst_69 : f32 to vector<2x96xf32>
    %427 = arith.addf %426, %425 : vector<2x96xf32>
    %428 = arith.divf %426, %427 : vector<2x96xf32>
    %429 = vector.extract_strided_slice %422 {offsets = [0, 96], sizes = [2, 32], strides = [1, 1]} : vector<2x128xf32> to vector<2x32xf32>
    %430 = math.tanh %429 : vector<2x32xf32>
    %431 = vector.extract_strided_slice %428 {offsets = [0, 0], sizes = [2, 32], strides = [1, 1]} : vector<2x96xf32> to vector<2x32xf32>
    %432 = vector.extract_strided_slice %428 {offsets = [0, 32], sizes = [2, 32], strides = [1, 1]} : vector<2x96xf32> to vector<2x32xf32>
    %433 = vector.extract_strided_slice %428 {offsets = [0, 64], sizes = [2, 32], strides = [1, 1]} : vector<2x96xf32> to vector<2x32xf32>
    %434 = arith.mulf %432, %391 : vector<2x32xf32>
    %435 = arith.mulf %431, %430 : vector<2x32xf32>
    %436 = arith.addf %434, %435 : vector<2x32xf32>
    %437 = math.tanh %436 : vector<2x32xf32>
    %438 = arith.mulf %433, %437 : vector<2x32xf32>
    %c1 = arith.constant 1 : index
    %c0_70 = arith.constant 0 : index
    %c0_71 = arith.constant 0 : index
    %439 = vector.load %arg12[%c1, %c0_70, %c0_71] : memref<8x2x32xf32, #tpu.memory_space<vmem>>, vector<1x2x32xf32>
    %440 = vector.shape_cast %439 : vector<1x2x32xf32> to vector<2x32xf32>
    %441 = vector.shape_cast %438 : vector<2x32xf32> to vector<1x2x32xf32>
    tpu.vector_store %arg12[%c1, %c0_70, %c0_71], %441 {strides = array<i32>} : memref<8x2x32xf32, #tpu.memory_space<vmem>>, vector<1x2x32xf32>,
    %442 = vector.extract_strided_slice %11 {offsets = [20, 0], sizes = [2, 128], strides = [1, 1]} : vector<32x128xf32> to vector<2x128xf32>
    %443 = arith.truncf %416 : vector<2x32xf32> to vector<2x32xbf16>
    %cst_72 = arith.constant dense<0.000000e+00> : vector<2x128xf32>
    %444 = tpu.matmul %443, %0, %cst_72 {dimension_numbers = #tpu.dot_dimension_numbers<[1], [0], [0], [1], [0, 0, 1, 1], [], []>} : vector<2x32xbf16>, vector<32x128xbf16>, vector<2x128xf32> -> vector<2x128xf32>
    %445 = arith.addf %442, %444 : vector<2x128xf32>
    %446 = vector.extract_strided_slice %445 {offsets = [0, 0], sizes = [2, 96], strides = [1, 1]} : vector<2x128xf32> to vector<2x96xf32>
    %447 = arith.negf %446 : vector<2x96xf32>
    %448 = math.exp %447 : vector<2x96xf32>
    %cst_73 = arith.constant 1.000000e+00 : f32
    %449 = vector.broadcast %cst_73 : f32 to vector<2x96xf32>
    %450 = arith.addf %449, %448 : vector<2x96xf32>
    %451 = arith.divf %449, %450 : vector<2x96xf32>
    %452 = vector.extract_strided_slice %445 {offsets = [0, 96], sizes = [2, 32], strides = [1, 1]} : vector<2x128xf32> to vector<2x32xf32>
    %453 = math.tanh %452 : vector<2x32xf32>
    %454 = vector.extract_strided_slice %451 {offsets = [0, 0], sizes = [2, 32], strides = [1, 1]} : vector<2x96xf32> to vector<2x32xf32>
    %455 = vector.extract_strided_slice %451 {offsets = [0, 32], sizes = [2, 32], strides = [1, 1]} : vector<2x96xf32> to vector<2x32xf32>
    %456 = vector.extract_strided_slice %451 {offsets = [0, 64], sizes = [2, 32], strides = [1, 1]} : vector<2x96xf32> to vector<2x32xf32>
    %457 = arith.mulf %455, %414 : vector<2x32xf32>
    %458 = arith.mulf %454, %453 : vector<2x32xf32>
    %459 = arith.addf %457, %458 : vector<2x32xf32>
    %460 = math.tanh %459 : vector<2x32xf32>
    %461 = arith.mulf %456, %460 : vector<2x32xf32>
    %462 = arith.truncf %461 : vector<2x32xf32> to vector<2x32xbf16>
    %cst_74 = arith.constant dense<0.000000e+00> : vector<2x128xf32>
    %463 = tpu.matmul %462, %1, %cst_74 {dimension_numbers = #tpu.dot_dimension_numbers<[1], [0], [0], [1], [0, 0, 1, 1], [], []>} : vector<2x32xbf16>, vector<32x128xbf16>, vector<2x128xf32> -> vector<2x128xf32>
    %464 = arith.truncf %438 : vector<2x32xf32> to vector<2x32xbf16>
    %cst_75 = arith.constant dense<0.000000e+00> : vector<2x128xf32>
    %465 = tpu.matmul %464, %2, %cst_75 {dimension_numbers = #tpu.dot_dimension_numbers<[1], [0], [0], [1], [0, 0, 1, 1], [], []>} : vector<2x32xbf16>, vector<32x128xbf16>, vector<2x128xf32> -> vector<2x128xf32>
    %466 = arith.addf %463, %465 : vector<2x128xf32>
    %467 = arith.addf %466, %5 : vector<2x128xf32>
    %468 = vector.extract_strided_slice %467 {offsets = [0, 0], sizes = [2, 96], strides = [1, 1]} : vector<2x128xf32> to vector<2x96xf32>
    %469 = arith.negf %468 : vector<2x96xf32>
    %470 = math.exp %469 : vector<2x96xf32>
    %cst_76 = arith.constant 1.000000e+00 : f32
    %471 = vector.broadcast %cst_76 : f32 to vector<2x96xf32>
    %472 = arith.addf %471, %470 : vector<2x96xf32>
    %473 = arith.divf %471, %472 : vector<2x96xf32>
    %474 = vector.extract_strided_slice %467 {offsets = [0, 96], sizes = [2, 32], strides = [1, 1]} : vector<2x128xf32> to vector<2x32xf32>
    %475 = math.tanh %474 : vector<2x32xf32>
    %476 = vector.extract_strided_slice %473 {offsets = [0, 0], sizes = [2, 32], strides = [1, 1]} : vector<2x96xf32> to vector<2x32xf32>
    %477 = vector.extract_strided_slice %473 {offsets = [0, 32], sizes = [2, 32], strides = [1, 1]} : vector<2x96xf32> to vector<2x32xf32>
    %478 = vector.extract_strided_slice %473 {offsets = [0, 64], sizes = [2, 32], strides = [1, 1]} : vector<2x96xf32> to vector<2x32xf32>
    %479 = arith.mulf %477, %436 : vector<2x32xf32>
    %480 = arith.mulf %476, %475 : vector<2x32xf32>
    %481 = arith.addf %479, %480 : vector<2x32xf32>
    %482 = math.tanh %481 : vector<2x32xf32>
    %483 = arith.mulf %478, %482 : vector<2x32xf32>
    %c2 = arith.constant 2 : index
    %c0_77 = arith.constant 0 : index
    %c0_78 = arith.constant 0 : index
    %484 = vector.load %arg12[%c2, %c0_77, %c0_78] : memref<8x2x32xf32, #tpu.memory_space<vmem>>, vector<1x2x32xf32>
    %485 = vector.shape_cast %484 : vector<1x2x32xf32> to vector<2x32xf32>
    %486 = vector.shape_cast %483 : vector<2x32xf32> to vector<1x2x32xf32>
    tpu.vector_store %arg12[%c2, %c0_77, %c0_78], %486 {strides = array<i32>} : memref<8x2x32xf32, #tpu.memory_space<vmem>>, vector<1x2x32xf32>,
    %487 = vector.extract_strided_slice %11 {offsets = [22, 0], sizes = [2, 128], strides = [1, 1]} : vector<32x128xf32> to vector<2x128xf32>
    %488 = arith.truncf %461 : vector<2x32xf32> to vector<2x32xbf16>
    %cst_79 = arith.constant dense<0.000000e+00> : vector<2x128xf32>
    %489 = tpu.matmul %488, %0, %cst_79 {dimension_numbers = #tpu.dot_dimension_numbers<[1], [0], [0], [1], [0, 0, 1, 1], [], []>} : vector<2x32xbf16>, vector<32x128xbf16>, vector<2x128xf32> -> vector<2x128xf32>
    %490 = arith.addf %487, %489 : vector<2x128xf32>
    %491 = vector.extract_strided_slice %490 {offsets = [0, 0], sizes = [2, 96], strides = [1, 1]} : vector<2x128xf32> to vector<2x96xf32>
    %492 = arith.negf %491 : vector<2x96xf32>
    %493 = math.exp %492 : vector<2x96xf32>
    %cst_80 = arith.constant 1.000000e+00 : f32
    %494 = vector.broadcast %cst_80 : f32 to vector<2x96xf32>
    %495 = arith.addf %494, %493 : vector<2x96xf32>
    %496 = arith.divf %494, %495 : vector<2x96xf32>
    %497 = vector.extract_strided_slice %490 {offsets = [0, 96], sizes = [2, 32], strides = [1, 1]} : vector<2x128xf32> to vector<2x32xf32>
    %498 = math.tanh %497 : vector<2x32xf32>
    %499 = vector.extract_strided_slice %496 {offsets = [0, 0], sizes = [2, 32], strides = [1, 1]} : vector<2x96xf32> to vector<2x32xf32>
    %500 = vector.extract_strided_slice %496 {offsets = [0, 32], sizes = [2, 32], strides = [1, 1]} : vector<2x96xf32> to vector<2x32xf32>
    %501 = vector.extract_strided_slice %496 {offsets = [0, 64], sizes = [2, 32], strides = [1, 1]} : vector<2x96xf32> to vector<2x32xf32>
    %502 = arith.mulf %500, %459 : vector<2x32xf32>
    %503 = arith.mulf %499, %498 : vector<2x32xf32>
    %504 = arith.addf %502, %503 : vector<2x32xf32>
    %505 = math.tanh %504 : vector<2x32xf32>
    %506 = arith.mulf %501, %505 : vector<2x32xf32>
    %507 = arith.truncf %506 : vector<2x32xf32> to vector<2x32xbf16>
    %cst_81 = arith.constant dense<0.000000e+00> : vector<2x128xf32>
    %508 = tpu.matmul %507, %1, %cst_81 {dimension_numbers = #tpu.dot_dimension_numbers<[1], [0], [0], [1], [0, 0, 1, 1], [], []>} : vector<2x32xbf16>, vector<32x128xbf16>, vector<2x128xf32> -> vector<2x128xf32>
    %509 = arith.truncf %483 : vector<2x32xf32> to vector<2x32xbf16>
    %cst_82 = arith.constant dense<0.000000e+00> : vector<2x128xf32>
    %510 = tpu.matmul %509, %2, %cst_82 {dimension_numbers = #tpu.dot_dimension_numbers<[1], [0], [0], [1], [0, 0, 1, 1], [], []>} : vector<2x32xbf16>, vector<32x128xbf16>, vector<2x128xf32> -> vector<2x128xf32>
    %511 = arith.addf %508, %510 : vector<2x128xf32>
    %512 = arith.addf %511, %5 : vector<2x128xf32>
    %513 = vector.extract_strided_slice %512 {offsets = [0, 0], sizes = [2, 96], strides = [1, 1]} : vector<2x128xf32> to vector<2x96xf32>
    %514 = arith.negf %513 : vector<2x96xf32>
    %515 = math.exp %514 : vector<2x96xf32>
    %cst_83 = arith.constant 1.000000e+00 : f32
    %516 = vector.broadcast %cst_83 : f32 to vector<2x96xf32>
    %517 = arith.addf %516, %515 : vector<2x96xf32>
    %518 = arith.divf %516, %517 : vector<2x96xf32>
    %519 = vector.extract_strided_slice %512 {offsets = [0, 96], sizes = [2, 32], strides = [1, 1]} : vector<2x128xf32> to vector<2x32xf32>
    %520 = math.tanh %519 : vector<2x32xf32>
    %521 = vector.extract_strided_slice %518 {offsets = [0, 0], sizes = [2, 32], strides = [1, 1]} : vector<2x96xf32> to vector<2x32xf32>
    %522 = vector.extract_strided_slice %518 {offsets = [0, 32], sizes = [2, 32], strides = [1, 1]} : vector<2x96xf32> to vector<2x32xf32>
    %523 = vector.extract_strided_slice %518 {offsets = [0, 64], sizes = [2, 32], strides = [1, 1]} : vector<2x96xf32> to vector<2x32xf32>
    %524 = arith.mulf %522, %481 : vector<2x32xf32>
    %525 = arith.mulf %521, %520 : vector<2x32xf32>
    %526 = arith.addf %524, %525 : vector<2x32xf32>
    %527 = math.tanh %526 : vector<2x32xf32>
    %528 = arith.mulf %523, %527 : vector<2x32xf32>
    %c3 = arith.constant 3 : index
    %c0_84 = arith.constant 0 : index
    %c0_85 = arith.constant 0 : index
    %529 = vector.load %arg12[%c3, %c0_84, %c0_85] : memref<8x2x32xf32, #tpu.memory_space<vmem>>, vector<1x2x32xf32>
    %530 = vector.shape_cast %529 : vector<1x2x32xf32> to vector<2x32xf32>
    %531 = vector.shape_cast %528 : vector<2x32xf32> to vector<1x2x32xf32>
    tpu.vector_store %arg12[%c3, %c0_84, %c0_85], %531 {strides = array<i32>} : memref<8x2x32xf32, #tpu.memory_space<vmem>>, vector<1x2x32xf32>,
    %532 = vector.extract_strided_slice %11 {offsets = [24, 0], sizes = [2, 128], strides = [1, 1]} : vector<32x128xf32> to vector<2x128xf32>
    %533 = arith.truncf %506 : vector<2x32xf32> to vector<2x32xbf16>
    %cst_86 = arith.constant dense<0.000000e+00> : vector<2x128xf32>
    %534 = tpu.matmul %533, %0, %cst_86 {dimension_numbers = #tpu.dot_dimension_numbers<[1], [0], [0], [1], [0, 0, 1, 1], [], []>} : vector<2x32xbf16>, vector<32x128xbf16>, vector<2x128xf32> -> vector<2x128xf32>
    %535 = arith.addf %532, %534 : vector<2x128xf32>
    %536 = vector.extract_strided_slice %535 {offsets = [0, 0], sizes = [2, 96], strides = [1, 1]} : vector<2x128xf32> to vector<2x96xf32>
    %537 = arith.negf %536 : vector<2x96xf32>
    %538 = math.exp %537 : vector<2x96xf32>
    %cst_87 = arith.constant 1.000000e+00 : f32
    %539 = vector.broadcast %cst_87 : f32 to vector<2x96xf32>
    %540 = arith.addf %539, %538 : vector<2x96xf32>
    %541 = arith.divf %539, %540 : vector<2x96xf32>
    %542 = vector.extract_strided_slice %535 {offsets = [0, 96], sizes = [2, 32], strides = [1, 1]} : vector<2x128xf32> to vector<2x32xf32>
    %543 = math.tanh %542 : vector<2x32xf32>
    %544 = vector.extract_strided_slice %541 {offsets = [0, 0], sizes = [2, 32], strides = [1, 1]} : vector<2x96xf32> to vector<2x32xf32>
    %545 = vector.extract_strided_slice %541 {offsets = [0, 32], sizes = [2, 32], strides = [1, 1]} : vector<2x96xf32> to vector<2x32xf32>
    %546 = vector.extract_strided_slice %541 {offsets = [0, 64], sizes = [2, 32], strides = [1, 1]} : vector<2x96xf32> to vector<2x32xf32>
    %547 = arith.mulf %545, %504 : vector<2x32xf32>
    %548 = arith.mulf %544, %543 : vector<2x32xf32>
    %549 = arith.addf %547, %548 : vector<2x32xf32>
    %550 = math.tanh %549 : vector<2x32xf32>
    %551 = arith.mulf %546, %550 : vector<2x32xf32>
    %552 = arith.truncf %551 : vector<2x32xf32> to vector<2x32xbf16>
    %cst_88 = arith.constant dense<0.000000e+00> : vector<2x128xf32>
    %553 = tpu.matmul %552, %1, %cst_88 {dimension_numbers = #tpu.dot_dimension_numbers<[1], [0], [0], [1], [0, 0, 1, 1], [], []>} : vector<2x32xbf16>, vector<32x128xbf16>, vector<2x128xf32> -> vector<2x128xf32>
    %554 = arith.truncf %528 : vector<2x32xf32> to vector<2x32xbf16>
    %cst_89 = arith.constant dense<0.000000e+00> : vector<2x128xf32>
    %555 = tpu.matmul %554, %2, %cst_89 {dimension_numbers = #tpu.dot_dimension_numbers<[1], [0], [0], [1], [0, 0, 1, 1], [], []>} : vector<2x32xbf16>, vector<32x128xbf16>, vector<2x128xf32> -> vector<2x128xf32>
    %556 = arith.addf %553, %555 : vector<2x128xf32>
    %557 = arith.addf %556, %5 : vector<2x128xf32>
    %558 = vector.extract_strided_slice %557 {offsets = [0, 0], sizes = [2, 96], strides = [1, 1]} : vector<2x128xf32> to vector<2x96xf32>
    %559 = arith.negf %558 : vector<2x96xf32>
    %560 = math.exp %559 : vector<2x96xf32>
    %cst_90 = arith.constant 1.000000e+00 : f32
    %561 = vector.broadcast %cst_90 : f32 to vector<2x96xf32>
    %562 = arith.addf %561, %560 : vector<2x96xf32>
    %563 = arith.divf %561, %562 : vector<2x96xf32>
    %564 = vector.extract_strided_slice %557 {offsets = [0, 96], sizes = [2, 32], strides = [1, 1]} : vector<2x128xf32> to vector<2x32xf32>
    %565 = math.tanh %564 : vector<2x32xf32>
    %566 = vector.extract_strided_slice %563 {offsets = [0, 0], sizes = [2, 32], strides = [1, 1]} : vector<2x96xf32> to vector<2x32xf32>
    %567 = vector.extract_strided_slice %563 {offsets = [0, 32], sizes = [2, 32], strides = [1, 1]} : vector<2x96xf32> to vector<2x32xf32>
    %568 = vector.extract_strided_slice %563 {offsets = [0, 64], sizes = [2, 32], strides = [1, 1]} : vector<2x96xf32> to vector<2x32xf32>
    %569 = arith.mulf %567, %526 : vector<2x32xf32>
    %570 = arith.mulf %566, %565 : vector<2x32xf32>
    %571 = arith.addf %569, %570 : vector<2x32xf32>
    %572 = math.tanh %571 : vector<2x32xf32>
    %573 = arith.mulf %568, %572 : vector<2x32xf32>
    %c4 = arith.constant 4 : index
    %c0_91 = arith.constant 0 : index
    %c0_92 = arith.constant 0 : index
    %574 = vector.load %arg12[%c4, %c0_91, %c0_92] : memref<8x2x32xf32, #tpu.memory_space<vmem>>, vector<1x2x32xf32>
    %575 = vector.shape_cast %574 : vector<1x2x32xf32> to vector<2x32xf32>
    %576 = vector.shape_cast %573 : vector<2x32xf32> to vector<1x2x32xf32>
    tpu.vector_store %arg12[%c4, %c0_91, %c0_92], %576 {strides = array<i32>} : memref<8x2x32xf32, #tpu.memory_space<vmem>>, vector<1x2x32xf32>,
    %577 = vector.extract_strided_slice %11 {offsets = [26, 0], sizes = [2, 128], strides = [1, 1]} : vector<32x128xf32> to vector<2x128xf32>
    %578 = arith.truncf %551 : vector<2x32xf32> to vector<2x32xbf16>
    %cst_93 = arith.constant dense<0.000000e+00> : vector<2x128xf32>
    %579 = tpu.matmul %578, %0, %cst_93 {dimension_numbers = #tpu.dot_dimension_numbers<[1], [0], [0], [1], [0, 0, 1, 1], [], []>} : vector<2x32xbf16>, vector<32x128xbf16>, vector<2x128xf32> -> vector<2x128xf32>
    %580 = arith.addf %577, %579 : vector<2x128xf32>
    %581 = vector.extract_strided_slice %580 {offsets = [0, 0], sizes = [2, 96], strides = [1, 1]} : vector<2x128xf32> to vector<2x96xf32>
    %582 = arith.negf %581 : vector<2x96xf32>
    %583 = math.exp %582 : vector<2x96xf32>
    %cst_94 = arith.constant 1.000000e+00 : f32
    %584 = vector.broadcast %cst_94 : f32 to vector<2x96xf32>
    %585 = arith.addf %584, %583 : vector<2x96xf32>
    %586 = arith.divf %584, %585 : vector<2x96xf32>
    %587 = vector.extract_strided_slice %580 {offsets = [0, 96], sizes = [2, 32], strides = [1, 1]} : vector<2x128xf32> to vector<2x32xf32>
    %588 = math.tanh %587 : vector<2x32xf32>
    %589 = vector.extract_strided_slice %586 {offsets = [0, 0], sizes = [2, 32], strides = [1, 1]} : vector<2x96xf32> to vector<2x32xf32>
    %590 = vector.extract_strided_slice %586 {offsets = [0, 32], sizes = [2, 32], strides = [1, 1]} : vector<2x96xf32> to vector<2x32xf32>
    %591 = vector.extract_strided_slice %586 {offsets = [0, 64], sizes = [2, 32], strides = [1, 1]} : vector<2x96xf32> to vector<2x32xf32>
    %592 = arith.mulf %590, %549 : vector<2x32xf32>
    %593 = arith.mulf %589, %588 : vector<2x32xf32>
    %594 = arith.addf %592, %593 : vector<2x32xf32>
    %595 = math.tanh %594 : vector<2x32xf32>
    %596 = arith.mulf %591, %595 : vector<2x32xf32>
    %597 = arith.truncf %596 : vector<2x32xf32> to vector<2x32xbf16>
    %cst_95 = arith.constant dense<0.000000e+00> : vector<2x128xf32>
    %598 = tpu.matmul %597, %1, %cst_95 {dimension_numbers = #tpu.dot_dimension_numbers<[1], [0], [0], [1], [0, 0, 1, 1], [], []>} : vector<2x32xbf16>, vector<32x128xbf16>, vector<2x128xf32> -> vector<2x128xf32>
    %599 = arith.truncf %573 : vector<2x32xf32> to vector<2x32xbf16>
    %cst_96 = arith.constant dense<0.000000e+00> : vector<2x128xf32>
    %600 = tpu.matmul %599, %2, %cst_96 {dimension_numbers = #tpu.dot_dimension_numbers<[1], [0], [0], [1], [0, 0, 1, 1], [], []>} : vector<2x32xbf16>, vector<32x128xbf16>, vector<2x128xf32> -> vector<2x128xf32>
    %601 = arith.addf %598, %600 : vector<2x128xf32>
    %602 = arith.addf %601, %5 : vector<2x128xf32>
    %603 = vector.extract_strided_slice %602 {offsets = [0, 0], sizes = [2, 96], strides = [1, 1]} : vector<2x128xf32> to vector<2x96xf32>
    %604 = arith.negf %603 : vector<2x96xf32>
    %605 = math.exp %604 : vector<2x96xf32>
    %cst_97 = arith.constant 1.000000e+00 : f32
    %606 = vector.broadcast %cst_97 : f32 to vector<2x96xf32>
    %607 = arith.addf %606, %605 : vector<2x96xf32>
    %608 = arith.divf %606, %607 : vector<2x96xf32>
    %609 = vector.extract_strided_slice %602 {offsets = [0, 96], sizes = [2, 32], strides = [1, 1]} : vector<2x128xf32> to vector<2x32xf32>
    %610 = math.tanh %609 : vector<2x32xf32>
    %611 = vector.extract_strided_slice %608 {offsets = [0, 0], sizes = [2, 32], strides = [1, 1]} : vector<2x96xf32> to vector<2x32xf32>
    %612 = vector.extract_strided_slice %608 {offsets = [0, 32], sizes = [2, 32], strides = [1, 1]} : vector<2x96xf32> to vector<2x32xf32>
    %613 = vector.extract_strided_slice %608 {offsets = [0, 64], sizes = [2, 32], strides = [1, 1]} : vector<2x96xf32> to vector<2x32xf32>
    %614 = arith.mulf %612, %571 : vector<2x32xf32>
    %615 = arith.mulf %611, %610 : vector<2x32xf32>
    %616 = arith.addf %614, %615 : vector<2x32xf32>
    %617 = math.tanh %616 : vector<2x32xf32>
    %618 = arith.mulf %613, %617 : vector<2x32xf32>
    %c5 = arith.constant 5 : index
    %c0_98 = arith.constant 0 : index
    %c0_99 = arith.constant 0 : index
    %619 = vector.load %arg12[%c5, %c0_98, %c0_99] : memref<8x2x32xf32, #tpu.memory_space<vmem>>, vector<1x2x32xf32>
    %620 = vector.shape_cast %619 : vector<1x2x32xf32> to vector<2x32xf32>
    %621 = vector.shape_cast %618 : vector<2x32xf32> to vector<1x2x32xf32>
    tpu.vector_store %arg12[%c5, %c0_98, %c0_99], %621 {strides = array<i32>} : memref<8x2x32xf32, #tpu.memory_space<vmem>>, vector<1x2x32xf32>,
    %622 = vector.extract_strided_slice %11 {offsets = [28, 0], sizes = [2, 128], strides = [1, 1]} : vector<32x128xf32> to vector<2x128xf32>
    %623 = arith.truncf %596 : vector<2x32xf32> to vector<2x32xbf16>
    %cst_100 = arith.constant dense<0.000000e+00> : vector<2x128xf32>
    %624 = tpu.matmul %623, %0, %cst_100 {dimension_numbers = #tpu.dot_dimension_numbers<[1], [0], [0], [1], [0, 0, 1, 1], [], []>} : vector<2x32xbf16>, vector<32x128xbf16>, vector<2x128xf32> -> vector<2x128xf32>
    %625 = arith.addf %622, %624 : vector<2x128xf32>
    %626 = vector.extract_strided_slice %625 {offsets = [0, 0], sizes = [2, 96], strides = [1, 1]} : vector<2x128xf32> to vector<2x96xf32>
    %627 = arith.negf %626 : vector<2x96xf32>
    %628 = math.exp %627 : vector<2x96xf32>
    %cst_101 = arith.constant 1.000000e+00 : f32
    %629 = vector.broadcast %cst_101 : f32 to vector<2x96xf32>
    %630 = arith.addf %629, %628 : vector<2x96xf32>
    %631 = arith.divf %629, %630 : vector<2x96xf32>
    %632 = vector.extract_strided_slice %625 {offsets = [0, 96], sizes = [2, 32], strides = [1, 1]} : vector<2x128xf32> to vector<2x32xf32>
    %633 = math.tanh %632 : vector<2x32xf32>
    %634 = vector.extract_strided_slice %631 {offsets = [0, 0], sizes = [2, 32], strides = [1, 1]} : vector<2x96xf32> to vector<2x32xf32>
    %635 = vector.extract_strided_slice %631 {offsets = [0, 32], sizes = [2, 32], strides = [1, 1]} : vector<2x96xf32> to vector<2x32xf32>
    %636 = vector.extract_strided_slice %631 {offsets = [0, 64], sizes = [2, 32], strides = [1, 1]} : vector<2x96xf32> to vector<2x32xf32>
    %637 = arith.mulf %635, %594 : vector<2x32xf32>
    %638 = arith.mulf %634, %633 : vector<2x32xf32>
    %639 = arith.addf %637, %638 : vector<2x32xf32>
    %640 = math.tanh %639 : vector<2x32xf32>
    %641 = arith.mulf %636, %640 : vector<2x32xf32>
    %642 = arith.truncf %641 : vector<2x32xf32> to vector<2x32xbf16>
    %cst_102 = arith.constant dense<0.000000e+00> : vector<2x128xf32>
    %643 = tpu.matmul %642, %1, %cst_102 {dimension_numbers = #tpu.dot_dimension_numbers<[1], [0], [0], [1], [0, 0, 1, 1], [], []>} : vector<2x32xbf16>, vector<32x128xbf16>, vector<2x128xf32> -> vector<2x128xf32>
    %644 = arith.truncf %618 : vector<2x32xf32> to vector<2x32xbf16>
    %cst_103 = arith.constant dense<0.000000e+00> : vector<2x128xf32>
    %645 = tpu.matmul %644, %2, %cst_103 {dimension_numbers = #tpu.dot_dimension_numbers<[1], [0], [0], [1], [0, 0, 1, 1], [], []>} : vector<2x32xbf16>, vector<32x128xbf16>, vector<2x128xf32> -> vector<2x128xf32>
    %646 = arith.addf %643, %645 : vector<2x128xf32>
    %647 = arith.addf %646, %5 : vector<2x128xf32>
    %648 = vector.extract_strided_slice %647 {offsets = [0, 0], sizes = [2, 96], strides = [1, 1]} : vector<2x128xf32> to vector<2x96xf32>
    %649 = arith.negf %648 : vector<2x96xf32>
    %650 = math.exp %649 : vector<2x96xf32>
    %cst_104 = arith.constant 1.000000e+00 : f32
    %651 = vector.broadcast %cst_104 : f32 to vector<2x96xf32>
    %652 = arith.addf %651, %650 : vector<2x96xf32>
    %653 = arith.divf %651, %652 : vector<2x96xf32>
    %654 = vector.extract_strided_slice %647 {offsets = [0, 96], sizes = [2, 32], strides = [1, 1]} : vector<2x128xf32> to vector<2x32xf32>
    %655 = math.tanh %654 : vector<2x32xf32>
    %656 = vector.extract_strided_slice %653 {offsets = [0, 0], sizes = [2, 32], strides = [1, 1]} : vector<2x96xf32> to vector<2x32xf32>
    %657 = vector.extract_strided_slice %653 {offsets = [0, 32], sizes = [2, 32], strides = [1, 1]} : vector<2x96xf32> to vector<2x32xf32>
    %658 = vector.extract_strided_slice %653 {offsets = [0, 64], sizes = [2, 32], strides = [1, 1]} : vector<2x96xf32> to vector<2x32xf32>
    %659 = arith.mulf %657, %616 : vector<2x32xf32>
    %660 = arith.mulf %656, %655 : vector<2x32xf32>
    %661 = arith.addf %659, %660 : vector<2x32xf32>
    %662 = math.tanh %661 : vector<2x32xf32>
    %663 = arith.mulf %658, %662 : vector<2x32xf32>
    %c6 = arith.constant 6 : index
    %c0_105 = arith.constant 0 : index
    %c0_106 = arith.constant 0 : index
    %664 = vector.load %arg12[%c6, %c0_105, %c0_106] : memref<8x2x32xf32, #tpu.memory_space<vmem>>, vector<1x2x32xf32>
    %665 = vector.shape_cast %664 : vector<1x2x32xf32> to vector<2x32xf32>
    %666 = vector.shape_cast %663 : vector<2x32xf32> to vector<1x2x32xf32>
    tpu.vector_store %arg12[%c6, %c0_105, %c0_106], %666 {strides = array<i32>} : memref<8x2x32xf32, #tpu.memory_space<vmem>>, vector<1x2x32xf32>,
    %667 = vector.extract_strided_slice %11 {offsets = [30, 0], sizes = [2, 128], strides = [1, 1]} : vector<32x128xf32> to vector<2x128xf32>
    %668 = arith.truncf %641 : vector<2x32xf32> to vector<2x32xbf16>
    %cst_107 = arith.constant dense<0.000000e+00> : vector<2x128xf32>
    %669 = tpu.matmul %668, %0, %cst_107 {dimension_numbers = #tpu.dot_dimension_numbers<[1], [0], [0], [1], [0, 0, 1, 1], [], []>} : vector<2x32xbf16>, vector<32x128xbf16>, vector<2x128xf32> -> vector<2x128xf32>
    %670 = arith.addf %667, %669 : vector<2x128xf32>
    %671 = vector.extract_strided_slice %670 {offsets = [0, 0], sizes = [2, 96], strides = [1, 1]} : vector<2x128xf32> to vector<2x96xf32>
    %672 = arith.negf %671 : vector<2x96xf32>
    %673 = math.exp %672 : vector<2x96xf32>
    %cst_108 = arith.constant 1.000000e+00 : f32
    %674 = vector.broadcast %cst_108 : f32 to vector<2x96xf32>
    %675 = arith.addf %674, %673 : vector<2x96xf32>
    %676 = arith.divf %674, %675 : vector<2x96xf32>
    %677 = vector.extract_strided_slice %670 {offsets = [0, 96], sizes = [2, 32], strides = [1, 1]} : vector<2x128xf32> to vector<2x32xf32>
    %678 = math.tanh %677 : vector<2x32xf32>
    %679 = vector.extract_strided_slice %676 {offsets = [0, 0], sizes = [2, 32], strides = [1, 1]} : vector<2x96xf32> to vector<2x32xf32>
    %680 = vector.extract_strided_slice %676 {offsets = [0, 32], sizes = [2, 32], strides = [1, 1]} : vector<2x96xf32> to vector<2x32xf32>
    %681 = vector.extract_strided_slice %676 {offsets = [0, 64], sizes = [2, 32], strides = [1, 1]} : vector<2x96xf32> to vector<2x32xf32>
    %682 = arith.mulf %680, %639 : vector<2x32xf32>
    %683 = arith.mulf %679, %678 : vector<2x32xf32>
    %684 = arith.addf %682, %683 : vector<2x32xf32>
    %685 = math.tanh %684 : vector<2x32xf32>
    %686 = arith.mulf %681, %685 : vector<2x32xf32>
    %687 = arith.truncf %686 : vector<2x32xf32> to vector<2x32xbf16>
    %cst_109 = arith.constant dense<0.000000e+00> : vector<2x128xf32>
    %688 = tpu.matmul %687, %1, %cst_109 {dimension_numbers = #tpu.dot_dimension_numbers<[1], [0], [0], [1], [0, 0, 1, 1], [], []>} : vector<2x32xbf16>, vector<32x128xbf16>, vector<2x128xf32> -> vector<2x128xf32>
    %689 = arith.truncf %663 : vector<2x32xf32> to vector<2x32xbf16>
    %cst_110 = arith.constant dense<0.000000e+00> : vector<2x128xf32>
    %690 = tpu.matmul %689, %2, %cst_110 {dimension_numbers = #tpu.dot_dimension_numbers<[1], [0], [0], [1], [0, 0, 1, 1], [], []>} : vector<2x32xbf16>, vector<32x128xbf16>, vector<2x128xf32> -> vector<2x128xf32>
    %691 = arith.addf %688, %690 : vector<2x128xf32>
    %692 = arith.addf %691, %5 : vector<2x128xf32>
    %693 = vector.extract_strided_slice %692 {offsets = [0, 0], sizes = [2, 96], strides = [1, 1]} : vector<2x128xf32> to vector<2x96xf32>
    %694 = arith.negf %693 : vector<2x96xf32>
    %695 = math.exp %694 : vector<2x96xf32>
    %cst_111 = arith.constant 1.000000e+00 : f32
    %696 = vector.broadcast %cst_111 : f32 to vector<2x96xf32>
    %697 = arith.addf %696, %695 : vector<2x96xf32>
    %698 = arith.divf %696, %697 : vector<2x96xf32>
    %699 = vector.extract_strided_slice %692 {offsets = [0, 96], sizes = [2, 32], strides = [1, 1]} : vector<2x128xf32> to vector<2x32xf32>
    %700 = math.tanh %699 : vector<2x32xf32>
    %701 = vector.extract_strided_slice %698 {offsets = [0, 0], sizes = [2, 32], strides = [1, 1]} : vector<2x96xf32> to vector<2x32xf32>
    %702 = vector.extract_strided_slice %698 {offsets = [0, 32], sizes = [2, 32], strides = [1, 1]} : vector<2x96xf32> to vector<2x32xf32>
    %703 = vector.extract_strided_slice %698 {offsets = [0, 64], sizes = [2, 32], strides = [1, 1]} : vector<2x96xf32> to vector<2x32xf32>
    %704 = arith.mulf %702, %661 : vector<2x32xf32>
    %705 = arith.mulf %701, %700 : vector<2x32xf32>
    %706 = arith.addf %704, %705 : vector<2x32xf32>
    %707 = math.tanh %706 : vector<2x32xf32>
    %708 = arith.mulf %703, %707 : vector<2x32xf32>
    %c7 = arith.constant 7 : index
    %c0_112 = arith.constant 0 : index
    %c0_113 = arith.constant 0 : index
    %709 = vector.load %arg12[%c7, %c0_112, %c0_113] : memref<8x2x32xf32, #tpu.memory_space<vmem>>, vector<1x2x32xf32>
    %710 = vector.shape_cast %709 : vector<1x2x32xf32> to vector<2x32xf32>
    %711 = vector.shape_cast %708 : vector<2x32xf32> to vector<1x2x32xf32>
    tpu.vector_store %arg12[%c7, %c0_112, %c0_113], %711 {strides = array<i32>} : memref<8x2x32xf32, #tpu.memory_space<vmem>>, vector<1x2x32xf32>,
    %c0_114 = arith.constant 0 : index
    %c0_115 = arith.constant 0 : index
    %c0_116 = arith.constant 0 : index
    %712 = vector.load %arg12[%c0_114, %c0_115, %c0_116] : memref<8x2x32xf32, #tpu.memory_space<vmem>>, vector<8x2x32xf32>
    %713 = vector.shape_cast %712 : vector<8x2x32xf32> to vector<16x32xf32>
    %c0_117 = arith.constant 0 : index
    %c0_118 = arith.constant 0 : index
    %714 = vector.load %arg7[%c0_117, %c0_118] : memref<32x1024xf32, #tpu.memory_space<vmem>>, vector<32x1024xf32>
    %cst_119 = arith.constant dense<0.000000e+00> : vector<16x1024xf32>
    %715 = tpu.matmul %713, %714, %cst_119 {dimension_numbers = #tpu.dot_dimension_numbers<[1], [0], [0], [1], [0, 0, 1, 1], [], []>} : vector<16x32xf32>, vector<32x1024xf32>, vector<16x1024xf32> -> vector<16x1024xf32>
    %c0_120 = arith.constant 0 : index
    %c0_121 = arith.constant 0 : index
    %716 = vector.load %arg8[%c0_120, %c0_121] : memref<1x1024xf32, #tpu.memory_space<vmem>>, vector<1x1024xf32>
    %717 = vector.broadcast %716 : vector<1x1024xf32> to vector<16x1024xf32>
    %718 = arith.addf %715, %717 : vector<16x1024xf32>
    %cst_122 = arith.constant 0.000000e+00 : f32
    %719 = vector.broadcast %cst_122 : f32 to vector<16x1024xf32>
    %720 = arith.maximumf %718, %719 : vector<16x1024xf32>
    %c0_123 = arith.constant 0 : index
    %c0_124 = arith.constant 0 : index
    %721 = vector.load %arg9[%c0_123, %c0_124] : memref<1024x4xf32, #tpu.memory_space<vmem>>, vector<1024x4xf32>
    %cst_125 = arith.constant dense<0.000000e+00> : vector<16x4xf32>
    %722 = tpu.matmul %720, %721, %cst_125 {dimension_numbers = #tpu.dot_dimension_numbers<[1], [0], [0], [1], [0, 0, 1, 1], [], []>} : vector<16x1024xf32>, vector<1024x4xf32>, vector<16x4xf32> -> vector<16x4xf32>
    %c0_126 = arith.constant 0 : index
    %c0_127 = arith.constant 0 : index
    %723 = vector.load %arg10[%c0_126, %c0_127] : memref<1x4xf32, #tpu.memory_space<vmem>>, vector<1x4xf32>
    %724 = vector.broadcast %723 : vector<1x4xf32> to vector<16x4xf32>
    %725 = arith.addf %722, %724 : vector<16x4xf32>
    %c0_128 = arith.constant 0 : index
    %c0_129 = arith.constant 0 : index
    %726 = vector.load %arg11[%c0_128, %c0_129] : memref<16x4xf32, #tpu.memory_space<vmem>>, vector<16x4xf32>
    tpu.vector_store %arg11[%c0_128, %c0_129], %725 {strides = array<i32>} : memref<16x4xf32, #tpu.memory_space<vmem>>, vector<16x4xf32>,
    return
  }
}

</mosaic_0001>

<bundles_post_ra>
// kernel: tpu_custom_call.1
= control target key start
LH: loop header
LB: loop body
LE: loop exit
PB: predicated region body
PF: predicated region fallthrough
CT: control target
= control target key end

     0   :  { %v5415_v0 = vmov 0.0   ;;  %vm70_vm0 = vcmask 64512   ;;  %vm5416_vm1 = vmmov 0   ;;  %v5417_v6 = vmov 0   ;;  %s5418_s28 = smov 32   ;;  %s5419_s21 = smov 64   ;;  %s6841_s3 = inlined_call_operand.vmem [shape: bf16[32,128], index: 3, kind: input, shape index: {}]   ;;  %s6842_s1 = inlined_call_operand.vmem [shape: f32[8,128], index: 1, kind: input, shape index: {}]   ;;  %s6843_s0 = inlined_call_operand.vmem [shape: f32[32,8], index: 0, kind: input, shape index: {}]   ;;  %s6844_s2 = inlined_call_operand.vmem [shape: f32[1,128], index: 2, kind: input, shape index: {}]   ;;  %s6845_s5 = inlined_call_operand.vmem [shape: bf16[32,128], index: 5, kind: input, shape index: {}]   ;;  %s6846_s4 = inlined_call_operand.vmem [shape: bf16[32,128], index: 4, kind: input, shape index: {}]   ;;  %s6847_s6 = inlined_call_operand.vmem [shape: f32[1,128], index: 6, kind: input, shape index: {}]   ;;  %s6848_s7 = inlined_call_operand.vmem [shape: f32[32,1024], index: 7, kind: input, shape index: {}]   ;;  %s6849_s9 = inlined_call_operand.vmem [shape: f32[1024,4], index: 9, kind: input, shape index: {}]   ;;  %s6850_s8 = inlined_call_operand.vmem [shape: f32[1,1024], index: 8, kind: input, shape index: {}]   ;;  %s6851_s10 = inlined_call_operand.vmem [shape: f32[1,4], index: 10, kind: input, shape index: {}]   ;;  %s6852_s11 = inlined_call_operand.vmem [shape: f32[16,4], index: 11, kind: output, shape index: {}]  }
   0x1   :  { %4588 = vmatprep.subr.bf16.mxu1 %v5415_v0  ;;  %v5485_v1 = vld [vmem:[%s6841_s3] sm:$0xff]   ;;  %4592 = vmatprep.mubr.msk.bf16.mxu1 %vm5416_vm1, %v5415_v0  ;;  %v59_v4 = vld [vmem:[%s6843_s0 + $0x8] sm:$0xff]  ;;  %v60_v26 = vld [vmem:[%s6843_s0 + $0x10] sm:$0xff]  ;;  %vm180_vm2 = vcmask 261120   ;;  %vm1909_vm3 = vcmask 254976   ;;  %vm4173_vm4 = vcmask 31744  }
   0x2   :  { %v62_v2 = vld [vmem:[%s6842_s1] sm:$0xff]  ;;  %4589 = vmatpush3.bf16.msra.mxu1 %v5485_v1  ;;  %v5502_v5 = vld [vmem:[%s6841_s3 + $0x8] sm:$0xff]   ;;  %v61_v27 = vld [vmem:[%s6843_s0 + $0x18] sm:$0xff] }
   0x3   :  { %v58_v3 = vld [vmem:[%s6843_s0] sm:$0xff]  ;;  %4580 = vmatprep.subr.mxu0 %v62_v2  ;;  %4590 = vmatprep.subr.bf16.mxu1 %v5415_v0  ;;  %v5544_v29 = vld [vmem:[%s6845_s5 + $0x8] sm:$0xff]  }
   0x4   :  { %4581 = vmatpush3.msra.mxu0 %v62_v2  ;;  %4582 = vmatprep.mubr.msk.f32.mxu0 %vm70_vm0, %v58_v3  ;;  %v5515_v7 = vld [vmem:[%s6844_s2] ss:$0 sm:$0xff]  ;;  %v5559_v31 = vld [vmem:[%s6846_s4 + $0x8] sm:$0xff]  }
   0x5   :  { %4583 = vmatmul.mubr.msk.f32.vlgmr.msra.gmra.mrb[0].mxu0 %vm70_vm0, %v59_v4  ;;  %4596 = vmatprep.subr.bf16.mxu0 %v5415_v0  ;;  %v5537_v28 = vld [vmem:[%s6845_s5] sm:$0xff]  }
   0x6   :  { %4591 = vmatpush3.bf16.msra.mxu1 %v5502_v5  ;;  %4585 = vmatprep.mubr.msk.f32.mxu0 %vm70_vm0, %v60_v26  ;;  %v5552_v30 = vld [vmem:[%s6846_s4] sm:$0xff]  }
   0x7   :  { %4604 = vmatprep.subr.bf16.mxu1 %v5415_v0  ;;  %4597 = vmatpush3.bf16.msra.mxu0 %v5537_v28  ;;  %v5595_v43 = vld [vmem:[%s6847_s6] ss:$0 sm:$0xff] }
   0x8   :  { %4598 = vmatprep.subr.bf16.mxu0 %v5415_v0 }
   0x9   :  { %4593 = vmatmul.mubr.bf16.vlgmr.msra.gmra.mrb[0].mxu1 %v5417_v6  ;;  %4586 = vmatmul.mubr.msk.f32.gmra.mrb[2].mxu0 %vm70_vm0, %v61_v27 }
   0xa   :  { %4608 = vmatprep.mubr.msk.bf16.mxu1 %vm5416_vm1, %v5415_v0  ;;  %4600 = vmatprep.mubr.msk.bf16.mxu0 %vm5416_vm1, %v5415_v0 }
   0xb   :  { %4605 = vmatpush3.bf16.msra.mxu1 %v5552_v30  ;;  %4599 = vmatpush3.bf16.msra.mxu0 %v5544_v29 }
   0xc   :  { %4606 = vmatprep.subr.bf16.mxu1 %v5415_v0  ;;  %4612 = vmatprep.subr.bf16.mxu0 %v5415_v0 }
   0xe   :  { %4601 = vmatmul.mubr.bf16.vlgmr.msra.gmra.mrb[4].mxu0 %v5417_v6 }
   0xf   :  { %4607 = vmatpush3.bf16.msra.mxu1 %v5559_v31  ;;  %4613 = vmatpush3.bf16.msra.mxu0 %v5485_v1 }
  0x10   :  { %4620 = vmatprep.subr.bf16.mxu1 %v5415_v0  ;;  %4616 = vmatprep.mubr.msk.bf16.mxu0 %vm5416_vm1, %v5415_v0 }
  0x11   :  { %4614 = vmatprep.subr.bf16.mxu0 %v5415_v0 }
  0x13   :  { %4615 = vmatpush3.bf16.msra.mxu0 %v5502_v5 }
  0x14   :  { %4628 = vmatprep.subr.bf16.mxu0 %v5415_v0 }
  0xd8   :  { %v5517_v8 = vpop.f32.mrb[0].mxu0 }
  0xd9   :  { %v149_v9 = vpop.f32.mrb[1].mxu0 }
  0xda   :  { %v5520_v10 = vadd.f32 %v5515_v7, %v149_v9 }
  0xdc   :  { %v218_v11 = vpop.f32.mrb[0].mxu1  ;;  %v5574_v36 = vpop.f32.mrb[2].mxu0 }
  0xdd   :  { %v224_v12 = vadd.f32 %v218_v11, %v5520_v10  ;;  %v4594_v13 = vpop.f32.mrb[1].mxu1  ;;  %v5576_v37 = vpop.f32.mrb[3].mxu0 }
  0xde   :  { %v221_v14 = vpop.f32.mrb[2].mxu1 }
  0xdf   :  { %5144 = vtanh.f32 %v224_v12  ;;  %v4595_v15 = vpop.f32.mrb[3].mxu1  ;;  %v4188_v17 = vmul.f32 -1.442695, %v224_v12 }
  0xe1   :  { %5146 = vpow2.f32 %v4188_v17  ;;  %v296_v38 = vpop.f32.mrb[4].mxu0 }
  0xe2   :  { %v4602_v39 = vpop.f32.mrb[5].mxu0 }
  0xe3   :  { %v299_v40 = vpop.f32.mrb[6].mxu0 }
  0xe4   :  { %v4603_v41 = vpop.f32.mrb[7].mxu0 }
  0xe9   :  { %v5145_v16 = vpop.eup %5144 }
  0xea   :  { %234 = vrot.lane.b32.xlu0 %v5145_v16, %s5418_s28 }
  0xeb   :  { %v5147_v18 = vpop.eup %5146 }
  0xec   :  { %v228_v19 = vadd.f32 1.0, %v5147_v18 }
  0xee   :  { %5148 = vrcp.f32 %v228_v19 }
  0xf8   :  { %v5149_v20 = vpop.eup %5148 }
  0xf9   :  { %v232_v23 = vmul.f32 0.0, %v5149_v20 }
 0x15c   :  { %v235_v21 = vpop.permute.xlu0 %234 }
 0x15d   :  { %v237_v22 = vmul.f32 %v5149_v20, %v235_v21 }
 0x15f   :  { %239 = vrot.lane.b32.xlu0 %v237_v22, %s5418_s28 }
 0x1d1   :  { %v240_v24 = vpop.permute.xlu0 %239 }
 0x1d2   :  { %v5525_v25 = vadd.f32 %v240_v24, %v232_v23 }
 0x1d4   :  { %5150 = vtanh.f32 %v5525_v25  ;;  %v437_v12 = vrot.slane %v5525_v25, 6 }
 0x1de   :  { %v5151_v32 = vpop.eup %5150 }
 0x1df   :  { %245 = vrot.lane.b32.xlu1 %v5151_v32, %s5418_s28 }
 0x251   :  { %v246_v33 = vpop.permute.xlu1 %245 }
 0x252   :  { %v248_v34 = vmul.f32 %v5149_v20, %v246_v33 }
 0x254   :  { %v249_v35 = vpack.c.bf16 %v248_v34, %v248_v34 }
 0x256   :  { %303 = vrot.lane.b32.xlu1 %v249_v35, %s5419_s21 }
 0x2c8   :  { %v304_v42 = vpop.permute.xlu1 %303 }
 0x2c9   :  { %4609 = vmatmul.mubr.msk.bf16.vlgmr.msra.gmra.mrb[4].mxu1 %vm180_vm2, %v304_v42  ;;  %4617 = vmatmul.mubr.msk.bf16.vlgmr.msra.gmra.mrb[8].mxu0 %vm180_vm2, %v304_v42 }
 0x2ca   :  { %4621 = vmatpush3.bf16.msra.mxu1 %v5537_v28  ;;  %4629 = vmatpush3.bf16.msra.mxu0 %v5552_v30 }
 0x2cb   :  { %4622 = vmatprep.subr.bf16.mxu1 %v5415_v0  ;;  %4630 = vmatprep.subr.bf16.mxu0 %v5415_v0 }
 0x2cc   :  { %4624 = vmatprep.mubr.msk.bf16.mxu1 %vm5416_vm1, %v5415_v0  ;;  %4632 = vmatprep.mubr.msk.bf16.mxu0 %vm5416_vm1, %v5415_v0 }
 0x2ce   :  { %4623 = vmatpush3.bf16.msra.mxu1 %v5544_v29  ;;  %4631 = vmatpush3.bf16.msra.mxu0 %v5559_v31 }
 0x2cf   :  { %4636 = vmatprep.subr.bf16.mxu1 %v5415_v0  ;;  %4644 = vmatprep.subr.bf16.mxu0 %v5415_v0 }
 0x39c   :  { %v354_v44 = vpop.f32.mrb[4].mxu1  ;;  %v419_v45 = vpop.f32.mrb[8].mxu0 }
 0x39d   :  { %v355_v46 = vadd.f32 %v354_v44, %v296_v38  ;;  %v426_v47 = vrot.slane %v419_v45, 6  ;;  %v4610_v48 = vpop.f32.mrb[5].mxu1  ;;  %v4618_v49 = vpop.f32.mrb[9].mxu0 }
 0x39e   :  { %v357_v50 = vpop.f32.mrb[6].mxu1  ;;  %v422_v51 = vpop.f32.mrb[10].mxu0 }
 0x39f   :  { %v360_v52 = vadd.f32 %v5595_v43, %v355_v46  ;;  %v428_v53 = vadd.f32 %v426_v47, %v5520_v10  ;;  %v4611_v54 = vpop.f32.mrb[7].mxu1  ;;  %v4619_v55 = vpop.f32.mrb[11].mxu0 }
 0x3a1   :  { %5152 = vtanh.f32 %v360_v52  ;;  %v4194_v58 = vmul.f32 -1.442695, %v360_v52  ;;  %v4196_v59 = vmul.f32 -1.442695, %v428_v53 }
 0x3a2   :  { %5154 = vtanh.f32 %v428_v53 }
 0x3a3   :  { %5156 = vpow2.f32 %v4194_v58 }
 0x3a4   :  { %5158 = vpow2.f32 %v4196_v59 }
 0x3ab   :  { %v5153_v56 = vpop.eup %5152 }
 0x3ac   :  { %v5155_v57 = vpop.eup %5154  ;;  %370 = vrot.lane.b32.xlu0 %v5153_v56, %s5418_s28 }
 0x3ad   :  { %441 = vrot.lane.b32.xlu1 %v5155_v57, %s5418_s28  ;;  %v5157_v60 = vpop.eup %5156 }
 0x3ae   :  { %v5159_v61 = vpop.eup %5158  ;;  %v364_v62 = vadd.f32 1.0, %v5157_v60 }
 0x3af   :  { %v432_v63 = vadd.f32 1.0, %v5159_v61 }
 0x3b0   :  { %5160 = vrcp.f32 %v364_v62 }
 0x3b1   :  { %5162 = vrcp.f32 %v432_v63 }
 0x3ba   :  { %v5161_v2 = vpop.eup %5160 }
 0x3bb   :  { %v5163_v4 = vpop.eup %5162  ;;  %v368_v13 = vmul.f32 0.0, %v5161_v2 }
 0x3bc   :  { %v439_v14 = vmul.f32 %v5163_v4, %v437_v12 }
 0x41e   :  { %v371_v3 = vpop.permute.xlu0 %370 }
 0x41f   :  { %v442_v6 = vpop.permute.xlu1 %441  ;;  %v373_v9 = vmul.f32 %v5161_v2, %v371_v3 }
 0x420   :  { %v444_v11 = vmul.f32 %v5163_v4, %v442_v6 }
 0x421   :  { %375 = vrot.lane.b32.xlu0 %v373_v9, %s5418_s28 }
 0x422   :  { %446 = vrot.lane.b32.xlu1 %v444_v11, %s5418_s28 }
 0x493   :  { %v376_v15 = vpop.permute.xlu0 %375 }
 0x494   :  { %v447_v16 = vpop.permute.xlu1 %446  ;;  %v5604_v17 = vadd.f32 %v376_v15, %v368_v13 }
 0x495   :  { %v5606_v18 = vadd.f32 %v447_v16, %v439_v14 }
 0x496   :  { %5164 = vtanh.f32 %v5604_v17 }
 0x497   :  { %5166 = vtanh.f32 %v5606_v18  ;;  %v628_v12 = vrot.slane %v5606_v18, 6 }
 0x4a0   :  { %v5165_v19 = vpop.eup %5164 }
 0x4a1   :  { %v5167_v20 = vpop.eup %5166  ;;  %381 = vrot.lane.b32.xlu0 %v5165_v19, %s5418_s28 }
 0x4a2   :  { %452 = vrot.lane.b32.xlu1 %v5167_v20, %s5418_s28 }
 0x513   :  { %v382_v21 = vpop.permute.xlu0 %381 }
 0x514   :  { %v453_v22 = vpop.permute.xlu1 %452  ;;  %v384_v23 = vmul.f32 %v5161_v2, %v382_v21 }
 0x515   :  { %v455_v24 = vmul.f32 %v5163_v4, %v453_v22 }
 0x516   :  { %v457_v25 = vpack.c.bf16 %v384_v23, %v384_v23 }
 0x517   :  { %v456_v26 = vpack.c.bf16 %v455_v24, %v455_v24 }
 0x518   :  { %459 = vrot.lane.b32.xlu0 %v457_v25, %s5419_s21 }
 0x519   :  { %v505_v27 = vrot.slane %v456_v26, 1 }
 0x51b   :  { %506 = vrot.lane.b32.xlu1 %v505_v27, %s5419_s21 }
 0x58a   :  { %v460_v32 = vpop.permute.xlu0 %459 }
 0x58b   :  { %4625 = vmatmul.mubr.msk.bf16.vlgmr.msra.gmra.mrb[8].mxu1 %vm180_vm2, %v460_v32 }
 0x58c   :  { %4637 = vmatpush3.bf16.msra.mxu1 %v5485_v1  ;;  %4640 = vmatprep.mubr.msk.bf16.mxu1 %vm5416_vm1, %v5415_v0 }
 0x58d   :  { %v507_v33 = vpop.permute.xlu1 %506  ;;  %4638 = vmatprep.subr.bf16.mxu1 %v5415_v0 }
 0x58e   :  { %4633 = vmatmul.mubr.msk.bf16.vlgmr.msra.gmra.mrb[12].mxu0 %vm180_vm2, %v507_v33 }
 0x58f   :  { %4645 = vmatpush3.bf16.msra.mxu0 %v5537_v28  ;;  %4648 = vmatprep.mubr.msk.bf16.mxu0 %vm5416_vm1, %v5415_v0 }
 0x590   :  { %4639 = vmatpush3.bf16.msra.mxu1 %v5502_v5  ;;  %4646 = vmatprep.subr.bf16.mxu0 %v5415_v0 }
 0x591   :  { %4652 = vmatprep.subr.bf16.mxu1 %v5415_v0 }
 0x593   :  { %4641 = vmatmul.mubr.msk.bf16.vlgmr.msra.gmra.mrb[12].mxu1 %vm180_vm2, %v507_v33  ;;  %4647 = vmatpush3.bf16.msra.mxu0 %v5544_v29 }
 0x594   :  { %4660 = vmatprep.subr.bf16.mxu0 %v5415_v0  ;;  %4653 = vmatpush3.bf16.msra.mxu1 %v5552_v30 }
 0x595   :  { %4654 = vmatprep.subr.bf16.mxu1 %v5415_v0  ;;  %4656 = vmatprep.mubr.msk.bf16.mxu1 %vm5416_vm1, %v5415_v0 }
 0x598   :  { %4655 = vmatpush3.bf16.msra.mxu1 %v5559_v31 }
 0x599   :  { %4668 = vmatprep.subr.bf16.mxu1 %v5415_v0 }
 0x65e   :  { %v498_v34 = vpop.f32.mrb[8].mxu1 }
 0x65f   :  { %v4626_v35 = vpop.f32.mrb[9].mxu1 }
 0x660   :  { %v501_v38 = vpop.f32.mrb[10].mxu1 }
 0x661   :  { %v545_v39 = vpop.f32.mrb[12].mxu0  ;;  %v4627_v40 = vpop.f32.mrb[11].mxu1 }
 0x662   :  { %v546_v41 = vadd.f32 %v545_v39, %v498_v34  ;;  %v4634_v42 = vpop.f32.mrb[13].mxu0 }
 0x663   :  { %v548_v44 = vpop.f32.mrb[14].mxu0 }
 0x664   :  { %v551_v45 = vadd.f32 %v5595_v43, %v546_v41  ;;  %v4635_v46 = vpop.f32.mrb[15].mxu0 }
 0x666   :  { %5168 = vtanh.f32 %v551_v45  ;;  %v610_v47 = vpop.f32.mrb[12].mxu1  ;;  %v4199_v55 = vmul.f32 -1.442695, %v551_v45 }
 0x667   :  { %v617_v48 = vrot.slane %v610_v47, 4  ;;  %v4642_v49 = vpop.f32.mrb[13].mxu1 }
 0x668   :  { %v613_v50 = vpop.f32.mrb[14].mxu1 }
 0x669   :  { %v619_v51 = vadd.f32 %v617_v48, %v5520_v10  ;;  %v4643_v52 = vpop.f32.mrb[15].mxu1 }
 0x66b   :  { %5170 = vtanh.f32 %v619_v51  ;;  %v4201_v56 = vmul.f32 -1.442695, %v619_v51 }
 0x66c   :  { %5172 = vpow2.f32 %v4199_v55 }
 0x66d   :  { %5174 = vpow2.f32 %v4201_v56 }
 0x670   :  { %v5169_v53 = vpop.eup %5168 }
 0x671   :  { %561 = vrot.lane.b32.xlu0 %v5169_v53, %s5418_s28 }
 0x675   :  { %v5171_v54 = vpop.eup %5170 }
 0x676   :  { %632 = vrot.lane.b32.xlu1 %v5171_v54, %s5418_s28  ;;  %v5173_v57 = vpop.eup %5172 }
 0x677   :  { %v555_v58 = vadd.f32 1.0, %v5173_v57  ;;  %v5175_v59 = vpop.eup %5174 }
 0x678   :  { %v623_v60 = vadd.f32 1.0, %v5175_v59 }
 0x679   :  { %5176 = vrcp.f32 %v555_v58 }
 0x67a   :  { %5178 = vrcp.f32 %v623_v60 }
 0x683   :  { %v5177_v61 = vpop.eup %5176 }
 0x684   :  { %v5179_v2 = vpop.eup %5178  ;;  %v559_v6 = vmul.f32 %v5177_v61, %v5604_v17 }
 0x685   :  { %v630_v13 = vmul.f32 %v5179_v2, %v628_v12 }
 0x6e3   :  { %v562_v62 = vpop.permute.xlu0 %561 }
 0x6e4   :  { %v564_v63 = vmul.f32 %v5177_v61, %v562_v62 }
 0x6e6   :  { %566 = vrot.lane.b32.xlu0 %v564_v63, %s5418_s28 }
 0x6e8   :  { %v633_v3 = vpop.permute.xlu1 %632 }
 0x6e9   :  { %v635_v4 = vmul.f32 %v5179_v2, %v633_v3 }
 0x6eb   :  { %637 = vrot.lane.b32.xlu1 %v635_v4, %s5418_s28 }
 0x758   :  { %v567_v9 = vpop.permute.xlu0 %566 }
 0x759   :  { %v5642_v11 = vadd.f32 %v567_v9, %v559_v6 }
 0x75b   :  { %5180 = vtanh.f32 %v5642_v11 }
 0x75d   :  { %v638_v14 = vpop.permute.xlu1 %637 }
 0x75e   :  { %v5646_v15 = vadd.f32 %v638_v14, %v630_v13 }
 0x760   :  { %5182 = vtanh.f32 %v5646_v15  ;;  %v819_v63 = vrot.slane %v5646_v15, 6 }
 0x765   :  { %v5181_v16 = vpop.eup %5180 }
 0x766   :  { %572 = vrot.lane.b32.xlu0 %v5181_v16, %s5418_s28 }
 0x76a   :  { %v5183_v19 = vpop.eup %5182 }
 0x76b   :  { %643 = vrot.lane.b32.xlu1 %v5183_v19, %s5418_s28 }
 0x7d8   :  { %v573_v17 = vpop.permute.xlu0 %572 }
 0x7d9   :  { %v575_v20 = vmul.f32 %v5177_v61, %v573_v17 }
 0x7db   :  { %v648_v21 = vpack.c.bf16 %v575_v20, %v575_v20 }
 0x7dd   :  { %650 = vrot.lane.b32.xlu0 %v648_v21, %s5419_s21  ;;  %v644_v18 = vpop.permute.xlu1 %643 }
 0x7de   :  { %v646_v22 = vmul.f32 %v5179_v2, %v644_v18 }
 0x7e0   :  { %v647_v23 = vpack.c.bf16 %v646_v22, %v646_v22 }
 0x7e2   :  { %v696_v24 = vrot.slane %v647_v23, 2 }
 0x7e4   :  { %697 = vrot.lane.b32.xlu1 %v696_v24, %s5419_s21 }
 0x84f   :  { %v651_v25 = vpop.permute.xlu0 %650 }
 0x850   :  { %4649 = vmatmul.mubr.msk.bf16.vlgmr.msra.gmra.mrb[16].mxu0 %vm180_vm2, %v651_v25 }
 0x851   :  { %4661 = vmatpush3.bf16.msra.mxu0 %v5485_v1  ;;  %4664 = vmatprep.mubr.msk.bf16.mxu0 %vm5416_vm1, %v5415_v0 }
 0x852   :  { %4662 = vmatprep.subr.bf16.mxu0 %v5415_v0 }
 0x855   :  { %4663 = vmatpush3.bf16.msra.mxu0 %v5502_v5 }
 0x856   :  { %v698_v26 = vpop.permute.xlu1 %697  ;;  %4676 = vmatprep.subr.bf16.mxu0 %v5415_v0 }
 0x857   :  { %4657 = vmatmul.mubr.msk.bf16.vlgmr.msra.gmra.mrb[16].mxu1 %vm180_vm2, %v698_v26 }
 0x858   :  { %4665 = vmatmul.mubr.msk.bf16.vlgmr.msra.gmra.mrb[20].mxu0 %vm180_vm2, %v698_v26  ;;  %4669 = vmatpush3.bf16.msra.mxu1 %v5537_v28 }
 0x859   :  { %4677 = vmatpush3.bf16.msra.mxu0 %v5552_v30  ;;  %4670 = vmatprep.subr.bf16.mxu1 %v5415_v0 }
 0x85a   :  { %4678 = vmatprep.subr.bf16.mxu0 %v5415_v0  ;;  %4672 = vmatprep.mubr.msk.bf16.mxu1 %vm5416_vm1, %v5415_v0 }
 0x85b   :  { %4680 = vmatprep.mubr.msk.bf16.mxu0 %vm5416_vm1, %v5415_v0 }
 0x85c   :  { %4671 = vmatpush3.bf16.msra.mxu1 %v5544_v29 }
 0x85d   :  { %4679 = vmatpush3.bf16.msra.mxu0 %v5559_v31  ;;  %4684 = vmatprep.subr.bf16.mxu1 %v5415_v0 }
 0x85e   :  { %4692 = vmatprep.subr.bf16.mxu0 %v5415_v0 }
 0x923   :  { %v689_v27 = vpop.f32.mrb[16].mxu0 }
 0x924   :  { %v4650_v32 = vpop.f32.mrb[17].mxu0 }
 0x925   :  { %v692_v33 = vpop.f32.mrb[18].mxu0 }
 0x926   :  { %v4651_v34 = vpop.f32.mrb[19].mxu0 }
 0x92a   :  { %v736_v35 = vpop.f32.mrb[16].mxu1 }
 0x92b   :  { %v737_v38 = vadd.f32 %v736_v35, %v689_v27  ;;  %v801_v39 = vpop.f32.mrb[20].mxu0  ;;  %v4658_v40 = vpop.f32.mrb[17].mxu1 }
 0x92c   :  { %v808_v41 = vrot.slane %v801_v39, 2  ;;  %v4666_v42 = vpop.f32.mrb[21].mxu0  ;;  %v739_v44 = vpop.f32.mrb[18].mxu1  ;;  %v5716_v39 = vadd.f32 %v5517_v8, %v5515_v7 }
 0x92d   :  { %v742_v45 = vadd.f32 %v5595_v43, %v737_v38  ;;  %v804_v46 = vpop.f32.mrb[22].mxu0  ;;  %v4659_v47 = vpop.f32.mrb[19].mxu1 }
 0x92e   :  { %v810_v48 = vadd.f32 %v808_v41, %v5520_v10  ;;  %v4667_v49 = vpop.f32.mrb[23].mxu0 }
 0x92f   :  { %5184 = vtanh.f32 %v742_v45  ;;  %v4204_v52 = vmul.f32 -1.442695, %v742_v45 }
 0x930   :  { %5186 = vtanh.f32 %v810_v48  ;;  %v4206_v53 = vmul.f32 -1.442695, %v810_v48 }
 0x931   :  { %5188 = vpow2.f32 %v4204_v52 }
 0x932   :  { %5190 = vpow2.f32 %v4206_v53 }
 0x939   :  { %v5185_v50 = vpop.eup %5184 }
 0x93a   :  { %v5187_v51 = vpop.eup %5186  ;;  %752 = vrot.lane.b32.xlu1 %v5185_v50, %s5418_s28 }
 0x93b   :  { %823 = vrot.lane.b32.xlu0 %v5187_v51, %s5418_s28  ;;  %v5189_v54 = vpop.eup %5188 }
 0x93c   :  { %v5191_v55 = vpop.eup %5190  ;;  %v746_v56 = vadd.f32 1.0, %v5189_v54 }
 0x93d   :  { %v814_v57 = vadd.f32 1.0, %v5191_v55 }
 0x93e   :  { %5192 = vrcp.f32 %v746_v56 }
 0x93f   :  { %5194 = vrcp.f32 %v814_v57 }
 0x948   :  { %v5193_v10 = vpop.eup %5192 }
 0x949   :  { %v5195_v59 = vpop.eup %5194  ;;  %v750_v2 = vmul.f32 %v5193_v10, %v5642_v11 }
 0x94a   :  { %v821_v3 = vmul.f32 %v5195_v59, %v819_v63 }
 0x9ac   :  { %v753_v58 = vpop.permute.xlu1 %752 }
 0x9ad   :  { %v824_v60 = vpop.permute.xlu0 %823  ;;  %v755_v61 = vmul.f32 %v5193_v10, %v753_v58 }
 0x9ae   :  { %v826_v62 = vmul.f32 %v5195_v59, %v824_v60 }
 0x9af   :  { %757 = vrot.lane.b32.xlu1 %v755_v61, %s5418_s28 }
 0x9b0   :  { %828 = vrot.lane.b32.xlu0 %v826_v62, %s5418_s28 }
 0xa21   :  { %v758_v4 = vpop.permute.xlu1 %757 }
 0xa22   :  { %v829_v6 = vpop.permute.xlu0 %828  ;;  %v5682_v9 = vadd.f32 %v758_v4, %v750_v2 }
 0xa23   :  { %v5684_v12 = vadd.f32 %v829_v6, %v821_v3 }
 0xa24   :  { %5196 = vtanh.f32 %v5682_v9 }
 0xa25   :  { %5198 = vtanh.f32 %v5684_v12  ;;  %v1007_v58 = vrot.slane %v5684_v12, 6 }
 0xa2e   :  { %v5197_v13 = vpop.eup %5196 }
 0xa2f   :  { %v5199_v14 = vpop.eup %5198  ;;  %763 = vrot.lane.b32.xlu1 %v5197_v13, %s5418_s28 }
 0xa30   :  { %834 = vrot.lane.b32.xlu0 %v5199_v14, %s5418_s28 }
 0xaa1   :  { %v764_v15 = vpop.permute.xlu1 %763 }
 0xaa2   :  { %v835_v16 = vpop.permute.xlu0 %834  ;;  %v766_v11 = vmul.f32 %v5193_v10, %v764_v15 }
 0xaa3   :  { %v837_v19 = vmul.f32 %v5195_v59, %v835_v16 }
 0xaa4   :  { %v839_v17 = vpack.c.bf16 %v766_v11, %v766_v11 }
 0xaa5   :  { %v838_v20 = vpack.c.bf16 %v837_v19, %v837_v19 }
 0xaa6   :  { %841 = vrot.lane.b32.xlu0 %v839_v17, %s5419_s21 }
 0xaa7   :  { %v887_v21 = vrot.slane %v838_v20, 3 }
 0xaa9   :  { %888 = vrot.lane.b32.xlu1 %v887_v21, %s5419_s21 }
 0xb18   :  { %v842_v18 = vpop.permute.xlu0 %841 }
 0xb19   :  { %4673 = vmatmul.mubr.msk.bf16.vlgmr.msra.gmra.mrb[20].mxu1 %vm180_vm2, %v842_v18 }
 0xb1a   :  { %4685 = vmatpush3.bf16.msra.mxu1 %v5485_v1  ;;  %4688 = vmatprep.mubr.msk.bf16.mxu1 %vm5416_vm1, %v5415_v0 }
 0xb1b   :  { %v889_v22 = vpop.permute.xlu1 %888  ;;  %4686 = vmatprep.subr.bf16.mxu1 %v5415_v0 }
 0xb1c   :  { %4681 = vmatmul.mubr.msk.bf16.vlgmr.msra.gmra.mrb[24].mxu0 %vm180_vm2, %v889_v22 }
 0xb1d   :  { %4693 = vmatpush3.bf16.msra.mxu0 %v5537_v28  ;;  %4696 = vmatprep.mubr.msk.bf16.mxu0 %vm5416_vm1, %v5415_v0 }
 0xb1e   :  { %4687 = vmatpush3.bf16.msra.mxu1 %v5502_v5  ;;  %4694 = vmatprep.subr.bf16.mxu0 %v5415_v0 }
 0xb1f   :  { %4700 = vmatprep.subr.bf16.mxu1 %v5415_v0 }
 0xb21   :  { %4689 = vmatmul.mubr.msk.bf16.vlgmr.msra.gmra.mrb[24].mxu1 %vm180_vm2, %v889_v22  ;;  %4695 = vmatpush3.bf16.msra.mxu0 %v5544_v29 }
 0xb22   :  { %4701 = vmatpush3.bf16.msra.mxu1 %v5552_v30  ;;  %4708 = vmatprep.subr.bf16.mxu0 %v5415_v0 }
 0xb23   :  { %4702 = vmatprep.subr.bf16.mxu1 %v5415_v0  ;;  %4704 = vmatprep.mubr.msk.bf16.mxu1 %vm5416_vm1, %v5415_v0 }
 0xb26   :  { %4703 = vmatpush3.bf16.msra.mxu1 %v5559_v31 }
 0xb27   :  { %4716 = vmatprep.subr.bf16.mxu1 %v5415_v0 }
 0xbec   :  { %v880_v23 = vpop.f32.mrb[20].mxu1 }
 0xbed   :  { %v4674_v24 = vpop.f32.mrb[21].mxu1 }
 0xbee   :  { %v883_v25 = vpop.f32.mrb[22].mxu1 }
 0xbef   :  { %v927_v26 = vpop.f32.mrb[24].mxu0  ;;  %v4675_v27 = vpop.f32.mrb[23].mxu1 }
 0xbf0   :  { %v928_v32 = vadd.f32 %v927_v26, %v880_v23  ;;  %v4682_v33 = vpop.f32.mrb[25].mxu0 }
 0xbf1   :  { %v930_v34 = vpop.f32.mrb[26].mxu0 }
 0xbf2   :  { %v933_v35 = vadd.f32 %v5595_v43, %v928_v32  ;;  %v4683_v38 = vpop.f32.mrb[27].mxu0 }
 0xbf4   :  { %5200 = vtanh.f32 %v933_v35  ;;  %v992_v40 = vpop.f32.mrb[24].mxu1  ;;  %v4209_v48 = vmul.f32 -1.442695, %v933_v35 }
 0xbf5   :  { %v998_v41 = vadd.f32 %v992_v40, %v5716_v39  ;;  %v4690_v42 = vpop.f32.mrb[25].mxu1 }
 0xbf6   :  { %v995_v44 = vpop.f32.mrb[26].mxu1 }
 0xbf7   :  { %5202 = vtanh.f32 %v998_v41  ;;  %v4691_v45 = vpop.f32.mrb[27].mxu1  ;;  %v4211_v49 = vmul.f32 -1.442695, %v998_v41 }
 0xbf8   :  { %5204 = vpow2.f32 %v4209_v48 }
 0xbf9   :  { %5206 = vpow2.f32 %v4211_v49 }
 0xbfe   :  { %v5201_v46 = vpop.eup %5200 }
 0xbff   :  { %943 = vrot.lane.b32.xlu0 %v5201_v46, %s5418_s28 }
 0xc01   :  { %v5203_v47 = vpop.eup %5202 }
 0xc02   :  { %1011 = vrot.lane.b32.xlu1 %v5203_v47, %s5418_s28  ;;  %v5205_v7 = vpop.eup %5204 }
 0xc03   :  { %v5207_v8 = vpop.eup %5206  ;;  %v937_v50 = vadd.f32 1.0, %v5205_v7 }
 0xc04   :  { %v1002_v51 = vadd.f32 1.0, %v5207_v8 }
 0xc05   :  { %5208 = vrcp.f32 %v937_v50 }
 0xc06   :  { %5210 = vrcp.f32 %v1002_v51 }
 0xc0f   :  { %v5209_v52 = vpop.eup %5208 }
 0xc10   :  { %v5211_v55 = vpop.eup %5210  ;;  %v941_v10 = vmul.f32 %v5209_v52, %v5682_v9 }
 0xc11   :  { %v1009_v61 = vmul.f32 %v5211_v55, %v1007_v58 }
 0xc71   :  { %v944_v53 = vpop.permute.xlu0 %943 }
 0xc72   :  { %v946_v54 = vmul.f32 %v5209_v52, %v944_v53 }
 0xc74   :  { %948 = vrot.lane.b32.xlu0 %v946_v54, %s5418_s28  ;;  %v1012_v56 = vpop.permute.xlu1 %1011 }
 0xc75   :  { %v1014_v57 = vmul.f32 %v5211_v55, %v1012_v56 }
 0xc77   :  { %1016 = vrot.lane.b32.xlu1 %v1014_v57, %s5418_s28 }
 0xce6   :  { %v949_v59 = vpop.permute.xlu0 %948 }
 0xce7   :  { %v5725_v60 = vadd.f32 %v949_v59, %v941_v10 }
 0xce9   :  { %5212 = vtanh.f32 %v5725_v60  ;;  %v1017_v62 = vpop.permute.xlu1 %1016 }
 0xcea   :  { %v5728_v63 = vadd.f32 %v1017_v62, %v1009_v61 }
 0xcec   :  { %5214 = vtanh.f32 %v5728_v63 }
 0xcf3   :  { %v5213_v2 = vpop.eup %5212 }
 0xcf4   :  { %954 = vrot.lane.b32.xlu0 %v5213_v2, %s5418_s28 }
 0xcf6   :  { %v5215_v3 = vpop.eup %5214 }
 0xcf7   :  { %1022 = vrot.lane.b32.xlu1 %v5215_v3, %s5418_s28 }
 0xd66   :  { %v955_v4 = vpop.permute.xlu0 %954 }
 0xd67   :  { %v957_v6 = vmul.f32 %v5209_v52, %v955_v4 }
 0xd69   :  { %v1027_v9 = vpack.c.bf16 %v957_v6, %v957_v6  ;;  %v1023_v12 = vpop.permute.xlu1 %1022 }
 0xd6a   :  { %v1025_v13 = vmul.f32 %v5211_v55, %v1023_v12  ;;  %v1197_v55 = vrot.slane %v5728_v63, 6 }
 0xd6b   :  { %1029 = vrot.lane.b32.xlu0 %v1027_v9, %s5419_s21 }
 0xd6c   :  { %v1026_v14 = vpack.c.bf16 %v1025_v13, %v1025_v13 }
 0xd6e   :  { %1075 = vrot.lane.b32.xlu1 %v1026_v14, %s5419_s21 }
 0xddd   :  { %v1030_v15 = vpop.permute.xlu0 %1029 }
 0xdde   :  { %4697 = vmatmul.mubr.msk.bf16.vlgmr.msra.gmra.mrb[28].mxu0 %vm180_vm2, %v1030_v15 }
 0xddf   :  { %4709 = vmatpush3.bf16.msra.mxu0 %v5485_v1  ;;  %4712 = vmatprep.mubr.msk.bf16.mxu0 %vm5416_vm1, %v5415_v0 }
 0xde0   :  { %4710 = vmatprep.subr.bf16.mxu0 %v5415_v0  ;;  %v1076_v16 = vpop.permute.xlu1 %1075 }
 0xde1   :  { %4705 = vmatmul.mubr.msk.bf16.vlgmr.msra.gmra.mrb[28].mxu1 %vm180_vm2, %v1076_v16 }
 0xde2   :  { %4717 = vmatpush3.bf16.msra.mxu1 %v5537_v28  ;;  %4720 = vmatprep.mubr.msk.bf16.mxu1 %vm5416_vm1, %v5415_v0 }
 0xde3   :  { %4711 = vmatpush3.bf16.msra.mxu0 %v5502_v5  ;;  %4718 = vmatprep.subr.bf16.mxu1 %v5415_v0 }
 0xde4   :  { %4724 = vmatprep.subr.bf16.mxu0 %v5415_v0 }
 0xde6   :  { %4713 = vmatmul.mubr.msk.bf16.vlgmr.msra.gmra.mrb[32].mxu0 %vm180_vm2, %v1076_v16  ;;  %4719 = vmatpush3.bf16.msra.mxu1 %v5544_v29 }
 0xde7   :  { %4725 = vmatpush3.bf16.msra.mxu0 %v5552_v30  ;;  %4732 = vmatprep.subr.bf16.mxu1 %v5415_v0 }
 0xde8   :  { %4726 = vmatprep.subr.bf16.mxu0 %v5415_v0  ;;  %4728 = vmatprep.mubr.msk.bf16.mxu0 %vm5416_vm1, %v5415_v0 }
 0xdeb   :  { %4727 = vmatpush3.bf16.msra.mxu0 %v5559_v31 }
 0xdec   :  { %4740 = vmatprep.subr.bf16.mxu0 %v5415_v0 }
 0xeb1   :  { %v1068_v11 = vpop.f32.mrb[28].mxu0 }
 0xeb2   :  { %v4698_v19 = vpop.f32.mrb[29].mxu0 }
 0xeb3   :  { %v1071_v17 = vpop.f32.mrb[30].mxu0 }
 0xeb4   :  { %v4699_v20 = vpop.f32.mrb[31].mxu0  ;;  %v1114_v21 = vpop.f32.mrb[28].mxu1 }
 0xeb5   :  { %v1115_v18 = vadd.f32 %v1114_v21, %v1068_v11  ;;  %v4706_v22 = vpop.f32.mrb[29].mxu1 }
 0xeb6   :  { %v1117_v23 = vpop.f32.mrb[30].mxu1 }
 0xeb7   :  { %v1120_v24 = vadd.f32 %v5595_v43, %v1115_v18  ;;  %v4707_v25 = vpop.f32.mrb[31].mxu1 }
 0xeb9   :  { %5216 = vtanh.f32 %v1120_v24  ;;  %v1179_v26 = vpop.f32.mrb[32].mxu0  ;;  %v4214_v41 = vmul.f32 -1.442695, %v1120_v24 }
 0xeba   :  { %v1186_v27 = vrot.slane %v1179_v26, 6  ;;  %v4714_v32 = vpop.f32.mrb[33].mxu0 }
 0xebb   :  { %v1182_v33 = vpop.f32.mrb[34].mxu0 }
 0xebc   :  { %v1188_v34 = vadd.f32 %v1186_v27, %v5716_v39  ;;  %v4715_v35 = vpop.f32.mrb[35].mxu0 }
 0xebe   :  { %5218 = vtanh.f32 %v1188_v34  ;;  %v4216_v42 = vmul.f32 -1.442695, %v1188_v34 }
 0xebf   :  { %5220 = vpow2.f32 %v4214_v41 }
 0xec0   :  { %5222 = vpow2.f32 %v4216_v42 }
 0xec3   :  { %v5217_v38 = vpop.eup %5216 }
 0xec4   :  { %1130 = vrot.lane.b32.xlu0 %v5217_v38, %s5418_s28 }
 0xec8   :  { %v5219_v40 = vpop.eup %5218 }
 0xec9   :  { %1201 = vrot.lane.b32.xlu1 %v5219_v40, %s5418_s28  ;;  %v5221_v44 = vpop.eup %5220 }
 0xeca   :  { %v1124_v45 = vadd.f32 1.0, %v5221_v44  ;;  %v5223_v46 = vpop.eup %5222 }
 0xecb   :  { %v1192_v47 = vadd.f32 1.0, %v5223_v46 }
 0xecc   :  { %5224 = vrcp.f32 %v1124_v45 }
 0xecd   :  { %5226 = vrcp.f32 %v1192_v47 }
 0xed6   :  { %v5225_v48 = vpop.eup %5224 }
 0xed7   :  { %v5227_v8 = vpop.eup %5226  ;;  %v1128_v52 = vmul.f32 %v5225_v48, %v5725_v60 }
 0xed8   :  { %v1199_v56 = vmul.f32 %v5227_v8, %v1197_v55 }
 0xf36   :  { %v1131_v49 = vpop.permute.xlu0 %1130 }
 0xf37   :  { %v1133_v7 = vmul.f32 %v5225_v48, %v1131_v49 }
 0xf39   :  { %1135 = vrot.lane.b32.xlu0 %v1133_v7, %s5418_s28 }
 0xf3b   :  { %v1202_v50 = vpop.permute.xlu1 %1201 }
 0xf3c   :  { %v1204_v51 = vmul.f32 %v5227_v8, %v1202_v50 }
 0xf3e   :  { %1206 = vrot.lane.b32.xlu1 %v1204_v51, %s5418_s28 }
 0xfab   :  { %v1136_v53 = vpop.permute.xlu0 %1135 }
 0xfac   :  { %v5763_v54 = vadd.f32 %v1136_v53, %v1128_v52 }
 0xfae   :  { %5228 = vtanh.f32 %v5763_v54 }
 0xfb0   :  { %v1207_v57 = vpop.permute.xlu1 %1206 }
 0xfb1   :  { %v5767_v10 = vadd.f32 %v1207_v57, %v1199_v56 }
 0xfb3   :  { %5230 = vtanh.f32 %v5767_v10  ;;  %v1388_v42 = vrot.slane %v5767_v10, 6  ;;  %v5817_v10 = vld [vmem:[%s6841_s3] sm:$0xff]  }
 0xfb8   :  { %v5229_v58 = vpop.eup %5228 }
 0xfb9   :  { %1141 = vrot.lane.b32.xlu0 %v5229_v58, %s5418_s28 }
 0xfbd   :  { %v5231_v59 = vpop.eup %5230 }
 0xfbe   :  { %1212 = vrot.lane.b32.xlu1 %v5231_v59, %s5418_s28  ;;  %v5827_v59 = vld [vmem:[%s6845_s5] sm:$0xff]  }
0x102b   :  { %v1142_v60 = vpop.permute.xlu0 %1141 }
0x102c   :  { %v1144_v61 = vmul.f32 %v5225_v48, %v1142_v60  ;;  %v5835_v60 = vld [vmem:[%s6841_s3 + $0x8] sm:$0xff]  }
0x102e   :  { %v1217_v62 = vpack.c.bf16 %v1144_v61, %v1144_v61  ;;  %v5844_v61 = vld [vmem:[%s6845_s5 + $0x8] sm:$0xff]  }
0x1030   :  { %v1213_v2 = vpop.permute.xlu1 %1212  ;;  %1219 = vrot.lane.b32.xlu0 %v1217_v62, %s5419_s21  ;;  %v5850_v62 = vld [vmem:[%s6846_s4] sm:$0xff]  }
0x1031   :  { %v1215_v63 = vmul.f32 %v5227_v8, %v1213_v2  ;;  %v5860_v2 = vld [vmem:[%s6846_s4 + $0x8] sm:$0xff]  }
0x1033   :  { %v1216_v3 = vpack.c.bf16 %v1215_v63, %v1215_v63 }
0x1035   :  { %v1265_v4 = vrot.slane %v1216_v3, 1 }
0x1037   :  { %1266 = vrot.lane.b32.xlu1 %v1265_v4, %s5419_s21 }
0x10a2   :  { %v1220_v6 = vpop.permute.xlu0 %1219 }
0x10a3   :  { %4721 = vmatmul.mubr.msk.bf16.vlgmr.msra.gmra.mrb[32].mxu1 %vm180_vm2, %v1220_v6 }
0x10a4   :  { %4733 = vmatpush3.bf16.msra.mxu1 %v5485_v1  ;;  %4736 = vmatprep.mubr.msk.bf16.mxu1 %vm5416_vm1, %v5415_v0 }
0x10a5   :  { %4734 = vmatprep.subr.bf16.mxu1 %v5415_v0 }
0x10a8   :  { %4735 = vmatpush3.bf16.msra.mxu1 %v5502_v5 }
0x10a9   :  { %v1267_v9 = vpop.permute.xlu1 %1266  ;;  %4748 = vmatprep.subr.bf16.mxu1 %v5415_v0 }
0x10aa   :  { %4729 = vmatmul.mubr.msk.bf16.vlgmr.msra.gmra.mrb[36].mxu0 %vm180_vm2, %v1267_v9 }
0x10ab   :  { %4737 = vmatmul.mubr.msk.bf16.vlgmr.msra.gmra.mrb[36].mxu1 %vm180_vm2, %v1267_v9  ;;  %4741 = vmatpush3.bf16.msra.mxu0 %v5537_v28 }
0x10ac   :  { %4742 = vmatprep.subr.bf16.mxu0 %v5415_v0  ;;  %4749 = vmatpush3.bf16.msra.mxu1 %v5552_v30 }
0x10ad   :  { %4744 = vmatprep.mubr.msk.bf16.mxu0 %vm5416_vm1, %v5415_v0  ;;  %4750 = vmatprep.subr.bf16.mxu1 %v5415_v0 }
0x10ae   :  { %4752 = vmatprep.mubr.msk.bf16.mxu1 %vm5416_vm1, %v5415_v0 }
0x10af   :  { %4743 = vmatpush3.bf16.msra.mxu0 %v5544_v29 }
0x10b0   :  { %4756 = vmatprep.subr.bf16.mxu0 %v5415_v0  ;;  %4751 = vmatpush3.bf16.msra.mxu1 %v5559_v31 }
0x10b1   :  { %4764 = vmatprep.subr.bf16.mxu1 %v5415_v0 }
0x1176   :  { %v1258_v1 = vpop.f32.mrb[32].mxu1 }
0x1177   :  { %v4722_v5 = vpop.f32.mrb[33].mxu1 }
0x1178   :  { %v1261_v28 = vpop.f32.mrb[34].mxu1 }
0x1179   :  { %v4723_v30 = vpop.f32.mrb[35].mxu1 }
0x117d   :  { %v1305_v12 = vpop.f32.mrb[36].mxu0 }
0x117e   :  { %v1306_v13 = vadd.f32 %v1305_v12, %v1258_v1  ;;  %v4730_v14 = vpop.f32.mrb[37].mxu0  ;;  %v1370_v15 = vpop.f32.mrb[36].mxu1 }
0x117f   :  { %v1308_v16 = vpop.f32.mrb[38].mxu0  ;;  %v1377_v11 = vrot.slane %v1370_v15, 4  ;;  %v4738_v19 = vpop.f32.mrb[37].mxu1 }
0x1180   :  { %v1311_v17 = vadd.f32 %v5595_v43, %v1306_v13  ;;  %v4731_v29 = vpop.f32.mrb[39].mxu0  ;;  %v1373_v20 = vpop.f32.mrb[38].mxu1 }
0x1181   :  { %v1379_v21 = vadd.f32 %v1377_v11, %v5716_v39  ;;  %v4739_v31 = vpop.f32.mrb[39].mxu1 }
0x1182   :  { %5232 = vtanh.f32 %v1311_v17  ;;  %v4219_v23 = vmul.f32 -1.442695, %v1311_v17 }
0x1183   :  { %5234 = vtanh.f32 %v1379_v21  ;;  %v4221_v24 = vmul.f32 -1.442695, %v1379_v21 }
0x1184   :  { %5236 = vpow2.f32 %v4219_v23 }
0x1185   :  { %5238 = vpow2.f32 %v4221_v24 }
0x118c   :  { %v5233_v18 = vpop.eup %5232 }
0x118d   :  { %v5235_v22 = vpop.eup %5234  ;;  %1321 = vrot.lane.b32.xlu0 %v5233_v18, %s5418_s28 }
0x118e   :  { %1392 = vrot.lane.b32.xlu1 %v5235_v22, %s5418_s28  ;;  %v5237_v25 = vpop.eup %5236 }
0x118f   :  { %v5239_v26 = vpop.eup %5238  ;;  %v1315_v27 = vadd.f32 1.0, %v5237_v25 }
0x1190   :  { %v1383_v32 = vadd.f32 1.0, %v5239_v26 }
0x1191   :  { %5240 = vrcp.f32 %v1315_v27 }
0x1192   :  { %5242 = vrcp.f32 %v1383_v32 }
0x119b   :  { %v5241_v33 = vpop.eup %5240 }
0x119c   :  { %v5243_v35 = vpop.eup %5242  ;;  %v1319_v44 = vmul.f32 %v5241_v33, %v5763_v54 }
0x119d   :  { %v1390_v46 = vmul.f32 %v5243_v35, %v1388_v42 }
0x11ff   :  { %v1322_v34 = vpop.permute.xlu0 %1321 }
0x1200   :  { %v1324_v38 = vmul.f32 %v5241_v33, %v1322_v34  ;;  %v1393_v40 = vpop.permute.xlu1 %1392 }
0x1201   :  { %v1395_v41 = vmul.f32 %v5243_v35, %v1393_v40 }
0x1202   :  { %1326 = vrot.lane.b32.xlu0 %v1324_v38, %s5418_s28 }
0x1203   :  { %1397 = vrot.lane.b32.xlu1 %v1395_v41, %s5418_s28 }
0x1274   :  { %v1327_v45 = vpop.permute.xlu0 %1326 }
0x1275   :  { %v5803_v47 = vadd.f32 %v1327_v45, %v1319_v44  ;;  %v1398_v48 = vpop.permute.xlu1 %1397 }
0x1276   :  { %v5805_v49 = vadd.f32 %v1398_v48, %v1390_v46 }
0x1277   :  { %5244 = vtanh.f32 %v5803_v47 }
0x1278   :  { %5246 = vtanh.f32 %v5805_v49 }
0x1281   :  { %v5245_v7 = vpop.eup %5244 }
0x1282   :  { %v5247_v8 = vpop.eup %5246  ;;  %1332 = vrot.lane.b32.xlu0 %v5245_v7, %s5418_s28 }
0x1283   :  { %1403 = vrot.lane.b32.xlu1 %v5247_v8, %s5418_s28 }
0x12f4   :  { %v1333_v50 = vpop.permute.xlu0 %1332 }
0x12f5   :  { %v1335_v51 = vmul.f32 %v5241_v33, %v1333_v50  ;;  %v1404_v52 = vpop.permute.xlu1 %1403 }
0x12f6   :  { %v1406_v53 = vmul.f32 %v5243_v35, %v1404_v52  ;;  %v1579_v35 = vrot.slane %v5805_v49, 6 }
0x12f7   :  { %v1408_v54 = vpack.c.bf16 %v1335_v51, %v1335_v51 }
0x12f8   :  { %v1407_v55 = vpack.c.bf16 %v1406_v53, %v1406_v53 }
0x12f9   :  { %1410 = vrot.lane.b32.xlu0 %v1408_v54, %s5419_s21 }
0x12fa   :  { %v1456_v56 = vrot.slane %v1407_v55, 2 }
0x12fc   :  { %1457 = vrot.lane.b32.xlu1 %v1456_v56, %s5419_s21  ;;  %v5906_v56 = vld [vmem:[%s6844_s2] ss:$0 sm:$0xff] }
0x136b   :  { %v1411_v57 = vpop.permute.xlu0 %1410 }
0x136c   :  { %4745 = vmatmul.mubr.msk.bf16.vlgmr.msra.gmra.mrb[40].mxu0 %vm180_vm2, %v1411_v57  ;;  %v5910_v57 = vadd.f32 %v5906_v56, %v5576_v37 }
0x136d   :  { %4757 = vmatpush3.bf16.msra.mxu0 %v5817_v10  ;;  %4760 = vmatprep.mubr.msk.bf16.mxu0 %vm5416_vm1, %v5415_v0 }
0x136e   :  { %4758 = vmatprep.subr.bf16.mxu0 %v5415_v0  ;;  %v1458_v58 = vpop.permute.xlu1 %1457 }
0x136f   :  { %4753 = vmatmul.mubr.msk.bf16.vlgmr.msra.gmra.mrb[40].mxu1 %vm180_vm2, %v1458_v58 }
0x1370   :  { %4765 = vmatpush3.bf16.msra.mxu1 %v5827_v59  ;;  %4768 = vmatprep.mubr.msk.bf16.mxu1 %vm5416_vm1, %v5415_v0 }
0x1371   :  { %4759 = vmatpush3.bf16.msra.mxu0 %v5835_v60  ;;  %4766 = vmatprep.subr.bf16.mxu1 %v5415_v0 }
0x1372   :  { %4772 = vmatprep.subr.bf16.mxu0 %v5415_v0 }
0x1374   :  { %4761 = vmatmul.mubr.msk.bf16.vlgmr.msra.gmra.mrb[44].mxu0 %vm180_vm2, %v1458_v58  ;;  %4767 = vmatpush3.bf16.msra.mxu1 %v5844_v61 }
0x1375   :  { %4773 = vmatpush3.bf16.msra.mxu0 %v5850_v62  ;;  %4780 = vmatprep.subr.bf16.mxu1 %v5415_v0 }
0x1376   :  { %4774 = vmatprep.subr.bf16.mxu0 %v5415_v0  ;;  %4776 = vmatprep.mubr.msk.bf16.mxu0 %vm5416_vm1, %v5415_v0 }
0x1379   :  { %4775 = vmatpush3.bf16.msra.mxu0 %v5860_v2 }
0x137a   :  { %4788 = vmatprep.subr.bf16.mxu0 %v5415_v0 }
0x143f   :  { %v1449_v63 = vpop.f32.mrb[40].mxu0 }
0x1440   :  { %v4746_v3 = vpop.f32.mrb[41].mxu0 }
0x1441   :  { %v1452_v4 = vpop.f32.mrb[42].mxu0 }
0x1442   :  { %v4747_v6 = vpop.f32.mrb[43].mxu0  ;;  %v1496_v9 = vpop.f32.mrb[40].mxu1 }
0x1443   :  { %v1497_v1 = vadd.f32 %v1496_v9, %v1449_v63  ;;  %v4754_v5 = vpop.f32.mrb[41].mxu1 }
0x1444   :  { %v1499_v28 = vpop.f32.mrb[42].mxu1  ;;  %v5916_v5 = vld [vmem:[%s6847_s6] ss:$0 sm:$0xff] }
0x1445   :  { %v1502_v30 = vadd.f32 %v5595_v43, %v1497_v1  ;;  %v4755_v12 = vpop.f32.mrb[43].mxu1 }
0x1447   :  { %5248 = vtanh.f32 %v1502_v30  ;;  %v1561_v13 = vpop.f32.mrb[44].mxu0  ;;  %v4224_v20 = vmul.f32 -1.442695, %v1502_v30 }
0x1448   :  { %v1568_v14 = vrot.slane %v1561_v13, 2  ;;  %v4762_v15 = vpop.f32.mrb[45].mxu0 }
0x1449   :  { %v1564_v16 = vpop.f32.mrb[46].mxu0 }
0x144a   :  { %v1570_v11 = vadd.f32 %v1568_v14, %v5716_v39  ;;  %v4763_v19 = vpop.f32.mrb[47].mxu0 }
0x144c   :  { %5250 = vtanh.f32 %v1570_v11  ;;  %v4226_v21 = vmul.f32 -1.442695, %v1570_v11 }
0x144d   :  { %5252 = vpow2.f32 %v4224_v20 }
0x144e   :  { %5254 = vpow2.f32 %v4226_v21 }
0x1451   :  { %v5249_v17 = vpop.eup %5248 }
0x1452   :  { %1512 = vrot.lane.b32.xlu1 %v5249_v17, %s5418_s28 }
0x1456   :  { %v5251_v29 = vpop.eup %5250 }
0x1457   :  { %1583 = vrot.lane.b32.xlu0 %v5251_v29, %s5418_s28  ;;  %v5253_v43 = vpop.eup %5252 }
0x1458   :  { %v1506_v31 = vadd.f32 1.0, %v5253_v43  ;;  %v5255_v18 = vpop.eup %5254 }
0x1459   :  { %v1574_v22 = vadd.f32 1.0, %v5255_v18 }
0x145a   :  { %5256 = vrcp.f32 %v1506_v31 }
0x145b   :  { %5258 = vrcp.f32 %v1574_v22 }
0x1464   :  { %v5257_v23 = vpop.eup %5256 }
0x1465   :  { %v5259_v25 = vpop.eup %5258  ;;  %v1510_v32 = vmul.f32 %v5257_v23, %v5803_v47 }
0x1466   :  { %v1581_v38 = vmul.f32 %v5259_v25, %v1579_v35 }
0x14c4   :  { %v1513_v39 = vpop.permute.xlu1 %1512 }
0x14c5   :  { %v1515_v24 = vmul.f32 %v5257_v23, %v1513_v39 }
0x14c7   :  { %1517 = vrot.lane.b32.xlu1 %v1515_v24, %s5418_s28 }
0x14c9   :  { %v1584_v26 = vpop.permute.xlu0 %1583 }
0x14ca   :  { %v1586_v27 = vmul.f32 %v5259_v25, %v1584_v26 }
0x14cc   :  { %1588 = vrot.lane.b32.xlu0 %v1586_v27, %s5418_s28 }
0x1539   :  { %v1518_v33 = vpop.permute.xlu1 %1517 }
0x153a   :  { %v5871_v34 = vadd.f32 %v1518_v33, %v1510_v32 }
0x153c   :  { %5260 = vtanh.f32 %v5871_v34 }
0x153e   :  { %v1589_v40 = vpop.permute.xlu0 %1588 }
0x153f   :  { %v5875_v41 = vadd.f32 %v1589_v40, %v1581_v38 }
0x1541   :  { %5262 = vtanh.f32 %v5875_v41 }
0x1546   :  { %v5261_v42 = vpop.eup %5260 }
0x1547   :  { %1523 = vrot.lane.b32.xlu1 %v5261_v42, %s5418_s28 }
0x154b   :  { %v5263_v44 = vpop.eup %5262 }
0x154c   :  { %1594 = vrot.lane.b32.xlu0 %v5263_v44, %s5418_s28 }
0x15b9   :  { %v1524_v45 = vpop.permute.xlu1 %1523 }
0x15ba   :  { %v1526_v46 = vmul.f32 %v5257_v23, %v1524_v45  ;;  %v1767_v23 = vrot.slane %v5875_v41, 6 }
0x15bc   :  { %v1599_v47 = vpack.c.bf16 %v1526_v46, %v1526_v46 }
0x15be   :  { %v1595_v48 = vpop.permute.xlu0 %1594  ;;  %1601 = vrot.lane.b32.xlu0 %v1599_v47, %s5419_s21 }
0x15bf   :  { %v1597_v49 = vmul.f32 %v5259_v25, %v1595_v48 }
0x15c1   :  { %v1598_v7 = vpack.c.bf16 %v1597_v49, %v1597_v49 }
0x15c3   :  { %v1647_v8 = vrot.slane %v1598_v7, 3 }
0x15c5   :  { %1648 = vrot.lane.b32.xlu1 %v1647_v8, %s5419_s21 }
0x1630   :  { %v1602_v50 = vpop.permute.xlu0 %1601 }
0x1631   :  { %4769 = vmatmul.mubr.msk.bf16.vlgmr.msra.gmra.mrb[44].mxu1 %vm180_vm2, %v1602_v50 }
0x1632   :  { %4781 = vmatpush3.bf16.msra.mxu1 %v5817_v10  ;;  %4784 = vmatprep.mubr.msk.bf16.mxu1 %vm5416_vm1, %v5415_v0 }
0x1633   :  { %4782 = vmatprep.subr.bf16.mxu1 %v5415_v0 }
0x1636   :  { %4783 = vmatpush3.bf16.msra.mxu1 %v5835_v60 }
0x1637   :  { %v1649_v51 = vpop.permute.xlu1 %1648  ;;  %4796 = vmatprep.subr.bf16.mxu1 %v5415_v0 }
0x1638   :  { %4777 = vmatmul.mubr.msk.bf16.vlgmr.msra.gmra.mrb[48].mxu0 %vm180_vm2, %v1649_v51 }
0x1639   :  { %4785 = vmatmul.mubr.msk.bf16.vlgmr.msra.gmra.mrb[48].mxu1 %vm180_vm2, %v1649_v51  ;;  %4789 = vmatpush3.bf16.msra.mxu0 %v5827_v59 }
0x163a   :  { %4797 = vmatpush3.bf16.msra.mxu1 %v5850_v62  ;;  %4790 = vmatprep.subr.bf16.mxu0 %v5415_v0 }
0x163b   :  { %4798 = vmatprep.subr.bf16.mxu1 %v5415_v0  ;;  %4792 = vmatprep.mubr.msk.bf16.mxu0 %vm5416_vm1, %v5415_v0 }
0x163c   :  { %4800 = vmatprep.mubr.msk.bf16.mxu1 %vm5416_vm1, %v5415_v0 }
0x163d   :  { %4791 = vmatpush3.bf16.msra.mxu0 %v5844_v61 }
0x163e   :  { %4799 = vmatpush3.bf16.msra.mxu1 %v5860_v2  ;;  %4804 = vmatprep.subr.bf16.mxu0 %v5415_v0 }
0x163f   :  { %4812 = vmatprep.subr.bf16.mxu1 %v5415_v0 }
0x1704   :  { %v1640_v52 = vpop.f32.mrb[44].mxu1 }
0x1705   :  { %v4770_v53 = vpop.f32.mrb[45].mxu1 }
0x1706   :  { %v1643_v54 = vpop.f32.mrb[46].mxu1 }
0x1707   :  { %v4771_v55 = vpop.f32.mrb[47].mxu1 }
0x170b   :  { %v1687_v58 = vpop.f32.mrb[48].mxu0 }
0x170c   :  { %v1688_v63 = vadd.f32 %v1687_v58, %v1640_v52  ;;  %v4778_v3 = vpop.f32.mrb[49].mxu0  ;;  %v1752_v4 = vpop.f32.mrb[48].mxu1 }
0x170d   :  { %v1690_v6 = vpop.f32.mrb[50].mxu0  ;;  %v1758_v9 = vadd.f32 %v1752_v4, %v5910_v57  ;;  %v4786_v1 = vpop.f32.mrb[49].mxu1 }
0x170e   :  { %v1693_v28 = vadd.f32 %v5916_v5, %v1688_v63  ;;  %v4779_v30 = vpop.f32.mrb[51].mxu0  ;;  %v1755_v12 = vpop.f32.mrb[50].mxu1 }
0x170f   :  { %5264 = vtanh.f32 %v1758_v9  ;;  %v4787_v37 = vpop.f32.mrb[51].mxu1  ;;  %v4231_v15 = vmul.f32 -1.442695, %v1758_v9 }
0x1710   :  { %5266 = vtanh.f32 %v1693_v28  ;;  %v4229_v16 = vmul.f32 -1.442695, %v1693_v28 }
0x1711   :  { %5268 = vpow2.f32 %v4231_v15 }
0x1712   :  { %5270 = vpow2.f32 %v4229_v16 }
0x1719   :  { %v5265_v13 = vpop.eup %5264 }
0x171a   :  { %v5267_v14 = vpop.eup %5266  ;;  %1771 = vrot.lane.b32.xlu1 %v5265_v13, %s5418_s28 }
0x171b   :  { %1703 = vrot.lane.b32.xlu0 %v5267_v14, %s5418_s28  ;;  %v5269_v11 = vpop.eup %5268 }
0x171c   :  { %v5271_v19 = vpop.eup %5270  ;;  %v1762_v17 = vadd.f32 1.0, %v5269_v11 }
0x171d   :  { %v1697_v29 = vadd.f32 1.0, %v5271_v19 }
0x171e   :  { %5272 = vrcp.f32 %v1762_v17 }
0x171f   :  { %5274 = vrcp.f32 %v1697_v29 }
0x1728   :  { %v5273_v20 = vpop.eup %5272 }
0x1729   :  { %v5275_v43 = vpop.eup %5274  ;;  %v1769_v39 = vmul.f32 %v5273_v20, %v1767_v23 }
0x172a   :  { %v1701_v24 = vmul.f32 %v5275_v43, %v5871_v34 }
0x178c   :  { %v1772_v21 = vpop.permute.xlu1 %1771 }
0x178d   :  { %v1704_v31 = vpop.permute.xlu0 %1703  ;;  %v1774_v18 = vmul.f32 %v5273_v20, %v1772_v21 }
0x178e   :  { %v1706_v22 = vmul.f32 %v5275_v43, %v1704_v31 }
0x178f   :  { %1776 = vrot.lane.b32.xlu1 %v1774_v18, %s5418_s28 }
0x1790   :  { %1708 = vrot.lane.b32.xlu0 %v1706_v22, %s5418_s28 }
0x1801   :  { %v1777_v25 = vpop.permute.xlu1 %1776 }
0x1802   :  { %v1709_v26 = vpop.permute.xlu0 %1708  ;;  %v5925_v27 = vadd.f32 %v1777_v25, %v1769_v39 }
0x1803   :  { %v5927_v32 = vadd.f32 %v1709_v26, %v1701_v24 }
0x1804   :  { %5276 = vtanh.f32 %v5925_v27  ;;  %v1963_v31 = vrot.slane %v5925_v27, 6 }
0x1805   :  { %5278 = vtanh.f32 %v5927_v32 }
0x180e   :  { %v5277_v33 = vpop.eup %5276 }
0x180f   :  { %v5279_v35 = vpop.eup %5278  ;;  %1782 = vrot.lane.b32.xlu1 %v5277_v33, %s5418_s28 }
0x1810   :  { %1714 = vrot.lane.b32.xlu0 %v5279_v35, %s5418_s28 }
0x1881   :  { %v1783_v38 = vpop.permute.xlu1 %1782 }
0x1882   :  { %v1715_v40 = vpop.permute.xlu0 %1714  ;;  %v1785_v41 = vmul.f32 %v5273_v20, %v1783_v38 }
0x1883   :  { %v1717_v34 = vmul.f32 %v5275_v43, %v1715_v40 }
0x1884   :  { %v1786_v42 = vpack.c.bf16 %v1785_v41, %v1785_v41 }
0x1885   :  { %v1787_v44 = vpack.c.bf16 %v1717_v34, %v1717_v34 }
0x1886   :  { %1835 = vrot.lane.b32.xlu1 %v1786_v42, %s5419_s21 }
0x1887   :  { %1789 = vrot.lane.b32.xlu0 %v1787_v44, %s5419_s21 }
0x18f8   :  { %v1836_v45 = vpop.permute.xlu1 %1835 }
0x18f9   :  { %v1790_v46 = vpop.permute.xlu0 %1789  ;;  %4801 = vmatmul.mubr.msk.bf16.vlgmr.msra.gmra.mrb[52].mxu1 %vm180_vm2, %v1836_v45 }
0x18fa   :  { %4793 = vmatmul.mubr.msk.bf16.vlgmr.msra.gmra.mrb[52].mxu0 %vm180_vm2, %v1790_v46  ;;  %4813 = vmatpush3.bf16.msra.mxu1 %v5827_v59 }
0x18fb   :  { %4805 = vmatpush3.bf16.msra.mxu0 %v5817_v10  ;;  %4808 = vmatprep.mubr.msk.bf16.mxu0 %vm5416_vm1, %v5415_v0 }
0x18fc   :  { %4806 = vmatprep.subr.bf16.mxu0 %v5415_v0  ;;  %4814 = vmatprep.subr.bf16.mxu1 %v5415_v0 }
0x18fd   :  { %4816 = vmatprep.mubr.msk.bf16.mxu1 %vm5416_vm1, %v5415_v0 }
0x18fe   :  { %4815 = vmatpush3.bf16.msra.mxu1 %v5844_v61 }
0x18ff   :  { %4807 = vmatpush3.bf16.msra.mxu0 %v5835_v60  ;;  %4828 = vmatprep.subr.bf16.mxu1 %v5415_v0 }
0x1900   :  { %4820 = vmatprep.subr.bf16.mxu0 %v5415_v0 }
0x1902   :  { %4809 = vmatmul.mubr.msk.bf16.vlgmr.msra.gmra.mrb[56].mxu0 %vm180_vm2, %v1836_v45 }
0x1903   :  { %4821 = vmatpush3.bf16.msra.mxu0 %v5850_v62  ;;  %4824 = vmatprep.mubr.msk.bf16.mxu0 %vm5416_vm1, %v5415_v0 }
0x1904   :  { %4822 = vmatprep.subr.bf16.mxu0 %v5415_v0 }
0x1907   :  { %4823 = vmatpush3.bf16.msra.mxu0 %v5860_v2 }
0x1908   :  { %4836 = vmatprep.subr.bf16.mxu0 %v5415_v0 }
0x19cc   :  { %v1874_v47 = vpop.f32.mrb[52].mxu1 }
0x19cd   :  { %v1828_v48 = vpop.f32.mrb[52].mxu0  ;;  %v4802_v49 = vpop.f32.mrb[53].mxu1 }
0x19ce   :  { %v1875_v7 = vadd.f32 %v1874_v47, %v1828_v48  ;;  %v4794_v8 = vpop.f32.mrb[53].mxu0  ;;  %v1877_v50 = vpop.f32.mrb[54].mxu1 }
0x19cf   :  { %v1831_v51 = vpop.f32.mrb[54].mxu0  ;;  %v4803_v52 = vpop.f32.mrb[55].mxu1 }
0x19d0   :  { %v1880_v53 = vadd.f32 %v5916_v5, %v1875_v7  ;;  %v4795_v54 = vpop.f32.mrb[55].mxu0 }
0x19d2   :  { %5280 = vtanh.f32 %v1880_v53  ;;  %v4234_v28 = vmul.f32 -1.442695, %v1880_v53 }
0x19d5   :  { %v1945_v55 = vpop.f32.mrb[56].mxu0 }
0x19d6   :  { %v1952_v58 = vrot.slane %v1945_v55, 6  ;;  %v4810_v63 = vpop.f32.mrb[57].mxu0 }
0x19d7   :  { %v1948_v3 = vpop.f32.mrb[58].mxu0 }
0x19d8   :  { %v1954_v4 = vadd.f32 %v1952_v58, %v5910_v57  ;;  %v4811_v6 = vpop.f32.mrb[59].mxu0 }
0x19da   :  { %5282 = vtanh.f32 %v1954_v4  ;;  %v4236_v30 = vmul.f32 -1.442695, %v1954_v4 }
0x19db   :  { %5284 = vpow2.f32 %v4234_v28 }
0x19dc   :  { %v5281_v9 = vpop.eup %5280  ;;  %5286 = vpow2.f32 %v4236_v30 }
0x19dd   :  { %1890 = vrot.lane.b32.xlu0 %v5281_v9, %s5418_s28 }
0x19e4   :  { %v5283_v1 = vpop.eup %5282 }
0x19e5   :  { %1967 = vrot.lane.b32.xlu1 %v5283_v1, %s5418_s28  ;;  %v5285_v12 = vpop.eup %5284 }
0x19e6   :  { %v1884_v37 = vadd.f32 1.0, %v5285_v12  ;;  %v5287_v13 = vpop.eup %5286 }
0x19e7   :  { %v1958_v14 = vadd.f32 1.0, %v5287_v13 }
0x19e8   :  { %5288 = vrcp.f32 %v1884_v37 }
0x19e9   :  { %5290 = vrcp.f32 %v1958_v14 }
0x19f2   :  { %v5289_v15 = vpop.eup %5288 }
0x19f3   :  { %v5291_v19 = vpop.eup %5290  ;;  %v1888_v20 = vmul.f32 %v5289_v15, %v5927_v32 }
0x19f4   :  { %v1965_v18 = vmul.f32 %v5291_v19, %v1963_v31 }
0x1a4f   :  { %v1891_v16 = vpop.permute.xlu0 %1890 }
0x1a50   :  { %v1893_v11 = vmul.f32 %v5289_v15, %v1891_v16 }
0x1a52   :  { %1895 = vrot.lane.b32.xlu0 %v1893_v11, %s5418_s28 }
0x1a57   :  { %v1968_v17 = vpop.permute.xlu1 %1967 }
0x1a58   :  { %v1970_v29 = vmul.f32 %v5291_v19, %v1968_v17 }
0x1a5a   :  { %1972 = vrot.lane.b32.xlu1 %v1970_v29, %s5418_s28 }
0x1ac4   :  { %v1896_v21 = vpop.permute.xlu0 %1895 }
0x1ac5   :  { %v5963_v43 = vadd.f32 %v1896_v21, %v1888_v20 }
0x1ac7   :  { %5292 = vtanh.f32 %v5963_v43 }
0x1acc   :  { %v1973_v22 = vpop.permute.xlu1 %1972 }
0x1acd   :  { %v5967_v23 = vadd.f32 %v1973_v22, %v1965_v18 }
0x1acf   :  { %5294 = vtanh.f32 %v5967_v23  ;;  %v2160_v16 = vrot.slane %v5967_v23, 6 }
0x1ad1   :  { %v5293_v39 = vpop.eup %5292 }
0x1ad2   :  { %1901 = vrot.lane.b32.xlu0 %v5293_v39, %s5418_s28 }
0x1ad9   :  { %v5295_v24 = vpop.eup %5294 }
0x1ada   :  { %1978 = vrot.lane.b32.xlu1 %v5295_v24, %s5418_s28 }
0x1b44   :  { %v1902_v25 = vpop.permute.xlu0 %1901 }
0x1b45   :  { %v5972_v26 = vmul.f32 %v5289_v15, %v1902_v25 }
0x1b47   :  { %v1983_v32 = vpack.c.bf16 %v5972_v26, %v5972_v26 }
0x1b49   :  { %1985 = vrot.lane.b32.xlu0 %v1983_v32, %s5419_s21 }
0x1b4c   :  { %v1979_v27 = vpop.permute.xlu1 %1978 }
0x1b4d   :  { %v1981_v33 = vmul.f32 %v5291_v19, %v1979_v27 }
0x1b4f   :  { %v1982_v35 = vpack.c.bf16 %v1981_v33, %v1981_v33 }
0x1b51   :  { %v2031_v38 = vrot.slane %v1982_v35, 1 }
0x1b53   :  { %2032 = vrot.lane.b32.xlu1 %v2031_v38, %s5419_s21 }
0x1bbb   :  { %v1986_v40 = vpop.permute.xlu0 %1985 }
0x1bbc   :  { %4817 = vmatmul.mubr.msk.bf16.vlgmr.msra.gmra.mrb[56].mxu1 %vm180_vm2, %v1986_v40 }
0x1bbd   :  { %4829 = vmatpush3.bf16.msra.mxu1 %v5817_v10  ;;  %4832 = vmatprep.mubr.msk.bf16.mxu1 %vm5416_vm1, %v5415_v0 }
0x1bbe   :  { %4830 = vmatprep.subr.bf16.mxu1 %v5415_v0 }
0x1bc1   :  { %4831 = vmatpush3.bf16.msra.mxu1 %v5835_v60 }
0x1bc2   :  { %4844 = vmatprep.subr.bf16.mxu1 %v5415_v0 }
0x1bc5   :  { %v2033_v41 = vpop.permute.xlu1 %2032 }
0x1bc6   :  { %4825 = vmatmul.mubr.msk.bf16.vlgmr.msra.gmra.mrb[60].mxu0 %vm180_vm2, %v2033_v41  ;;  %4833 = vmatmul.mubr.msk.bf16.vlgmr.msra.gmra.mrb[60].mxu1 %vm180_vm2, %v2033_v41 }
0x1bc7   :  { %4837 = vmatpush3.bf16.msra.mxu0 %v5827_v59  ;;  %4845 = vmatpush3.bf16.msra.mxu1 %v5850_v62 }
0x1bc8   :  { %4838 = vmatprep.subr.bf16.mxu0 %v5415_v0  ;;  %4846 = vmatprep.subr.bf16.mxu1 %v5415_v0 }
0x1bc9   :  { %4840 = vmatprep.mubr.msk.bf16.mxu0 %vm5416_vm1, %v5415_v0  ;;  %4848 = vmatprep.mubr.msk.bf16.mxu1 %vm5416_vm1, %v5415_v0 }
0x1bcb   :  { %4839 = vmatpush3.bf16.msra.mxu0 %v5844_v61  ;;  %4847 = vmatpush3.bf16.msra.mxu1 %v5860_v2 }
0x1bcc   :  { %4852 = vmatprep.subr.bf16.mxu0 %v5415_v0  ;;  %4860 = vmatprep.subr.bf16.mxu1 %v5415_v0 }
0x1c8f   :  { %v2024_v34 = vpop.f32.mrb[56].mxu1 }
0x1c90   :  { %v4818_v42 = vpop.f32.mrb[57].mxu1 }
0x1c91   :  { %v2027_v44 = vpop.f32.mrb[58].mxu1 }
0x1c92   :  { %v4819_v45 = vpop.f32.mrb[59].mxu1 }
0x1c99   :  { %v2071_v46 = vpop.f32.mrb[60].mxu0  ;;  %v2142_v47 = vpop.f32.mrb[60].mxu1 }
0x1c9a   :  { %v2072_v48 = vadd.f32 %v2071_v46, %v2024_v34  ;;  %v2149_v49 = vrot.slane %v2142_v47, 4  ;;  %v4826_v7 = vpop.f32.mrb[61].mxu0  ;;  %v4834_v8 = vpop.f32.mrb[61].mxu1 }
0x1c9b   :  { %v2074_v50 = vpop.f32.mrb[62].mxu0  ;;  %v2145_v51 = vpop.f32.mrb[62].mxu1 }
0x1c9c   :  { %v2077_v52 = vadd.f32 %v5916_v5, %v2072_v48  ;;  %v2151_v53 = vadd.f32 %v2149_v49, %v5910_v57  ;;  %v4827_v54 = vpop.f32.mrb[63].mxu0  ;;  %v4835_v55 = vpop.f32.mrb[63].mxu1 }
0x1c9e   :  { %5296 = vtanh.f32 %v2077_v52  ;;  %v4239_v3 = vmul.f32 -1.442695, %v2077_v52  ;;  %v4241_v4 = vmul.f32 -1.442695, %v2151_v53 }
0x1c9f   :  { %5298 = vtanh.f32 %v2151_v53 }
0x1ca0   :  { %5300 = vpow2.f32 %v4239_v3 }
0x1ca1   :  { %5302 = vpow2.f32 %v4241_v4 }
0x1ca8   :  { %v5297_v58 = vpop.eup %5296 }
0x1ca9   :  { %v5299_v63 = vpop.eup %5298  ;;  %2087 = vrot.lane.b32.xlu0 %v5297_v58, %s5418_s28 }
0x1caa   :  { %2164 = vrot.lane.b32.xlu1 %v5299_v63, %s5418_s28  ;;  %v5301_v6 = vpop.eup %5300 }
0x1cab   :  { %v5303_v9 = vpop.eup %5302  ;;  %v2081_v1 = vadd.f32 1.0, %v5301_v6 }
0x1cac   :  { %v2155_v28 = vadd.f32 1.0, %v5303_v9 }
0x1cad   :  { %5304 = vrcp.f32 %v2081_v1 }
0x1cae   :  { %5306 = vrcp.f32 %v2155_v28 }
0x1cb7   :  { %v5305_v30 = vpop.eup %5304 }
0x1cb8   :  { %v5307_v37 = vpop.eup %5306  ;;  %v2085_v11 = vmul.f32 %v5305_v30, %v5963_v43 }
0x1cb9   :  { %v2162_v17 = vmul.f32 %v5307_v37, %v2160_v16 }
0x1d1b   :  { %v2088_v12 = vpop.permute.xlu0 %2087 }
0x1d1c   :  { %v2090_v13 = vmul.f32 %v5305_v30, %v2088_v12  ;;  %v2165_v14 = vpop.permute.xlu1 %2164 }
0x1d1d   :  { %v2167_v15 = vmul.f32 %v5307_v37, %v2165_v14 }
0x1d1e   :  { %2092 = vrot.lane.b32.xlu0 %v2090_v13, %s5418_s28 }
0x1d1f   :  { %2169 = vrot.lane.b32.xlu1 %v2167_v15, %s5418_s28 }
0x1d90   :  { %v2093_v19 = vpop.permute.xlu0 %2092 }
0x1d91   :  { %v6007_v29 = vadd.f32 %v2093_v19, %v2085_v11  ;;  %v2170_v20 = vpop.permute.xlu1 %2169 }
0x1d92   :  { %v6009_v21 = vadd.f32 %v2170_v20, %v2162_v17 }
0x1d93   :  { %5308 = vtanh.f32 %v6007_v29 }
0x1d94   :  { %5310 = vtanh.f32 %v6009_v21  ;;  %v2357_v14 = vrot.slane %v6009_v21, 6 }
0x1d9d   :  { %v5309_v31 = vpop.eup %5308 }
0x1d9e   :  { %v5311_v18 = vpop.eup %5310  ;;  %2098 = vrot.lane.b32.xlu0 %v5309_v31, %s5418_s28 }
0x1d9f   :  { %2175 = vrot.lane.b32.xlu1 %v5311_v18, %s5418_s28 }
0x1e10   :  { %v2099_v22 = vpop.permute.xlu0 %2098 }
0x1e11   :  { %v6015_v23 = vmul.f32 %v5305_v30, %v2099_v22  ;;  %v2176_v43 = vpop.permute.xlu1 %2175 }
0x1e12   :  { %v2178_v39 = vmul.f32 %v5307_v37, %v2176_v43 }
0x1e13   :  { %v2180_v24 = vpack.c.bf16 %v6015_v23, %v6015_v23 }
0x1e14   :  { %v2179_v25 = vpack.c.bf16 %v2178_v39, %v2178_v39 }
0x1e15   :  { %2182 = vrot.lane.b32.xlu0 %v2180_v24, %s5419_s21 }
0x1e16   :  { %v2228_v32 = vrot.slane %v2179_v25, 2 }
0x1e18   :  { %2229 = vrot.lane.b32.xlu1 %v2228_v32, %s5419_s21 }
0x1e87   :  { %v2183_v27 = vpop.permute.xlu0 %2182 }
0x1e88   :  { %4841 = vmatmul.mubr.msk.bf16.vlgmr.msra.gmra.mrb[64].mxu0 %vm180_vm2, %v2183_v27 }
0x1e89   :  { %4853 = vmatpush3.bf16.msra.mxu0 %v5817_v10  ;;  %4856 = vmatprep.mubr.msk.bf16.mxu0 %vm5416_vm1, %v5415_v0 }
0x1e8a   :  { %v2230_v33 = vpop.permute.xlu1 %2229  ;;  %4854 = vmatprep.subr.bf16.mxu0 %v5415_v0 }
0x1e8b   :  { %4849 = vmatmul.mubr.msk.bf16.vlgmr.msra.gmra.mrb[64].mxu1 %vm180_vm2, %v2230_v33 }
0x1e8c   :  { %4861 = vmatpush3.bf16.msra.mxu1 %v5827_v59  ;;  %4864 = vmatprep.mubr.msk.bf16.mxu1 %vm5416_vm1, %v5415_v0 }
0x1e8d   :  { %4855 = vmatpush3.bf16.msra.mxu0 %v5835_v60  ;;  %4862 = vmatprep.subr.bf16.mxu1 %v5415_v0 }
0x1e8e   :  { %4868 = vmatprep.subr.bf16.mxu0 %v5415_v0 }
0x1e90   :  { %4857 = vmatmul.mubr.msk.bf16.vlgmr.msra.gmra.mrb[68].mxu0 %vm180_vm2, %v2230_v33  ;;  %4863 = vmatpush3.bf16.msra.mxu1 %v5844_v61 }
0x1e91   :  { %4869 = vmatpush3.bf16.msra.mxu0 %v5850_v62  ;;  %4876 = vmatprep.subr.bf16.mxu1 %v5415_v0 }
0x1e92   :  { %4870 = vmatprep.subr.bf16.mxu0 %v5415_v0  ;;  %4872 = vmatprep.mubr.msk.bf16.mxu0 %vm5416_vm1, %v5415_v0 }
0x1e95   :  { %4871 = vmatpush3.bf16.msra.mxu0 %v5860_v2 }
0x1e96   :  { %4884 = vmatprep.subr.bf16.mxu0 %v5415_v0 }
0x1f5b   :  { %v2221_v35 = vpop.f32.mrb[64].mxu0 }
0x1f5c   :  { %v4842_v38 = vpop.f32.mrb[65].mxu0 }
0x1f5d   :  { %v2224_v40 = vpop.f32.mrb[66].mxu0 }
0x1f5e   :  { %v2268_v41 = vpop.f32.mrb[64].mxu1  ;;  %v4843_v34 = vpop.f32.mrb[67].mxu0 }
0x1f5f   :  { %v2269_v42 = vadd.f32 %v2268_v41, %v2221_v35  ;;  %v4850_v44 = vpop.f32.mrb[65].mxu1  ;;  %v6087_v35 = vadd.f32 %v5906_v56, %v5574_v36 }
0x1f60   :  { %v2271_v45 = vpop.f32.mrb[66].mxu1 }
0x1f61   :  { %v2274_v46 = vadd.f32 %v5916_v5, %v2269_v42  ;;  %v4851_v47 = vpop.f32.mrb[67].mxu1 }
0x1f63   :  { %5312 = vtanh.f32 %v2274_v46  ;;  %v2339_v48 = vpop.f32.mrb[68].mxu0  ;;  %v4244_v54 = vmul.f32 -1.442695, %v2274_v46 }
0x1f64   :  { %v2346_v49 = vrot.slane %v2339_v48, 2  ;;  %v4858_v7 = vpop.f32.mrb[69].mxu0 }
0x1f65   :  { %v2342_v8 = vpop.f32.mrb[70].mxu0 }
0x1f66   :  { %v2348_v50 = vadd.f32 %v2346_v49, %v5910_v57  ;;  %v4859_v51 = vpop.f32.mrb[71].mxu0 }
0x1f68   :  { %5314 = vtanh.f32 %v2348_v50  ;;  %v4246_v55 = vmul.f32 -1.442695, %v2348_v50 }
0x1f69   :  { %5316 = vpow2.f32 %v4244_v54 }
0x1f6a   :  { %5318 = vpow2.f32 %v4246_v55 }
0x1f6d   :  { %v5313_v52 = vpop.eup %5312 }
0x1f6e   :  { %2284 = vrot.lane.b32.xlu1 %v5313_v52, %s5418_s28 }
0x1f72   :  { %v5315_v53 = vpop.eup %5314 }
0x1f73   :  { %2361 = vrot.lane.b32.xlu0 %v5315_v53, %s5418_s28  ;;  %v5317_v58 = vpop.eup %5316 }
0x1f74   :  { %v2278_v63 = vadd.f32 1.0, %v5317_v58  ;;  %v5319_v3 = vpop.eup %5318 }
0x1f75   :  { %v2352_v4 = vadd.f32 1.0, %v5319_v3 }
0x1f76   :  { %5320 = vrcp.f32 %v2278_v63 }
0x1f77   :  { %5322 = vrcp.f32 %v2352_v4 }
0x1f80   :  { %v5321_v6 = vpop.eup %5320 }
0x1f81   :  { %v5323_v1 = vpop.eup %5322  ;;  %v2282_v12 = vmul.f32 %v5321_v6, %v6007_v29 }
0x1f82   :  { %v2359_v15 = vmul.f32 %v5323_v1, %v2357_v14 }
0x1fe0   :  { %v2285_v57 = vpop.permute.xlu1 %2284 }
0x1fe1   :  { %v2287_v9 = vmul.f32 %v5321_v6, %v2285_v57 }
0x1fe3   :  { %2289 = vrot.lane.b32.xlu1 %v2287_v9, %s5418_s28 }
0x1fe5   :  { %v2362_v28 = vpop.permute.xlu0 %2361 }
0x1fe6   :  { %v2364_v30 = vmul.f32 %v5323_v1, %v2362_v28 }
0x1fe8   :  { %2366 = vrot.lane.b32.xlu0 %v2364_v30, %s5418_s28 }
0x2055   :  { %v2290_v37 = vpop.permute.xlu1 %2289 }
0x2056   :  { %v6049_v13 = vadd.f32 %v2290_v37, %v2282_v12 }
0x2058   :  { %5324 = vtanh.f32 %v6049_v13 }
0x205a   :  { %v2367_v16 = vpop.permute.xlu0 %2366 }
0x205b   :  { %v6053_v11 = vadd.f32 %v2367_v16, %v2359_v15 }
0x205d   :  { %5326 = vtanh.f32 %v6053_v11 }
0x2062   :  { %v5325_v19 = vpop.eup %5324 }
0x2063   :  { %2295 = vrot.lane.b32.xlu1 %v5325_v19, %s5418_s28 }
0x2067   :  { %v5327_v17 = vpop.eup %5326 }
0x2068   :  { %2372 = vrot.lane.b32.xlu0 %v5327_v17, %s5418_s28 }
0x20d5   :  { %v2296_v29 = vpop.permute.xlu1 %2295 }
0x20d6   :  { %v6058_v20 = vmul.f32 %v5321_v6, %v2296_v29  ;;  %v2551_v6 = vrot.slane %v6053_v11, 6 }
0x20d8   :  { %v2377_v21 = vpack.c.bf16 %v6058_v20, %v6058_v20 }
0x20da   :  { %2379 = vrot.lane.b32.xlu0 %v2377_v21, %s5419_s21  ;;  %v2373_v31 = vpop.permute.xlu0 %2372 }
0x20db   :  { %v2375_v18 = vmul.f32 %v5323_v1, %v2373_v31 }
0x20dd   :  { %v2376_v22 = vpack.c.bf16 %v2375_v18, %v2375_v18 }
0x20df   :  { %v2425_v43 = vrot.slane %v2376_v22, 3 }
0x20e1   :  { %2426 = vrot.lane.b32.xlu1 %v2425_v43, %s5419_s21 }
0x214c   :  { %v2380_v39 = vpop.permute.xlu0 %2379 }
0x214d   :  { %4865 = vmatmul.mubr.msk.bf16.vlgmr.msra.gmra.mrb[68].mxu1 %vm180_vm2, %v2380_v39 }
0x214e   :  { %4877 = vmatpush3.bf16.msra.mxu1 %v5817_v10  ;;  %4880 = vmatprep.mubr.msk.bf16.mxu1 %vm5416_vm1, %v5415_v0 }
0x214f   :  { %4878 = vmatprep.subr.bf16.mxu1 %v5415_v0 }
0x2152   :  { %4879 = vmatpush3.bf16.msra.mxu1 %v5835_v60 }
0x2153   :  { %v2427_v24 = vpop.permute.xlu1 %2426  ;;  %4892 = vmatprep.subr.bf16.mxu1 %v5415_v0 }
0x2154   :  { %4873 = vmatmul.mubr.msk.bf16.vlgmr.msra.gmra.mrb[72].mxu0 %vm180_vm2, %v2427_v24 }
0x2155   :  { %4881 = vmatmul.mubr.msk.bf16.vlgmr.msra.gmra.mrb[72].mxu1 %vm180_vm2, %v2427_v24  ;;  %4885 = vmatpush3.bf16.msra.mxu0 %v5827_v59 }
0x2156   :  { %4893 = vmatpush3.bf16.msra.mxu1 %v5850_v62  ;;  %4886 = vmatprep.subr.bf16.mxu0 %v5415_v0 }
0x2157   :  { %4894 = vmatprep.subr.bf16.mxu1 %v5415_v0  ;;  %4896 = vmatprep.mubr.msk.bf16.mxu1 %vm5416_vm1, %v5415_v0 }
0x2158   :  { %4888 = vmatprep.mubr.msk.bf16.mxu0 %vm5416_vm1, %v5415_v0 }
0x2159   :  { %4887 = vmatpush3.bf16.msra.mxu0 %v5844_v61 }
0x215a   :  { %4895 = vmatpush3.bf16.msra.mxu1 %v5860_v2  ;;  %4900 = vmatprep.subr.bf16.mxu0 %v5415_v0 }
0x215b   :  { %4908 = vmatprep.subr.bf16.mxu1 %v5415_v0 }
0x2220   :  { %v2418_v25 = vpop.f32.mrb[68].mxu1 }
0x2221   :  { %v4866_v32 = vpop.f32.mrb[69].mxu1 }
0x2222   :  { %v2421_v27 = vpop.f32.mrb[70].mxu1 }
0x2223   :  { %v4867_v33 = vpop.f32.mrb[71].mxu1 }
0x2227   :  { %v2465_v38 = vpop.f32.mrb[72].mxu0 }
0x2228   :  { %v2466_v40 = vadd.f32 %v2465_v38, %v2418_v25  ;;  %v2536_v41 = vpop.f32.mrb[72].mxu1  ;;  %v4874_v34 = vpop.f32.mrb[73].mxu0 }
0x2229   :  { %v2542_v42 = vadd.f32 %v2536_v41, %v6087_v35  ;;  %v4882_v44 = vpop.f32.mrb[73].mxu1  ;;  %v2468_v45 = vpop.f32.mrb[74].mxu0 }
0x222a   :  { %v2471_v46 = vadd.f32 %v5916_v5, %v2466_v40  ;;  %v2539_v47 = vpop.f32.mrb[74].mxu1  ;;  %v4875_v48 = vpop.f32.mrb[75].mxu0 }
0x222b   :  { %5328 = vtanh.f32 %v2542_v42  ;;  %v4883_v49 = vpop.f32.mrb[75].mxu1  ;;  %v4251_v36 = vmul.f32 -1.442695, %v2542_v42 }
0x222c   :  { %5330 = vtanh.f32 %v2471_v46  ;;  %v4249_v56 = vmul.f32 -1.442695, %v2471_v46 }
0x222d   :  { %5332 = vpow2.f32 %v4251_v36 }
0x222e   :  { %5334 = vpow2.f32 %v4249_v56 }
0x2235   :  { %v5329_v7 = vpop.eup %5328 }
0x2236   :  { %v5331_v8 = vpop.eup %5330  ;;  %2555 = vrot.lane.b32.xlu1 %v5329_v7, %s5418_s28 }
0x2237   :  { %2481 = vrot.lane.b32.xlu0 %v5331_v8, %s5418_s28  ;;  %v5333_v50 = vpop.eup %5332 }
0x2238   :  { %v5335_v51 = vpop.eup %5334  ;;  %v2546_v52 = vadd.f32 1.0, %v5333_v50 }
0x2239   :  { %v2475_v53 = vadd.f32 1.0, %v5335_v51 }
0x223a   :  { %5336 = vrcp.f32 %v2546_v52 }
0x223b   :  { %5338 = vrcp.f32 %v2475_v53 }
0x2244   :  { %v5337_v54 = vpop.eup %5336 }
0x2245   :  { %v5339_v58 = vpop.eup %5338  ;;  %v2553_v57 = vmul.f32 %v5337_v54, %v2551_v6 }
0x2246   :  { %v2479_v1 = vmul.f32 %v5339_v58, %v6049_v13 }
0x22a8   :  { %v2556_v55 = vpop.permute.xlu1 %2555 }
0x22a9   :  { %v2558_v63 = vmul.f32 %v5337_v54, %v2556_v55  ;;  %v2482_v3 = vpop.permute.xlu0 %2481 }
0x22aa   :  { %v2484_v4 = vmul.f32 %v5339_v58, %v2482_v3 }
0x22ab   :  { %2560 = vrot.lane.b32.xlu1 %v2558_v63, %s5418_s28 }
0x22ac   :  { %2486 = vrot.lane.b32.xlu0 %v2484_v4, %s5418_s28 }
0x231d   :  { %v2561_v9 = vpop.permute.xlu1 %2560 }
0x231e   :  { %v6097_v28 = vadd.f32 %v2561_v9, %v2553_v57  ;;  %v2487_v30 = vpop.permute.xlu0 %2486 }
0x231f   :  { %v6099_v12 = vadd.f32 %v2487_v30, %v2479_v1 }
0x2320   :  { %5340 = vtanh.f32 %v6097_v28  ;;  %v2747_v52 = vrot.slane %v6097_v28, 6 }
0x2321   :  { %5342 = vtanh.f32 %v6099_v12 }
0x232a   :  { %v5341_v37 = vpop.eup %5340 }
0x232b   :  { %v5343_v14 = vpop.eup %5342  ;;  %2566 = vrot.lane.b32.xlu1 %v5341_v37, %s5418_s28  ;;  %v6167_v37 = vld [vmem:[%s6841_s3 + $0x8] sm:$0xff]  }
0x232c   :  { %2492 = vrot.lane.b32.xlu0 %v5343_v14, %s5418_s28 }
0x239d   :  { %v2567_v15 = vpop.permute.xlu1 %2566 }
0x239e   :  { %v2569_v16 = vmul.f32 %v5337_v54, %v2567_v15  ;;  %v2493_v11 = vpop.permute.xlu0 %2492  ;;  %v6176_v15 = vld [vmem:[%s6845_s5] sm:$0xff]  }
0x239f   :  { %v6105_v19 = vmul.f32 %v5339_v58, %v2493_v11  ;;  %v6194_v11 = vld [vmem:[%s6845_s5 + $0x8] sm:$0xff]  }
0x23a0   :  { %v2570_v13 = vpack.c.bf16 %v2569_v16, %v2569_v16  ;;  %v6182_v16 = vld [vmem:[%s6846_s4] sm:$0xff]  }
0x23a1   :  { %v2571_v17 = vpack.c.bf16 %v6105_v19, %v6105_v19 }
0x23a2   :  { %2619 = vrot.lane.b32.xlu1 %v2570_v13, %s5419_s21  ;;  %v6200_v13 = vld [vmem:[%s6846_s4 + $0x8] sm:$0xff]  }
0x23a3   :  { %2573 = vrot.lane.b32.xlu0 %v2571_v17, %s5419_s21 }
0x2414   :  { %v2620_v29 = vpop.permute.xlu1 %2619 }
0x2415   :  { %4897 = vmatmul.mubr.msk.bf16.vlgmr.msra.gmra.mrb[76].mxu1 %vm180_vm2, %v2620_v29  ;;  %v2574_v21 = vpop.permute.xlu0 %2573 }
0x2416   :  { %4889 = vmatmul.mubr.msk.bf16.vlgmr.msra.gmra.mrb[76].mxu0 %vm180_vm2, %v2574_v21  ;;  %4909 = vmatpush3.bf16.msra.mxu1 %v5827_v59 }
0x2417   :  { %4901 = vmatpush3.bf16.msra.mxu0 %v5817_v10  ;;  %4904 = vmatprep.mubr.msk.bf16.mxu0 %vm5416_vm1, %v5415_v0 }
0x2418   :  { %4902 = vmatprep.subr.bf16.mxu0 %v5415_v0  ;;  %4910 = vmatprep.subr.bf16.mxu1 %v5415_v0 }
0x2419   :  { %4912 = vmatprep.mubr.msk.bf16.mxu1 %vm5416_vm1, %v5415_v0 }
0x241a   :  { %4911 = vmatpush3.bf16.msra.mxu1 %v5844_v61 }
0x241b   :  { %4903 = vmatpush3.bf16.msra.mxu0 %v5835_v60  ;;  %4924 = vmatprep.subr.bf16.mxu1 %v5415_v0 }
0x241c   :  { %4916 = vmatprep.subr.bf16.mxu0 %v5415_v0 }
0x241e   :  { %4905 = vmatmul.mubr.msk.bf16.vlgmr.msra.gmra.mrb[80].mxu0 %vm180_vm2, %v2620_v29 }
0x241f   :  { %4917 = vmatpush3.bf16.msra.mxu0 %v5850_v62  ;;  %4920 = vmatprep.mubr.msk.bf16.mxu0 %vm5416_vm1, %v5415_v0 }
0x2420   :  { %4918 = vmatprep.subr.bf16.mxu0 %v5415_v0 }
0x2423   :  { %4919 = vmatpush3.bf16.msra.mxu0 %v5860_v2 }
0x2424   :  { %4932 = vmatprep.subr.bf16.mxu0 %v5415_v0 }
0x24e8   :  { %v2658_v10 = vpop.f32.mrb[76].mxu1 }
0x24e9   :  { %v4898_v59 = vpop.f32.mrb[77].mxu1  ;;  %v2612_v60 = vpop.f32.mrb[76].mxu0 }
0x24ea   :  { %v2659_v61 = vadd.f32 %v2658_v10, %v2612_v60  ;;  %v2661_v31 = vpop.f32.mrb[78].mxu1  ;;  %v4890_v18 = vpop.f32.mrb[77].mxu0 }
0x24eb   :  { %v4899_v22 = vpop.f32.mrb[79].mxu1  ;;  %v2615_v43 = vpop.f32.mrb[78].mxu0 }
0x24ec   :  { %v2664_v39 = vadd.f32 %v5916_v5, %v2659_v61  ;;  %v4891_v62 = vpop.f32.mrb[79].mxu0 }
0x24ee   :  { %5344 = vtanh.f32 %v2664_v39  ;;  %v4254_v41 = vmul.f32 -1.442695, %v2664_v39 }
0x24f1   :  { %v2729_v24 = vpop.f32.mrb[80].mxu0 }
0x24f2   :  { %v2736_v25 = vrot.slane %v2729_v24, 6  ;;  %v4906_v32 = vpop.f32.mrb[81].mxu0 }
0x24f3   :  { %v2732_v27 = vpop.f32.mrb[82].mxu0 }
0x24f4   :  { %v2738_v2 = vadd.f32 %v2736_v25, %v6087_v35  ;;  %v4907_v33 = vpop.f32.mrb[83].mxu0 }
0x24f6   :  { %5346 = vtanh.f32 %v2738_v2  ;;  %v4256_v34 = vmul.f32 -1.442695, %v2738_v2 }
0x24f7   :  { %5348 = vpow2.f32 %v4254_v41 }
0x24f8   :  { %v5345_v38 = vpop.eup %5344  ;;  %5350 = vpow2.f32 %v4256_v34 }
0x24f9   :  { %2674 = vrot.lane.b32.xlu0 %v5345_v38, %s5418_s28 }
0x2500   :  { %v5347_v40 = vpop.eup %5346 }
0x2501   :  { %2751 = vrot.lane.b32.xlu1 %v5347_v40, %s5418_s28  ;;  %v5349_v42 = vpop.eup %5348 }
0x2502   :  { %v2668_v44 = vadd.f32 1.0, %v5349_v42  ;;  %v5351_v45 = vpop.eup %5350 }
0x2503   :  { %v2742_v46 = vadd.f32 1.0, %v5351_v45 }
0x2504   :  { %5352 = vrcp.f32 %v2668_v44 }
0x2505   :  { %5354 = vrcp.f32 %v2742_v46 }
0x250e   :  { %v5353_v47 = vpop.eup %5352 }
0x250f   :  { %v5355_v7 = vpop.eup %5354  ;;  %v2672_v56 = vmul.f32 %v5353_v47, %v6099_v12  ;;  %v6158_v12 = vld [vmem:[%s6841_s3] sm:$0xff]  }
0x2510   :  { %v2749_v53 = vmul.f32 %v5355_v7, %v2747_v52 }
0x256b   :  { %v2675_v48 = vpop.permute.xlu0 %2674 }
0x256c   :  { %v2677_v49 = vmul.f32 %v5353_v47, %v2675_v48 }
0x256e   :  { %2679 = vrot.lane.b32.xlu0 %v2677_v49, %s5418_s28 }
0x2573   :  { %v2752_v8 = vpop.permute.xlu1 %2751 }
0x2574   :  { %v2754_v36 = vmul.f32 %v5355_v7, %v2752_v8 }
0x2576   :  { %2756 = vrot.lane.b32.xlu1 %v2754_v36, %s5418_s28 }
0x25e0   :  { %v2680_v50 = vpop.permute.xlu0 %2679 }
0x25e1   :  { %v6139_v51 = vadd.f32 %v2680_v50, %v2672_v56 }
0x25e3   :  { %5356 = vtanh.f32 %v6139_v51 }
0x25e8   :  { %v2757_v54 = vpop.permute.xlu1 %2756 }
0x25e9   :  { %v6143_v55 = vadd.f32 %v2757_v54, %v2749_v53 }
0x25eb   :  { %5358 = vtanh.f32 %v6143_v55  ;;  %v2944_v49 = vrot.slane %v6143_v55, 6 }
0x25ed   :  { %v5357_v58 = vpop.eup %5356 }
0x25ee   :  { %2685 = vrot.lane.b32.xlu0 %v5357_v58, %s5418_s28 }
0x25f5   :  { %v5359_v63 = vpop.eup %5358 }
0x25f6   :  { %2762 = vrot.lane.b32.xlu1 %v5359_v63, %s5418_s28 }
0x2660   :  { %v2686_v3 = vpop.permute.xlu0 %2685 }
0x2661   :  { %v6148_v4 = vmul.f32 %v5353_v47, %v2686_v3 }
0x2663   :  { %v2767_v6 = vpack.c.bf16 %v6148_v4, %v6148_v4 }
0x2665   :  { %2769 = vrot.lane.b32.xlu0 %v2767_v6, %s5419_s21 }
0x2668   :  { %v2763_v57 = vpop.permute.xlu1 %2762 }
0x2669   :  { %v2765_v9 = vmul.f32 %v5355_v7, %v2763_v57 }
0x266b   :  { %v2766_v1 = vpack.c.bf16 %v2765_v9, %v2765_v9 }
0x266d   :  { %v2815_v28 = vrot.slane %v2766_v1, 1 }
0x266f   :  { %2816 = vrot.lane.b32.xlu1 %v2815_v28, %s5419_s21 }
0x26d7   :  { %v2770_v30 = vpop.permute.xlu0 %2769 }
0x26d8   :  { %4913 = vmatmul.mubr.msk.bf16.vlgmr.msra.gmra.mrb[80].mxu1 %vm180_vm2, %v2770_v30 }
0x26d9   :  { %4925 = vmatpush3.bf16.msra.mxu1 %v6158_v12  ;;  %4928 = vmatprep.mubr.msk.bf16.mxu1 %vm5416_vm1, %v5415_v0 }
0x26da   :  { %4926 = vmatprep.subr.bf16.mxu1 %v5415_v0 }
0x26dd   :  { %4927 = vmatpush3.bf16.msra.mxu1 %v6167_v37 }
0x26de   :  { %4940 = vmatprep.subr.bf16.mxu1 %v5415_v0 }
0x26e1   :  { %v2817_v14 = vpop.permute.xlu1 %2816 }
0x26e2   :  { %4921 = vmatmul.mubr.msk.bf16.vlgmr.msra.gmra.mrb[84].mxu0 %vm180_vm2, %v2817_v14  ;;  %4929 = vmatmul.mubr.msk.bf16.vlgmr.msra.gmra.mrb[84].mxu1 %vm180_vm2, %v2817_v14 }
0x26e3   :  { %4933 = vmatpush3.bf16.msra.mxu0 %v6176_v15  ;;  %4941 = vmatpush3.bf16.msra.mxu1 %v6182_v16 }
0x26e4   :  { %4934 = vmatprep.subr.bf16.mxu0 %v5415_v0  ;;  %4942 = vmatprep.subr.bf16.mxu1 %v5415_v0 }
0x26e5   :  { %4936 = vmatprep.mubr.msk.bf16.mxu0 %vm5416_vm1, %v5415_v0  ;;  %4944 = vmatprep.mubr.msk.bf16.mxu1 %vm5416_vm1, %v5415_v0 }
0x26e7   :  { %4935 = vmatpush3.bf16.msra.mxu0 %v6194_v11  ;;  %4943 = vmatpush3.bf16.msra.mxu1 %v6200_v13 }
0x26e8   :  { %4948 = vmatprep.subr.bf16.mxu0 %v5415_v0  ;;  %4956 = vmatprep.subr.bf16.mxu1 %v5415_v0 }
0x27ab   :  { %v2808_v17 = vpop.f32.mrb[80].mxu1 }
0x27ac   :  { %v4914_v29 = vpop.f32.mrb[81].mxu1 }
0x27ad   :  { %v2811_v21 = vpop.f32.mrb[82].mxu1 }
0x27ae   :  { %v4915_v10 = vpop.f32.mrb[83].mxu1 }
0x27b5   :  { %v2855_v59 = vpop.f32.mrb[84].mxu0  ;;  %v2926_v60 = vpop.f32.mrb[84].mxu1 }
0x27b6   :  { %v2856_v61 = vadd.f32 %v2855_v59, %v2808_v17  ;;  %v2933_v31 = vrot.slane %v2926_v60, 4  ;;  %v4922_v18 = vpop.f32.mrb[85].mxu0  ;;  %v4930_v22 = vpop.f32.mrb[85].mxu1 }
0x27b7   :  { %v2858_v43 = vpop.f32.mrb[86].mxu0  ;;  %v2929_v39 = vpop.f32.mrb[86].mxu1 }
0x27b8   :  { %v2861_v62 = vadd.f32 %v5916_v5, %v2856_v61  ;;  %v2935_v24 = vadd.f32 %v2933_v31, %v6087_v35  ;;  %v4923_v25 = vpop.f32.mrb[87].mxu0  ;;  %v4931_v32 = vpop.f32.mrb[87].mxu1 }
0x27ba   :  { %5360 = vtanh.f32 %v2861_v62  ;;  %v4259_v33 = vmul.f32 -1.442695, %v2861_v62  ;;  %v4261_v38 = vmul.f32 -1.442695, %v2935_v24 }
0x27bb   :  { %5362 = vtanh.f32 %v2935_v24 }
0x27bc   :  { %5364 = vpow2.f32 %v4259_v33 }
0x27bd   :  { %5366 = vpow2.f32 %v4261_v38 }
0x27c4   :  { %v5361_v27 = vpop.eup %5360 }
0x27c5   :  { %v5363_v2 = vpop.eup %5362  ;;  %2871 = vrot.lane.b32.xlu0 %v5361_v27, %s5418_s28 }
0x27c6   :  { %2948 = vrot.lane.b32.xlu1 %v5363_v2, %s5418_s28  ;;  %v5365_v40 = vpop.eup %5364 }
0x27c7   :  { %v5367_v41 = vpop.eup %5366  ;;  %v2865_v34 = vadd.f32 1.0, %v5365_v40 }
0x27c8   :  { %v2939_v5 = vadd.f32 1.0, %v5367_v41 }
0x27c9   :  { %5368 = vrcp.f32 %v2865_v34 }
0x27ca   :  { %5370 = vrcp.f32 %v2939_v5 }
0x27d3   :  { %v5369_v42 = vpop.eup %5368 }
0x27d4   :  { %v5371_v45 = vpop.eup %5370  ;;  %v2869_v7 = vmul.f32 %v5369_v42, %v6139_v51 }
0x27d5   :  { %v2946_v36 = vmul.f32 %v5371_v45, %v2944_v49 }
0x2837   :  { %v2872_v44 = vpop.permute.xlu0 %2871 }
0x2838   :  { %v2874_v46 = vmul.f32 %v5369_v42, %v2872_v44  ;;  %v2949_v47 = vpop.permute.xlu1 %2948 }
0x2839   :  { %v2951_v48 = vmul.f32 %v5371_v45, %v2949_v47 }
0x283a   :  { %2876 = vrot.lane.b32.xlu0 %v2874_v46, %s5418_s28 }
0x283b   :  { %2953 = vrot.lane.b32.xlu1 %v2951_v48, %s5418_s28 }
0x28ac   :  { %v2877_v8 = vpop.permute.xlu0 %2876 }
0x28ad   :  { %v6213_v56 = vadd.f32 %v2877_v8, %v2869_v7  ;;  %v2954_v50 = vpop.permute.xlu1 %2953 }
0x28ae   :  { %v6215_v52 = vadd.f32 %v2954_v50, %v2946_v36 }
0x28af   :  { %5372 = vtanh.f32 %v6213_v56 }
0x28b0   :  { %5374 = vtanh.f32 %v6215_v52 }
0x28b9   :  { %v5373_v53 = vpop.eup %5372 }
0x28ba   :  { %v5375_v54 = vpop.eup %5374  ;;  %2882 = vrot.lane.b32.xlu0 %v5373_v53, %s5418_s28 }
0x28bb   :  { %2959 = vrot.lane.b32.xlu1 %v5375_v54, %s5418_s28 }
0x292c   :  { %v2883_v55 = vpop.permute.xlu0 %2882 }
0x292d   :  { %v6221_v58 = vmul.f32 %v5369_v42, %v2883_v55  ;;  %v2960_v51 = vpop.permute.xlu1 %2959  ;;  %v3141_v42 = vrot.slane %v6215_v52, 6 }
0x292e   :  { %v2962_v63 = vmul.f32 %v5371_v45, %v2960_v51 }
0x292f   :  { %v2964_v3 = vpack.c.bf16 %v6221_v58, %v6221_v58 }
0x2930   :  { %v2963_v6 = vpack.c.bf16 %v2962_v63, %v2962_v63 }
0x2931   :  { %2966 = vrot.lane.b32.xlu0 %v2964_v3, %s5419_s21 }
0x2932   :  { %v3012_v57 = vrot.slane %v2963_v6, 2 }
0x2934   :  { %3013 = vrot.lane.b32.xlu1 %v3012_v57, %s5419_s21 }
0x29a3   :  { %v2967_v9 = vpop.permute.xlu0 %2966 }
0x29a4   :  { %4937 = vmatmul.mubr.msk.bf16.vlgmr.msra.gmra.mrb[88].mxu0 %vm180_vm2, %v2967_v9 }
0x29a5   :  { %4949 = vmatpush3.bf16.msra.mxu0 %v6158_v12  ;;  %4952 = vmatprep.mubr.msk.bf16.mxu0 %vm5416_vm1, %v5415_v0 }
0x29a6   :  { %v3014_v1 = vpop.permute.xlu1 %3013  ;;  %4950 = vmatprep.subr.bf16.mxu0 %v5415_v0 }
0x29a7   :  { %4945 = vmatmul.mubr.msk.bf16.vlgmr.msra.gmra.mrb[88].mxu1 %vm180_vm2, %v3014_v1 }
0x29a8   :  { %4957 = vmatpush3.bf16.msra.mxu1 %v6176_v15  ;;  %4960 = vmatprep.mubr.msk.bf16.mxu1 %vm5416_vm1, %v5415_v0 }
0x29a9   :  { %4951 = vmatpush3.bf16.msra.mxu0 %v6167_v37  ;;  %4958 = vmatprep.subr.bf16.mxu1 %v5415_v0 }
0x29aa   :  { %4964 = vmatprep.subr.bf16.mxu0 %v5415_v0 }
0x29ac   :  { %4953 = vmatmul.mubr.msk.bf16.vlgmr.msra.gmra.mrb[92].mxu0 %vm180_vm2, %v3014_v1  ;;  %4959 = vmatpush3.bf16.msra.mxu1 %v6194_v11  ;;  %v6249_v11 = vld [vmem:[%s6847_s6] ss:$0 sm:$0xff] }
0x29ad   :  { %4965 = vmatpush3.bf16.msra.mxu0 %v6182_v16  ;;  %4968 = vmatprep.mubr.msk.bf16.mxu0 %vm5416_vm1, %v5415_v0 }
0x29ae   :  { %4966 = vmatprep.subr.bf16.mxu0 %v5415_v0 }
0x29b1   :  { %4967 = vmatpush3.bf16.msra.mxu0 %v6200_v13 }
0x2a77   :  { %v3005_v28 = vpop.f32.mrb[88].mxu0 }
0x2a78   :  { %v4938_v30 = vpop.f32.mrb[89].mxu0 }
0x2a79   :  { %v3008_v12 = vpop.f32.mrb[90].mxu0 }
0x2a7a   :  { %v3052_v37 = vpop.f32.mrb[88].mxu1  ;;  %v4939_v14 = vpop.f32.mrb[91].mxu0 }
0x2a7b   :  { %v3053_v15 = vadd.f32 %v3052_v37, %v3005_v28  ;;  %v4946_v17 = vpop.f32.mrb[89].mxu1 }
0x2a7c   :  { %v3055_v29 = vpop.f32.mrb[90].mxu1 }
0x2a7d   :  { %v3058_v16 = vadd.f32 %v6249_v11, %v3053_v15  ;;  %v4947_v21 = vpop.f32.mrb[91].mxu1 }
0x2a7f   :  { %5376 = vtanh.f32 %v3058_v16  ;;  %v3123_v10 = vpop.f32.mrb[92].mxu0  ;;  %v4264_v43 = vmul.f32 -1.442695, %v3058_v16 }
0x2a80   :  { %v3130_v59 = vrot.slane %v3123_v10, 2  ;;  %v4954_v13 = vpop.f32.mrb[93].mxu0 }
0x2a81   :  { %v3126_v60 = vpop.f32.mrb[94].mxu0 }
0x2a82   :  { %v3132_v61 = vadd.f32 %v3130_v59, %v6087_v35  ;;  %v4955_v31 = vpop.f32.mrb[95].mxu0 }
0x2a84   :  { %5378 = vtanh.f32 %v3132_v61  ;;  %v4266_v39 = vmul.f32 -1.442695, %v3132_v61  ;;  %v3297_v61 = vld [vmem:[%s6848_s7 + $0x18] sm:$0xff] }
0x2a85   :  { %5380 = vpow2.f32 %v4264_v43  ;;  %v3302_v43 = vld [vmem:[%s6848_s7 + $0x40] sm:$0xff] }
0x2a86   :  { %5382 = vpow2.f32 %v4266_v39 }
0x2a89   :  { %v5377_v18 = vpop.eup %5376 }
0x2a8a   :  { %3068 = vrot.lane.b32.xlu1 %v5377_v18, %s5418_s28  ;;  %v3305_v18 = vld [vmem:[%s6848_s7 + $0x58] sm:$0xff] }
0x2a8b   :  { %v4980_v39 = vpack.c.bf16 %v3305_v18, %v3297_v61  ;;  %v3754_v61 = vld [vmem:[%s6849_s9 + $0x80] sm:$0xff] }
0x2a8d   :  { %4981 = vmatprep.subr.bf16.mxu0 %v4980_v39  ;;  %v3787_v39 = vld [vmem:[%s6849_s9 + $0x188] sm:$0xff] }
0x2a8e   :  { %v5379_v22 = vpop.eup %5378 }
0x2a8f   :  { %3145 = vrot.lane.b32.xlu0 %v5379_v22, %s5418_s28  ;;  %v5381_v62 = vpop.eup %5380  ;;  %v3294_v22 = vld [vmem:[%s6848_s7] sm:$0xff] }
0x2a90   :  { %v3062_v24 = vadd.f32 1.0, %v5381_v62  ;;  %v5383_v25 = vpop.eup %5382  ;;  %v4974_v62 = vpack.c.bf16 %v3302_v43, %v3294_v22  ;;  %v3755_v22 = vld [vmem:[%s6849_s9 + $0x88] sm:$0xff]  ;;  %v3786_v43 = vld [vmem:[%s6849_s9 + $0x180] sm:$0xff] }
0x2a91   :  { %v3136_v32 = vadd.f32 1.0, %v5383_v25  ;;  %v3304_v25 = vld [vmem:[%s6848_s7 + $0x50] sm:$0xff] }
0x2a92   :  { %5384 = vrcp.f32 %v3062_v24  ;;  %v3296_v24 = vld [vmem:[%s6848_s7 + $0x10] sm:$0xff] }
0x2a93   :  { %5386 = vrcp.f32 %v3136_v32  ;;  %v3311_v32 = vld [vmem:[%s6848_s7 + $0x88] sm:$0xff] }
0x2a9c   :  { %v5385_v27 = vpop.eup %5384 }
0x2a9d   :  { %v5387_v33 = vpop.eup %5386  ;;  %v3066_v41 = vmul.f32 %v5385_v27, %v6213_v56 }
0x2a9e   :  { %v3143_v44 = vmul.f32 %v5387_v33, %v3141_v42  ;;  %v3312_v42 = vld [vmem:[%s6848_s7 + $0x90] sm:$0xff] }
0x2afc   :  { %v3069_v35 = vpop.permute.xlu1 %3068 }
0x2afd   :  { %v3071_v2 = vmul.f32 %v5385_v27, %v3069_v35  ;;  %v4982_v35 = vpack.c.bf16 %v3304_v25, %v3296_v24  ;;  %v5004_v25 = vpack.c.bf16 %v3755_v22, %v3754_v61  ;;  %v3795_v61 = vld [vmem:[%s6849_s9 + $0x1c8] sm:$0xff]  ;;  %v3746_v22 = vld [vmem:[%s6849_s9 + $0x40] sm:$0xff] }
0x2aff   :  { %3073 = vrot.lane.b32.xlu1 %v3071_v2, %s5418_s28  ;;  %v3319_v2 = vld [vmem:[%s6848_s7 + $0xc8] sm:$0xff] }
0x2b01   :  { %v3146_v38 = vpop.permute.xlu0 %3145 }
0x2b02   :  { %v3148_v40 = vmul.f32 %v5387_v33, %v3146_v38  ;;  %v3321_v38 = vld [vmem:[%s6848_s7 + $0xd8] sm:$0xff] }
0x2b04   :  { %3150 = vrot.lane.b32.xlu0 %v3148_v40, %s5418_s28  ;;  %v4976_v40 = vpack.c.bf16 %v3319_v2, %v3311_v32  ;;  %v5036_v32 = vpack.c.bf16 %v3787_v39, %v3786_v43  ;;  %v3747_v43 = vld [vmem:[%s6849_s9 + $0x48] sm:$0xff] }
0x2b71   :  { %v3074_v34 = vpop.permute.xlu1 %3073 }
0x2b72   :  { %v3076_v5 = vadd.f32 %v3074_v34, %v3066_v41  ;;  %v3310_v34 = vld [vmem:[%s6848_s7 + $0x80] sm:$0xff] }
0x2b74   :  { %5388 = vtanh.f32 %v3076_v5 }
0x2b76   :  { %v3151_v45 = vpop.permute.xlu0 %3150 }
0x2b77   :  { %v3153_v46 = vadd.f32 %v3151_v45, %v3143_v44  ;;  %v3320_v45 = vld [vmem:[%s6848_s7 + $0xd0] sm:$0xff] }
0x2b79   :  { %5390 = vtanh.f32 %v3153_v46  ;;  %v4986_v46 = vpack.c.bf16 %v3320_v45, %v3312_v42  ;;  %v3739_v45 = vld [vmem:[%s6849_s9 + $0x8] sm:$0xff] }
0x2b7e   :  { %v5389_v47 = vpop.eup %5388 }
0x2b7f   :  { %3079 = vrot.lane.b32.xlu1 %v5389_v47, %s5418_s28  ;;  %v3307_v47 = vld [vmem:[%s6848_s7 + $0x68] sm:$0xff] }
0x2b83   :  { %v5391_v48 = vpop.eup %5390 }
0x2b84   :  { %3156 = vrot.lane.b32.xlu0 %v5391_v48, %s5418_s28 }
0x2bf1   :  { %v3080_v49 = vpop.permute.xlu1 %3079 }
0x2bf2   :  { %v3082_v7 = vmul.f32 %v5385_v27, %v3080_v49  ;;  %v3301_v49 = vld [vmem:[%s6848_s7 + $0x38] sm:$0xff] }
0x2bf4   :  { %v3161_v8 = vpack.c.bf16 %v3082_v7, %v3082_v7 }
0x2bf6   :  { %3163 = vrot.lane.b32.xlu0 %v3161_v8, %s5419_s21  ;;  %v3157_v36 = vpop.permute.xlu0 %3156 }
0x2bf7   :  { %v3159_v56 = vmul.f32 %v5387_v33, %v3157_v36  ;;  %v3313_v33 = vld [vmem:[%s6848_s7 + $0x98] sm:$0xff] }
0x2bf8   :  { %v4984_v41 = vpack.c.bf16 %v3321_v38, %v3313_v33 }
0x2bf9   :  { %v3160_v50 = vpack.c.bf16 %v3159_v56, %v3159_v56  ;;  %v3328_v56 = vlaneseq }
0x2bfb   :  { %v3209_v52 = vrot.slane %v3160_v50, 3  ;;  %v5420_v50 = vmov 1983009808  }
0x2bfd   :  { %3210 = vrot.lane.b32.xlu1 %v3209_v52, %s5419_s21  ;;  %v3379_v52 = vunpack.c.l.s4 %v5420_v50 }
0x2c68   :  { %v3164_v53 = vpop.permute.xlu0 %3163 }
0x2c69   :  { %4961 = vmatmul.mubr.msk.bf16.vlgmr.msra.gmra.mrb[92].mxu1 %vm180_vm2, %v3164_v53 }
0x2c6a   :  { %3478 = vmatprep.mubr.f32.mxu1 %v5415_v0 }
0x2c6f   :  { %v3211_v54 = vpop.permute.xlu1 %3210 }
0x2c70   :  { %4969 = vmatmul.mubr.msk.bf16.vlgmr.msra.gmra.mrb[96].mxu0 %vm180_vm2, %v3211_v54  ;;  %v6356_v54 = vshrl.u32 %v3328_v56, 7 }
0x2c71   :  { %3555 = vmatprep.mubr.f32.mxu0 %v5415_v0  ;;  %4983 = vmatpush1.bf16.msra.mxu0 %v4982_v35 }
0x2c72   :  { %4985 = vmatprep.subr.bf16.mxu0 %v4984_v41 }
0x2c75   :  { %4987 = vmatpush1.bf16.msra.mxu0 %v4986_v46  ;;  %v3770_v46 = vld [vmem:[%s6849_s9 + $0x100] sm:$0xff] }
0x2d3c   :  { %v3202_v55 = vpop.f32.mrb[92].mxu1 }
0x2d3d   :  { %v4962_v51 = vpop.f32.mrb[93].mxu1 }
0x2d3e   :  { %v3205_v63 = vpop.f32.mrb[94].mxu1 }
0x2d3f   :  { %v4963_v3 = vpop.f32.mrb[95].mxu1 }
0x2d43   :  { %v3249_v6 = vpop.f32.mrb[96].mxu0 }
0x2d44   :  { %v3250_v57 = vadd.f32 %v3249_v6, %v3202_v55  ;;  %v4970_v9 = vpop.f32.mrb[97].mxu0  ;;  %v3380_v55 = vunpack.c.0.s8 %v3379_v52  ;;  %v3772_v52 = vld [vmem:[%s6849_s9 + $0x110] sm:$0xff] }
0x2d45   :  { %v3252_v1 = vpop.f32.mrb[98].mxu0 }
0x2d46   :  { %v3255_v28 = vadd.f32 %v6249_v11, %v3250_v57  ;;  %v4971_v30 = vpop.f32.mrb[99].mxu0  ;;  %v3383_v57 = vsub.s32 %v3380_v55, %v6356_v54  ;;  %v3758_v55 = vld [vmem:[%s6849_s9 + $0xa0] sm:$0xff] }
0x2d48   :  { %5392 = vtanh.f32 %v3255_v28  ;;  %v4269_v37 = vmul.f32 -1.442695, %v3255_v28  ;;  %v3298_v28 = vld [vmem:[%s6848_s7 + $0x20] sm:$0xff] }
0x2d4a   :  { %5394 = vpow2.f32 %v4269_v37  ;;  %v3300_v37 = vld [vmem:[%s6848_s7 + $0x30] sm:$0xff] }
0x2d52   :  { %v5393_v12 = vpop.eup %5392 }
0x2d53   :  { %3265 = vrot.lane.b32.xlu0 %v5393_v12, %s5418_s28  ;;  %v3306_v12 = vld [vmem:[%s6848_s7 + $0x60] sm:$0xff] }
0x2d54   :  { %v5395_v14 = vpop.eup %5394 }
0x2d55   :  { %v3259_v15 = vadd.f32 1.0, %v5395_v14  ;;  %v3308_v14 = vld [vmem:[%s6848_s7 + $0x70] sm:$0xff] }
0x2d57   :  { %5396 = vrcp.f32 %v3259_v15  ;;  %v3315_v15 = vld [vmem:[%s6848_s7 + $0xa8] sm:$0xff] }
0x2d61   :  { %v6269_v17 = vpop.eup %5396 }
0x2d62   :  { %v3263_v11 = vmul.f32 %v6269_v17, %v3076_v5  ;;  %v3318_v5 = vld [vmem:[%s6848_s7 + $0xc0] sm:$0xff] }
0x2d63   :  { %v4978_v44 = vpack.c.bf16 %v3318_v5, %v3310_v34 }
0x2dc5   :  { %v3266_v29 = vpop.permute.xlu0 %3265 }
0x2dc6   :  { %v3268_v16 = vmul.f32 %v6269_v17, %v3266_v29 }
0x2dc8   :  { %3270 = vrot.lane.b32.xlu1 %v3268_v16, %s5418_s28  ;;  %v3323_v16 = vld [vmem:[%s6848_s7 + $0xe8] sm:$0xff] }
0x2dcc   :  { %1906 = vrot.lane.b32.xlu1 %v5972_v26, %s5419_s21 }
0x2dd0   :  { %2300 = vrot.lane.b32.xlu1 %v6058_v20, %s5419_s21  ;;  %v3295_v20 = vld [vmem:[%s6848_s7 + $0x8] sm:$0xff] }
0x2dd4   :  { %2690 = vrot.lane.b32.xlu1 %v6148_v4, %s5419_s21  ;;  %v3303_v4 = vld [vmem:[%s6848_s7 + $0x48] sm:$0xff] }
0x2dd5   :  { %v4972_v31 = vpack.c.bf16 %v3303_v4, %v3295_v20  ;;  %v3316_v20 = vld [vmem:[%s6848_s7 + $0xb0] sm:$0xff] }
0x2dd6   :  { %v3324_v4 = vld [vmem:[%s6848_s7 + $0xf0] sm:$0xff] }
0x2dd7   :  { %4973 = vmatprep.subr.bf16.mxu1 %v4972_v31  ;;  %v4992_v31 = vpack.c.bf16 %v3323_v16, %v3315_v15  ;;  %v5002_v24 = vpack.c.bf16 %v3324_v4, %v3316_v20  ;;  %v3792_v15 = vld [vmem:[%s6849_s9 + $0x1b0] sm:$0xff]  ;;  %v3763_v20 = vld [vmem:[%s6849_s9 + $0xc8] sm:$0xff]  ;;  %v3794_v4 = vld [vmem:[%s6849_s9 + $0x1c0] sm:$0xff] }
0x2dd8   :  { %3084 = vrot.lane.b32.xlu1 %v3082_v7, %s5419_s21  ;;  %4975 = vmatpush1.bf16.msra.mxu1 %v4974_v62 }
0x2dd9   :  { %4977 = vmatprep.subr.bf16.mxu1 %v4976_v40 }
0x2ddc   :  { %4979 = vmatpush1.bf16.msra.mxu1 %v4978_v44  ;;  %v3738_v44 = vld [vmem:[%s6849_s9] sm:$0xff] }
0x2e3a   :  { %v3271_v21 = vpop.permute.xlu1 %3270 }
0x2e3b   :  { %v3273_v10 = vadd.f32 %v3271_v21, %v3263_v11  ;;  %v3317_v11 = vld [vmem:[%s6848_s7 + $0xb8] sm:$0xff] }
0x2e3c   :  { %v3325_v21 = vld [vmem:[%s6848_s7 + $0xf8] sm:$0xff] }
0x2e3d   :  { %5398 = vtanh.f32 %v3273_v10  ;;  %v4990_v10 = vpack.c.bf16 %v3306_v12, %v3298_v28  ;;  %v5000_v18 = vpack.c.bf16 %v3325_v21, %v3317_v11  ;;  %v3775_v12 = vld [vmem:[%s6849_s9 + $0x128] sm:$0xff]  ;;  %v3744_v11 = vld [vmem:[%s6849_s9 + $0x30] sm:$0xff]  ;;  %v3745_v21 = vld [vmem:[%s6849_s9 + $0x38] sm:$0xff] }
0x2e3e   :  { %v1907_v59 = vpop.permute.xlu1 %1906 }
0x2e3f   :  { %1910 = vst.msk [vmem:[#allocation2] sm:$0x3] %vm1909_vm3, %v1907_v59  ;;  %v4998_v59 = vpack.c.bf16 %v3308_v14, %v3300_v37  ;;  %v3760_v37 = vld [vmem:[%s6849_s9 + $0xb0] sm:$0xff]  ;;  %v3761_v14 = vld [vmem:[%s6849_s9 + $0xb8] sm:$0xff] }
0x2e42   :  { %v2301_v13 = vpop.permute.xlu1 %2300 }
0x2e43   :  { %2304 = vst.msk [vmem:[#allocation2 + $0x4] sm:$0x3] %vm1909_vm3, %v2301_v13  ;;  %v3314_v13 = vld [vmem:[%s6848_s7 + $0xa0] sm:$0xff] }
0x2e46   :  { %v2691_v26 = vpop.permute.xlu1 %2690  ;;  %v3286_v3 = vld [vmem:[#allocation2] sm:$0x3] }
0x2e47   :  { %v5399_v60 = vpop.eup %5398  ;;  %2694 = vst.msk [vmem:[#allocation2 + $0x8] sm:$0x3] %vm1909_vm3, %v2691_v26  ;;  %v3322_v26 = vld [vmem:[%s6848_s7 + $0xe0] sm:$0xff] }
0x2e48   :  { %3276 = vrot.lane.b32.xlu0 %v5399_v60, %s5418_s28  ;;  %v4994_v62 = vpack.c.bf16 %v3322_v26, %v3314_v13  ;;  %v3776_v13 = vld [vmem:[%s6849_s9 + $0x130] sm:$0xff]  ;;  %v3777_v26 = vld [vmem:[%s6849_s9 + $0x138] sm:$0xff] }
0x2e4a   :  { %v3085_v27 = vpop.permute.xlu1 %3084  ;;  %v3288_v9 = vld [vmem:[#allocation2 + $0x4] sm:$0x3] }
0x2e4b   :  { %3088 = vst.msk [vmem:[#allocation2 + $0xc] sm:$0x3] %vm1909_vm3, %v3085_v27 }
0x2e4c   :  { %2103 = vrot.lane.b32.xlu0 %v6015_v23, %s5419_s21  ;;  %v3299_v23 = vld [vmem:[%s6848_s7 + $0x28] sm:$0xff] }
0x2e4d   :  { %v4988_v48 = vpack.c.bf16 %v3307_v47, %v3299_v23  ;;  %v3771_v23 = vld [vmem:[%s6849_s9 + $0x108] sm:$0xff]  ;;  %v3756_v47 = vld [vmem:[%s6849_s9 + $0x90] sm:$0xff] }
0x2e4e   :  { %v3290_v2 = vld [vmem:[#allocation2 + $0x8] sm:$0x3] }
0x2e4f   :  { %4989 = vmatprep.subr.bf16.mxu1 %v4988_v48  ;;  %v3757_v48 = vld [vmem:[%s6849_s9 + $0x98] sm:$0xff] }
0x2e50   :  { %2497 = vrot.lane.b32.xlu0 %v6105_v19, %s5419_s21  ;;  %v3309_v19 = vld [vmem:[%s6848_s7 + $0x78] sm:$0xff]  ;;  %v5008_v56 = vpack.c.bf16 %v3757_v48, %v3756_v47  ;;  %v3799_v47 = vld [vmem:[%s6849_s9 + $0x1e8] sm:$0xff] }
0x2e51   :  { %v4996_v7 = vpack.c.bf16 %v3309_v19, %v3301_v49  ;;  %v3788_v49 = vld [vmem:[%s6849_s9 + $0x190] sm:$0xff]  ;;  %v3789_v19 = vld [vmem:[%s6849_s9 + $0x198] sm:$0xff] }
0x2e52   :  { %v3292_v38 = vld [vmem:[#allocation2 + $0xc] sm:$0x3]  ;;  %v5040_v50 = vpack.c.bf16 %v3789_v19, %v3788_v49  ;;  %v3750_v19 = vld [vmem:[%s6849_s9 + $0x60] sm:$0xff] }
0x2e53   :  { %4997 = vmatprep.subr.bf16.mxu0 %v4996_v7  ;;  %v5006_v7 = vpack.c.bf16 %v3739_v45, %v3738_v44  ;;  %v3781_v44 = vld [vmem:[%s6849_s9 + $0x158] sm:$0xff]  ;;  %v3766_v45 = vld [vmem:[%s6849_s9 + $0xe0] sm:$0xff] }
0x2e54   :  { %2887 = vrot.lane.b32.xlu0 %v6221_v58, %s5419_s21 }
0x2eba   :  { %v3277_v58 = vpop.permute.xlu0 %3276 }
0x2ebb   :  { %v3279_v8 = vmul.f32 %v6269_v17, %v3277_v58  ;;  %v5038_v58 = vpack.c.bf16 %v3771_v23, %v3770_v46  ;;  %v3767_v46 = vld [vmem:[%s6849_s9 + $0xe8] sm:$0xff]  ;;  %v3798_v23 = vld [vmem:[%s6849_s9 + $0x1e0] sm:$0xff] }
0x2ebd   :  { %3281 = vrot.lane.b32.xlu0 %v3279_v8, %s5419_s21  ;;  %v3740_v8 = vld [vmem:[%s6849_s9 + $0x10] sm:$0xff] }
0x2ebe   :  { %v2104_v36 = vpop.permute.xlu0 %2103 }
0x2ebf   :  { %2107 = vst.msk [vmem:[#allocation2 + $0x2] sm:$0x3] %vm1909_vm3, %v2104_v36  ;;  %v3741_v36 = vld [vmem:[%s6849_s9 + $0x18] sm:$0xff] }
0x2ec2   :  { %v2498_v53 = vpop.permute.xlu0 %2497 }
0x2ec3   :  { %2501 = vst.msk [vmem:[#allocation2 + $0x6] sm:$0x3] %vm1909_vm3, %v2498_v53  ;;  %v3773_v53 = vld [vmem:[%s6849_s9 + $0x118] sm:$0xff] }
0x2ec6   :  { %v2888_v51 = vpop.permute.xlu0 %2887  ;;  %v3287_v63 = vld [vmem:[#allocation2 + $0x2] sm:$0x3] }
0x2ec7   :  { %2891 = vst.msk [vmem:[#allocation2 + $0xa] sm:$0x3] %vm1909_vm3, %v2888_v51  ;;  %v3376_v6 = vcombine.low %v3286_v3, %v3287_v63  ;;  %v3759_v51 = vld [vmem:[%s6849_s9 + $0xa8] sm:$0xff]  ;;  %v3790_v63 = vld [vmem:[%s6849_s9 + $0x1a0] sm:$0xff] }
0x2ec8   :  { %v3791_v3 = vld [vmem:[%s6849_s9 + $0x1a8] sm:$0xff]  ;;  %v5012_v28 = vpack.c.bf16 %v3759_v51, %v3758_v55  ;;  %v3801_v55 = vld [vmem:[%s6849_s9 + $0x1f8] sm:$0xff] }
0x2ec9   :  { %v3384_v17 = vrot.slane %v3376_v6, %v3383_v57  ;;  %v5010_v6 = vpack.c.bf16 %v3741_v36, %v3740_v8  ;;  %v5060_v8 = vpack.c.bf16 %v3799_v47, %v3798_v23  ;;  %v3782_v36 = vld [vmem:[%s6849_s9 + $0x160] sm:$0xff] }
0x2eca   :  { %v3289_v1 = vld [vmem:[#allocation2 + $0x6] sm:$0x3] }
0x2ecb   :  { %v3377_v30 = vcombine.low %v3288_v9, %v3289_v1  ;;  %v3742_v9 = vld [vmem:[%s6849_s9 + $0x20] sm:$0xff]  ;;  %v3743_v1 = vld [vmem:[%s6849_s9 + $0x28] sm:$0xff] }
0x2ecd   :  { %v3391_v29 = vrot.slane %v3377_v30, %v3383_v57  ;;  %v5044_v30 = vpack.c.bf16 %v3791_v3, %v3790_v63  ;;  %v3752_v3 = vld [vmem:[%s6849_s9 + $0x70] sm:$0xff] }
0x2ece   :  { %v3291_v35 = vld [vmem:[#allocation2 + $0xa] sm:$0x3] }
0x2ecf   :  { %v3392_v60 = vcombine.low %v3384_v17, %v3391_v29  ;;  %v3393_v33 = vcombine.low %v3290_v2, %v3291_v35  ;;  %v3793_v17 = vld [vmem:[%s6849_s9 + $0x1b8] sm:$0xff]  ;;  %v5014_v29 = vpack.c.bf16 %v3743_v1, %v3742_v9  ;;  %v3796_v35 = vld [vmem:[%s6849_s9 + $0x1d0] sm:$0xff] }
0x2ed0   :  { %v3797_v2 = vld [vmem:[%s6849_s9 + $0x1d8] sm:$0xff]  ;;  %v3784_v1 = vld [vmem:[%s6849_s9 + $0x170] sm:$0xff] }
0x2ed1   :  { %4270 = vmatmul.mubr.msk.f32.vlgmr.msra.gmra.mrb[96].mxu1 %vm180_vm2, %v3392_v60  ;;  %4272 = vmatmul.mubr.msk.f32.vlgmr.msra.gmra.mrb[100].mxu0 %vm180_vm2, %v3392_v60  ;;  %v3401_v34 = vrot.slane %v3393_v33, %v3383_v57  ;;  %v5022_v33 = vpack.c.bf16 %v3747_v43, %v3746_v22 }
0x2ed2   :  { %4991 = vmatpush1.bf16.msra.mxu1 %v4990_v10  ;;  %4999 = vmatpush1.bf16.msra.mxu0 %v4998_v59  ;;  %v5016_v10 = vpack.c.bf16 %v3761_v14, %v3760_v37  ;;  %v5048_v59 = vpack.c.bf16 %v3793_v17, %v3792_v15  ;;  %v3851_v37 = vld [vmem:[%s6849_s9 + $0x388] sm:$0xff] }
0x2ed3   :  { %3484 = vmatprep.mubr.f32.mxu1 %v5415_v0  ;;  %3561 = vmatprep.mubr.f32.mxu0 %v5415_v0 }
0x2ed4   :  { %4993 = vmatprep.subr.bf16.mxu1 %v4992_v31  ;;  %5001 = vmatprep.subr.bf16.mxu0 %v5000_v18  ;;  %v5018_v31 = vpack.c.bf16 %v3745_v21, %v3744_v11  ;;  %v5050_v18 = vpack.c.bf16 %v3777_v26, %v3776_v13  ;;  %v3338_v11 = vsub.s32 2, %v6356_v54  ;;  %v6620_v21 = vld [vmem:[%s6850_s8] sm:$0xff] }
0x2ed6   :  { %4995 = vmatpush1.bf16.msra.mxu1 %v4994_v62  ;;  %5003 = vmatpush1.bf16.msra.mxu0 %v5002_v24  ;;  %v5052_v62 = vpack.c.bf16 %v3795_v61, %v3794_v4  ;;  %v3778_v24 = vld [vmem:[%s6849_s9 + $0x140] sm:$0xff]  ;;  %v6628_v26 = vrot.slane %v6620_v21, %v3338_v11  ;;  %v3859_v11 = vld [vmem:[%s6849_s9 + $0x3c8] sm:$0xff] }
0x2ed7   :  { %5005 = vmatprep.subr.bf16.mxu1 %v5004_v25  ;;  %5037 = vmatprep.subr.bf16.mxu0 %v5036_v32  ;;  %v3779_v25 = vld [vmem:[%s6849_s9 + $0x148] sm:$0xff]  ;;  %v3764_v32 = vld [vmem:[%s6849_s9 + $0xd0] sm:$0xff] }
0x2f2f   :  { %v3282_v27 = vpop.permute.xlu0 %3281 }
0x2f30   :  { %3285 = vst.msk [vmem:[#allocation2 + $0xe] sm:$0x3] %vm1909_vm3, %v3282_v27  ;;  %v3765_v27 = vld [vmem:[%s6849_s9 + $0xd8] sm:$0xff] }
0x2f37   :  { %v3293_v40 = vld [vmem:[#allocation2 + $0xe] sm:$0x3] }
0x2f38   :  { %v3394_v41 = vcombine.low %v3292_v38, %v3293_v40  ;;  %v5054_v38 = vpack.c.bf16 %v3779_v25, %v3778_v24  ;;  %v3748_v40 = vld [vmem:[%s6849_s9 + $0x50] sm:$0xff]  ;;  %v3834_v24 = vld [vmem:[%s6849_s9 + $0x300] sm:$0xff]  ;;  %v3835_v25 = vld [vmem:[%s6849_s9 + $0x308] sm:$0xff] }
0x2f3a   :  { %v3408_v5 = vrot.slane %v3394_v41, %v3383_v57  ;;  %v5042_v57 = vpack.c.bf16 %v3773_v53, %v3772_v52  ;;  %v3749_v41 = vld [vmem:[%s6849_s9 + $0x58] sm:$0xff]  ;;  %v3800_v53 = vld [vmem:[%s6849_s9 + $0x1f0] sm:$0xff] }
0x2f3b   :  { %v5026_v48 = vpack.c.bf16 %v3749_v41, %v3748_v40  ;;  %v3769_v52 = vld [vmem:[%s6849_s9 + $0xf8] sm:$0xff]  ;;  %v5064_v9 = vpack.c.bf16 %v3801_v55, %v3800_v53 }
0x2f3c   :  { %v3409_v42 = vcombine.low %v3401_v34, %v3408_v5  ;;  %v5024_v34 = vpack.c.bf16 %v3765_v27, %v3764_v32  ;;  %v5056_v5 = vpack.c.bf16 %v3797_v2, %v3796_v35  ;;  %v3820_v32 = vld [vmem:[%s6849_s9 + $0x290] sm:$0xff]  ;;  %v3821_v2 = vld [vmem:[%s6849_s9 + $0x298] sm:$0xff] }
0x2f3d   :  { %v5072_v23 = vpack.c.bf16 %v3821_v2, %v3820_v32  ;;  %v3813_v2 = vld [vmem:[%s6849_s9 + $0x258] sm:$0xff] }
0x2f3e   :  { %4271 = vmatmul.mubr.msk.f32.gmra.mrb[98].mxu1 %vm180_vm2, %v3409_v42  ;;  %4273 = vmatmul.mubr.msk.f32.gmra.mrb[102].mxu0 %vm180_vm2, %v3409_v42 }
0x2f3f   :  { %3632 = vmatprep.mubr.f32.mxu1 %v5415_v0  ;;  %3709 = vmatprep.mubr.f32.mxu0 %v5415_v0 }
0x2f42   :  { %4274 = vmatmul.mubr.msk.f32.vlgmr.msra.gmra.mrb[100].mxu1 %vm180_vm2, %v3392_v60  ;;  %4276 = vmatmul.mubr.msk.f32.vlgmr.msra.gmra.mrb[104].mxu0 %vm180_vm2, %v3392_v60  ;;  %v3762_v60 = vld [vmem:[%s6849_s9 + $0xc0] sm:$0xff] }
0x2f43   :  { %3638 = vmatprep.mubr.f32.mxu1 %v5415_v0  ;;  %3715 = vmatprep.mubr.f32.mxu0 %v5415_v0  ;;  %v3774_v0 = vld [vmem:[%s6849_s9 + $0x120] sm:$0xff]  ;;  %v5020_v39 = vpack.c.bf16 %v3763_v20, %v3762_v60 }
0x2f44   :  { %5007 = vmatpush3.bf16.msra.mxu1 %v5006_v7  ;;  %5039 = vmatpush3.bf16.msra.mxu0 %v5038_v58  ;;  %v5046_v16 = vpack.c.bf16 %v3775_v12, %v3774_v0  ;;  %v3751_v7 = vld [vmem:[%s6849_s9 + $0x68] sm:$0xff]  ;;  %v5028_v58 = vpack.c.bf16 %v3767_v46, %v3766_v45  ;;  %v3850_v12 = vld [vmem:[%s6849_s9 + $0x380] sm:$0xff] }
0x2f45   :  { %5009 = vmatprep.subr.bf16.mxu1 %v5008_v56  ;;  %5041 = vmatprep.subr.bf16.mxu0 %v5040_v50  ;;  %v3783_v56 = vld [vmem:[%s6849_s9 + $0x168] sm:$0xff]  ;;  %v3768_v50 = vld [vmem:[%s6849_s9 + $0xf0] sm:$0xff]  ;;  %v5030_v51 = vpack.c.bf16 %v3751_v7, %v3750_v19  ;;  %v3822_v19 = vld [vmem:[%s6849_s9 + $0x2a0] sm:$0xff] }
0x2f46   :  { %4275 = vmatmul.mubr.msk.f32.gmra.mrb[102].mxu1 %vm180_vm2, %v3409_v42  ;;  %4277 = vmatmul.mubr.msk.f32.gmra.mrb[106].mxu0 %vm180_vm2, %v3409_v42  ;;  %v3780_v42 = vld [vmem:[%s6849_s9 + $0x150] sm:$0xff]  ;;  %v5062_v63 = vpack.c.bf16 %v3783_v56, %v3782_v36  ;;  %v3819_v0 = vld [vmem:[%s6849_s9 + $0x288] sm:$0xff] }
0x2f47   :  { %v5058_v49 = vpack.c.bf16 %v3781_v44, %v3780_v42  ;;  %v3804_v42 = vld [vmem:[%s6849_s9 + $0x210] sm:$0xff]  ;;  %v3805_v44 = vld [vmem:[%s6849_s9 + $0x218] sm:$0xff]  ;;  %v3823_v7 = vld [vmem:[%s6849_s9 + $0x2a8] sm:$0xff] }
0x2f48   :  { %5011 = vmatpush3.bf16.msra.mxu1 %v5010_v6  ;;  %5043 = vmatpush3.bf16.msra.mxu0 %v5042_v57  ;;  %v3753_v6 = vld [vmem:[%s6849_s9 + $0x78] sm:$0xff]  ;;  %v5032_v57 = vpack.c.bf16 %v3769_v52, %v3768_v50  ;;  %v5074_v36 = vpack.c.bf16 %v3805_v44, %v3804_v42  ;;  %v3806_v50 = vld [vmem:[%s6849_s9 + $0x220] sm:$0xff]  ;;  %v3807_v52 = vld [vmem:[%s6849_s9 + $0x228] sm:$0xff]  ;;  %v5076_v53 = vpack.c.bf16 %v3823_v7, %v3822_v19 }
0x2f49   :  { %5013 = vmatprep.subr.bf16.mxu1 %v5012_v28  ;;  %5045 = vmatprep.subr.bf16.mxu0 %v5044_v30  ;;  %v3785_v28 = vld [vmem:[%s6849_s9 + $0x178] sm:$0xff]  ;;  %v3818_v30 = vld [vmem:[%s6849_s9 + $0x280] sm:$0xff]  ;;  %v5034_v14 = vpack.c.bf16 %v3753_v6, %v3752_v3  ;;  %v3824_v3 = vld [vmem:[%s6849_s9 + $0x2b0] sm:$0xff] }
0x2f4a   :  { %v5066_v15 = vpack.c.bf16 %v3785_v28, %v3784_v1  ;;  %v5068_v17 = vpack.c.bf16 %v3819_v0, %v3818_v30  ;;  %v3825_v6 = vld [vmem:[%s6849_s9 + $0x2b8] sm:$0xff]  ;;  %v5078_v1 = vpack.c.bf16 %v3807_v52, %v3806_v50  ;;  %v3808_v30 = vld [vmem:[%s6849_s9 + $0x230] sm:$0xff]  ;;  %v3862_v42 = vld [vmem:[%s6849_s9 + $0x3e0] sm:$0xff] }
0x2f4b   :  { %v3809_v0 = vld [vmem:[%s6849_s9 + $0x238] sm:$0xff]  ;;  %v3863_v44 = vld [vmem:[%s6849_s9 + $0x3e8] sm:$0xff]  ;;  %v3846_v19 = vld [vmem:[%s6849_s9 + $0x360] sm:$0xff] }
0x2f4c   :  { %5015 = vmatpush3.bf16.msra.mxu1 %v5014_v29  ;;  %5047 = vmatpush3.bf16.msra.mxu0 %v5046_v16  ;;  %v5100_v29 = vpack.c.bf16 %v3851_v37, %v3850_v12  ;;  %v3330_v16 = vsub.s32 0, %v6356_v54  ;;  %v5080_v12 = vpack.c.bf16 %v3825_v6, %v3824_v3  ;;  %v3847_v7 = vld [vmem:[%s6849_s9 + $0x368] sm:$0xff]  ;;  %v3848_v3 = vld [vmem:[%s6849_s9 + $0x370] sm:$0xff]  ;;  %v3849_v6 = vld [vmem:[%s6849_s9 + $0x378] sm:$0xff] }
0x2f4d   :  { %5017 = vmatprep.subr.bf16.mxu1 %v5016_v10  ;;  %5049 = vmatprep.subr.bf16.mxu0 %v5048_v59  ;;  %v3334_v10 = vsub.s32 1, %v6356_v54  ;;  %v3342_v59 = vsub.s32 3, %v6356_v54  ;;  %v5126_v52 = vpack.c.bf16 %v3847_v7, %v3846_v19 }
0x2f4e   :  { %v6625_v13 = vrot.slane %v6620_v21, %v3330_v16  ;;  %v3858_v16 = vld [vmem:[%s6849_s9 + $0x3c0] sm:$0xff] }
0x2f4f   :  { %v6631_v60 = vrot.slane %v6620_v21, %v3334_v10  ;;  %v6634_v20 = vrot.slane %v6620_v21, %v3342_v59  ;;  %v5082_v10 = vpack.c.bf16 %v3809_v0, %v3808_v30  ;;  %v3350_v30 = vsub.s32 5, %v6356_v54 }
0x2f50   :  { %5019 = vmatpush3.bf16.msra.mxu1 %v5018_v31  ;;  %5051 = vmatpush3.bf16.msra.mxu0 %v5050_v18  ;;  %v3802_v31 = vld [vmem:[%s6849_s9 + $0x200] sm:$0xff]  ;;  %v3803_v18 = vld [vmem:[%s6849_s9 + $0x208] sm:$0xff]  ;;  %v3358_v0 = vsub.s32 7, %v6356_v54 }
0x2f51   :  { %5021 = vmatprep.subr.bf16.mxu1 %v5020_v39  ;;  %5053 = vmatprep.subr.bf16.mxu0 %v5052_v62 }
0x2f54   :  { %5023 = vmatpush3.bf16.msra.mxu1 %v5022_v33  ;;  %5055 = vmatpush3.bf16.msra.mxu0 %v5054_v38  ;;  %v3852_v33 = vld [vmem:[%s6849_s9 + $0x390] sm:$0xff]  ;;  %v3853_v38 = vld [vmem:[%s6849_s9 + $0x398] sm:$0xff] }
0x2f55   :  { %5025 = vmatprep.subr.bf16.mxu1 %v5024_v34  ;;  %5057 = vmatprep.subr.bf16.mxu0 %v5056_v5  ;;  %v5070_v34 = vpack.c.bf16 %v3803_v18, %v3802_v31  ;;  %v5102_v5 = vpack.c.bf16 %v3835_v25, %v3834_v24  ;;  %v5104_v47 = vpack.c.bf16 %v3853_v38, %v3852_v33  ;;  %v3860_v24 = vld [vmem:[%s6849_s9 + $0x3d0] sm:$0xff]  ;;  %v3861_v25 = vld [vmem:[%s6849_s9 + $0x3d8] sm:$0xff] }
0x2f56   :  { %v5116_v18 = vpack.c.bf16 %v3859_v11, %v3858_v16  ;;  %v5120_v38 = vpack.c.bf16 %v3861_v25, %v3860_v24 }
0x2f58   :  { %5027 = vmatpush3.bf16.msra.mxu1 %v5026_v48  ;;  %5059 = vmatpush3.bf16.msra.mxu0 %v5058_v49  ;;  %v3836_v48 = vld [vmem:[%s6849_s9 + $0x310] sm:$0xff]  ;;  %v3837_v49 = vld [vmem:[%s6849_s9 + $0x318] sm:$0xff] }
0x2f59   :  { %5029 = vmatprep.subr.bf16.mxu1 %v5028_v58  ;;  %5061 = vmatprep.subr.bf16.mxu0 %v5060_v8  ;;  %v3854_v58 = vld [vmem:[%s6849_s9 + $0x3a0] sm:$0xff]  ;;  %v3855_v8 = vld [vmem:[%s6849_s9 + $0x3a8] sm:$0xff]  ;;  %v5106_v56 = vpack.c.bf16 %v3837_v49, %v3836_v48  ;;  %v5124_v49 = vpack.c.bf16 %v3863_v44, %v3862_v42 }
0x2f5a   :  { %v5108_v55 = vpack.c.bf16 %v3855_v8, %v3854_v58  ;;  %v3832_v58 = vld [vmem:[%s6849_s9 + $0x2f0] sm:$0xff]  ;;  %v3833_v8 = vld [vmem:[%s6849_s9 + $0x2f8] sm:$0xff] }
0x2f5c   :  { %5031 = vmatpush3.bf16.msra.mxu1 %v5030_v51  ;;  %5063 = vmatpush3.bf16.msra.mxu0 %v5062_v63  ;;  %v3838_v51 = vld [vmem:[%s6849_s9 + $0x320] sm:$0xff]  ;;  %v3839_v63 = vld [vmem:[%s6849_s9 + $0x328] sm:$0xff] }
0x2f5d   :  { %5033 = vmatprep.subr.bf16.mxu1 %v5032_v57  ;;  %5065 = vmatprep.subr.bf16.mxu0 %v5064_v9  ;;  %v3856_v57 = vld [vmem:[%s6849_s9 + $0x3b0] sm:$0xff]  ;;  %v3857_v9 = vld [vmem:[%s6849_s9 + $0x3b8] sm:$0xff]  ;;  %v5110_v28 = vpack.c.bf16 %v3839_v63, %v3838_v51 }
0x2f5e   :  { %v5112_v37 = vpack.c.bf16 %v3857_v9, %v3856_v57  ;;  %v3817_v63 = vld [vmem:[%s6849_s9 + $0x278] sm:$0xff]  ;;  %v5130_v9 = vpack.c.bf16 %v3849_v6, %v3848_v3 }
0x2f60   :  { %5035 = vmatpush3.bf16.msra.mxu1 %v5034_v14  ;;  %5067 = vmatpush3.bf16.msra.mxu0 %v5066_v15  ;;  %v3840_v14 = vld [vmem:[%s6849_s9 + $0x330] sm:$0xff]  ;;  %v3841_v15 = vld [vmem:[%s6849_s9 + $0x338] sm:$0xff] }
0x2f61   :  { %5069 = vmatprep.subr.bf16.mxu1 %v5068_v17  ;;  %5101 = vmatprep.subr.bf16.mxu0 %v5100_v29  ;;  %v3826_v17 = vld [vmem:[%s6849_s9 + $0x2c0] sm:$0xff]  ;;  %v3827_v29 = vld [vmem:[%s6849_s9 + $0x2c8] sm:$0xff]  ;;  %v5114_v59 = vpack.c.bf16 %v3841_v15, %v3840_v14 }
0x2f62   :  { %v5084_v31 = vpack.c.bf16 %v3827_v29, %v3826_v17 }
0x2fa4   :  { %v3480_v4 = vpop.f32.mrb[96].mxu1  ;;  %v3557_v61 = vpop.f32.mrb[100].mxu0 }
0x2fa5   :  { %v3481_v22 = vadd.f32 %v3480_v4, %v6625_v13  ;;  %v3558_v43 = vadd.f32 %v3557_v61, %v6628_v26  ;;  %v3482_v39 = vpop.f32.mrb[97].mxu1  ;;  %v3559_v62 = vpop.f32.mrb[101].mxu0  ;;  %v3810_v4 = vld [vmem:[%s6849_s9 + $0x240] sm:$0xff]  ;;  %v3811_v61 = vld [vmem:[%s6849_s9 + $0x248] sm:$0xff] }
0x2fa6   :  { %v3483_v27 = vadd.f32 %v3482_v39, %v6631_v60  ;;  %v3560_v35 = vadd.f32 %v3559_v62, %v6634_v20  ;;  %v3828_v39 = vld [vmem:[%s6849_s9 + $0x2d0] sm:$0xff]  ;;  %v3829_v62 = vld [vmem:[%s6849_s9 + $0x2d8] sm:$0xff]  ;;  %v5086_v32 = vpack.c.bf16 %v3811_v61, %v3810_v4  ;;  %v3351_v4 = vrot.slane %v6620_v21, %v3350_v30 }
0x2fa7   :  { %v3722_v45 = vmax.f32 %v3481_v22, 0.0  ;;  %v3724_v46 = vmax.f32 %v3558_v43, 0.0  ;;  %v3842_v22 = vld [vmem:[%s6849_s9 + $0x340] sm:$0xff]  ;;  %v3843_v43 = vld [vmem:[%s6849_s9 + $0x348] sm:$0xff]  ;;  %v5088_v33 = vpack.c.bf16 %v3829_v62, %v3828_v39 }
0x2fa8   :  { %v3723_v40 = vmax.f32 %v3483_v27, 0.0  ;;  %v3725_v41 = vmax.f32 %v3560_v35, 0.0  ;;  %v5118_v27 = vpack.c.bf16 %v3843_v43, %v3842_v22  ;;  %v3812_v35 = vld [vmem:[%s6849_s9 + $0x250] sm:$0xff] }
0x2faa   :  { %3937 = vmatprep.mubr.f32.mxu1 %v3723_v40  ;;  %4012 = vmatprep.mubr.f32.mxu0 %v3725_v41  ;;  %v3844_v40 = vld [vmem:[%s6849_s9 + $0x350] sm:$0xff]  ;;  %v3845_v41 = vld [vmem:[%s6849_s9 + $0x358] sm:$0xff] }
0x2fab   :  { %3938 = vmatmul.mubr.f32.vlgmr.msra.gmra.mrb[104].mxu1 %v3722_v45  ;;  %4013 = vmatmul.mubr.f32.vlgmr.msra.gmra.mrb[108].mxu0 %v3724_v46  ;;  %v5090_v45 = vpack.c.bf16 %v3813_v2, %v3812_v35  ;;  %v5122_v46 = vpack.c.bf16 %v3845_v41, %v3844_v40 }
0x2fac   :  { %5071 = vmatpush3.bf16.msra.mxu1 %v5070_v34  ;;  %5103 = vmatpush3.bf16.msra.mxu0 %v5102_v5  ;;  %v3830_v34 = vld [vmem:[%s6849_s9 + $0x2e0] sm:$0xff]  ;;  %v3831_v5 = vld [vmem:[%s6849_s9 + $0x2e8] sm:$0xff] }
0x2fad   :  { %5073 = vmatprep.subr.bf16.mxu1 %v5072_v23  ;;  %5105 = vmatprep.subr.bf16.mxu0 %v5104_v47  ;;  %v3814_v23 = vld [vmem:[%s6849_s9 + $0x260] sm:$0xff]  ;;  %v3815_v47 = vld [vmem:[%s6849_s9 + $0x268] sm:$0xff]  ;;  %v5092_v48 = vpack.c.bf16 %v3831_v5, %v3830_v34 }
0x2fae   :  { %v5094_v50 = vpack.c.bf16 %v3815_v47, %v3814_v23 }
0x2fb0   :  { %5075 = vmatpush3.bf16.msra.mxu1 %v5074_v36  ;;  %5107 = vmatpush3.bf16.msra.mxu0 %v5106_v56  ;;  %v3864_v36 = vld [vmem:[%s6849_s9 + $0x3f0] sm:$0xff]  ;;  %v3865_v56 = vld [vmem:[%s6849_s9 + $0x3f8] sm:$0xff] }
0x2fb1   :  { %5077 = vmatprep.subr.bf16.mxu1 %v5076_v53  ;;  %5109 = vmatprep.subr.bf16.mxu0 %v5108_v55  ;;  %v3816_v53 = vld [vmem:[%s6849_s9 + $0x270] sm:$0xff]  ;;  %v5096_v55 = vpack.c.bf16 %v3833_v8, %v3832_v58  ;;  %v5128_v51 = vpack.c.bf16 %v3865_v56, %v3864_v36 }
0x2fb2   :  { %v5098_v57 = vpack.c.bf16 %v3817_v63, %v3816_v53 }
0x2fb4   :  { %5079 = vmatpush3.bf16.msra.mxu1 %v5078_v1  ;;  %5111 = vmatpush3.bf16.msra.mxu0 %v5110_v28  ;;  %v3346_v1 = vsub.s32 4, %v6356_v54  ;;  %v3354_v28 = vsub.s32 6, %v6356_v54  ;;  %v3359_v54 = vrot.slane %v6620_v21, %v3358_v0 }
0x2fb5   :  { %5081 = vmatprep.subr.bf16.mxu1 %v5080_v12  ;;  %5113 = vmatprep.subr.bf16.mxu0 %v5112_v37 }
0x2fb6   :  { %v3347_v16 = vrot.slane %v6620_v21, %v3346_v1  ;;  %v3355_v11 = vrot.slane %v6620_v21, %v3354_v28 }
0x2fb8   :  { %5083 = vmatpush3.bf16.msra.mxu1 %v5082_v10  ;;  %5115 = vmatpush3.bf16.msra.mxu0 %v5114_v59 }
0x2fb9   :  { %5085 = vmatprep.subr.bf16.mxu1 %v5084_v31  ;;  %5117 = vmatprep.subr.bf16.mxu0 %v5116_v18 }
0x2fbc   :  { %5087 = vmatpush3.bf16.msra.mxu1 %v5086_v32  ;;  %5119 = vmatpush3.bf16.msra.mxu0 %v5118_v27 }
0x2fbd   :  { %5089 = vmatprep.subr.bf16.mxu1 %v5088_v33  ;;  %5121 = vmatprep.subr.bf16.mxu0 %v5120_v38 }
0x2fc0   :  { %5091 = vmatpush3.bf16.msra.mxu1 %v5090_v45  ;;  %5123 = vmatpush3.bf16.msra.mxu0 %v5122_v46 }
0x2fc1   :  { %5093 = vmatprep.subr.bf16.mxu1 %v5092_v48  ;;  %5125 = vmatprep.subr.bf16.mxu0 %v5124_v49  ;;  %v4278_v48 = vld [vmem:[%s6851_s10] ss:$0 sm:$0xff] }
0x2fc4   :  { %5095 = vmatpush3.bf16.msra.mxu1 %v5094_v50  ;;  %5127 = vmatpush3.bf16.msra.mxu0 %v5126_v52 }
0x2fc5   :  { %5097 = vmatprep.subr.bf16.mxu1 %v5096_v55  ;;  %5129 = vmatprep.subr.bf16.mxu0 %v5128_v51 }
0x2fc8   :  { %5099 = vmatpush3.bf16.msra.mxu1 %v5098_v57  ;;  %5131 = vmatpush3.bf16.msra.mxu0 %v5130_v9 }
0x3011   :  { %v3486_v12 = vpop.f32.mrb[98].mxu1  ;;  %v3563_v37 = vpop.f32.mrb[102].mxu0 }
0x3012   :  { %v3487_v14 = vadd.f32 %v3486_v12, %v6625_v13  ;;  %v3564_v15 = vadd.f32 %v3563_v37, %v6628_v26  ;;  %v3488_v17 = vpop.f32.mrb[99].mxu1  ;;  %v3565_v29 = vpop.f32.mrb[103].mxu0 }
0x3013   :  { %v3489_v10 = vadd.f32 %v3488_v17, %v6631_v60  ;;  %v3566_v59 = vadd.f32 %v3565_v29, %v6634_v20 }
0x3014   :  { %v3730_v22 = vmax.f32 %v3487_v14, 0.0  ;;  %v3732_v26 = vmax.f32 %v3564_v15, 0.0 }
0x3015   :  { %v3731_v61 = vmax.f32 %v3489_v10, 0.0  ;;  %v3733_v31 = vmax.f32 %v3566_v59, 0.0  ;;  %v3634_v18 = vpop.f32.mrb[100].mxu1  ;;  %v3711_v13 = vpop.f32.mrb[104].mxu0 }
0x3016   :  { %v3635_v43 = vadd.f32 %v3634_v18, %v3347_v16  ;;  %v3712_v39 = vadd.f32 %v3711_v13, %v3355_v11  ;;  %v3636_v62 = vpop.f32.mrb[101].mxu1  ;;  %v3713_v24 = vpop.f32.mrb[105].mxu0 }
0x3017   :  { %v3637_v25 = vadd.f32 %v3636_v62, %v3351_v4  ;;  %v3714_v32 = vadd.f32 %v3713_v24, %v3359_v54  ;;  %3942 = vmatprep.mubr.f32.mxu1 %v3731_v61  ;;  %4017 = vmatprep.mubr.f32.mxu0 %v3733_v31 }
0x3018   :  { %3943 = vmatmul.mubr.f32.gmra.mrb[106].mxu1 %v3730_v22  ;;  %4018 = vmatmul.mubr.f32.gmra.mrb[110].mxu0 %v3732_v26  ;;  %v3726_v35 = vmax.f32 %v3635_v43, 0.0  ;;  %v3728_v2 = vmax.f32 %v3712_v39, 0.0 }
0x3019   :  { %v3727_v60 = vmax.f32 %v3637_v25, 0.0  ;;  %v3729_v20 = vmax.f32 %v3714_v32, 0.0  ;;  %v3640_v27 = vpop.f32.mrb[102].mxu1  ;;  %v3717_v21 = vpop.f32.mrb[106].mxu0 }
0x301a   :  { %v3641_v33 = vadd.f32 %v3640_v27, %v3347_v16  ;;  %v3718_v38 = vadd.f32 %v3717_v21, %v3355_v11  ;;  %v3642_v40 = vpop.f32.mrb[103].mxu1  ;;  %v3719_v41 = vpop.f32.mrb[107].mxu0 }
0x301b   :  { %v3643_v34 = vadd.f32 %v3642_v40, %v3351_v4  ;;  %v3720_v5 = vadd.f32 %v3719_v41, %v3359_v54  ;;  %4087 = vmatprep.mubr.f32.mxu1 %v3727_v60  ;;  %4162 = vmatprep.mubr.f32.mxu0 %v3729_v20 }
0x301c   :  { %4088 = vmatmul.mubr.f32.vlgmr.msra.gmra.mrb[108].mxu1 %v3726_v35  ;;  %4163 = vmatmul.mubr.f32.vlgmr.msra.gmra.mrb[112].mxu0 %v3728_v2  ;;  %v3734_v45 = vmax.f32 %v3641_v33, 0.0  ;;  %v3736_v46 = vmax.f32 %v3718_v38, 0.0 }
0x301d   :  { %v3735_v42 = vmax.f32 %v3643_v34, 0.0  ;;  %v3737_v44 = vmax.f32 %v3720_v5, 0.0 }
0x301f   :  { %4092 = vmatprep.mubr.f32.mxu1 %v3735_v42  ;;  %4167 = vmatprep.mubr.f32.mxu0 %v3737_v44 }
0x3020   :  { %4093 = vmatmul.mubr.f32.gmra.mrb[110].mxu1 %v3734_v45  ;;  %4168 = vmatmul.mubr.f32.gmra.mrb[114].mxu0 %v3736_v46 }
0x307e   :  { %v4460_v23 = vpop.f32.mrb[104].mxu1  ;;  %v4498_v47 = vpop.f32.mrb[108].mxu0 }
0x307f   :  { %v4461_v49 = vpop.f32.mrb[105].mxu1  ;;  %v4499_v19 = vpop.f32.mrb[109].mxu0 }
0x3080   :  { %v4462_v7 = vadd.f32 %v4461_v49, %v4460_v23  ;;  %v4500_v58 = vadd.f32 %v4499_v19, %v4498_v47 }
0x3082   :  { %v3940_v8 = vadd.f32 %v4462_v7, %v4278_v48 }
0x3084   :  { %v4015_v36 = vadd.f32 %v4500_v58, %v3940_v8 }
0x30eb   :  { %v4463_v56 = vpop.f32.mrb[106].mxu1  ;;  %v4501_v50 = vpop.f32.mrb[110].mxu0 }
0x30ec   :  { %v4464_v52 = vpop.f32.mrb[107].mxu1  ;;  %v4502_v53 = vpop.f32.mrb[111].mxu0 }
0x30ed   :  { %v4465_v55 = vadd.f32 %v4464_v52, %v4463_v56  ;;  %v4503_v51 = vadd.f32 %v4502_v53, %v4501_v50 }
0x30ef   :  { %v3945_v63 = vadd.f32 %v4465_v55, %v4278_v48  ;;  %v4536_v3 = vpop.f32.mrb[108].mxu1  ;;  %v4574_v6 = vpop.f32.mrb[112].mxu0 }
0x30f0   :  { %v4537_v57 = vpop.f32.mrb[109].mxu1  ;;  %v4575_v9 = vpop.f32.mrb[113].mxu0 }
0x30f1   :  { %v4020_v1 = vadd.f32 %v4503_v51, %v3945_v63  ;;  %v4538_v28 = vadd.f32 %v4537_v57, %v4536_v3  ;;  %v4576_v30 = vadd.f32 %v4575_v9, %v4574_v6 }
0x30f3   :  { %v4090_v0 = vadd.f32 %v4538_v28, %v4015_v36  ;;  %v4539_v12 = vpop.f32.mrb[110].mxu1  ;;  %v4577_v37 = vpop.f32.mrb[114].mxu0 }
0x30f4   :  { %v4540_v14 = vpop.f32.mrb[111].mxu1  ;;  %v4578_v15 = vpop.f32.mrb[115].mxu0 }
0x30f5   :  { %v4165_v17 = vadd.f32 %v4576_v30, %v4090_v0  ;;  %v4541_v29 = vadd.f32 %v4540_v14, %v4539_v12  ;;  %v4579_v16 = vadd.f32 %v4578_v15, %v4577_v37 }
0x30f7   :  { %4174 = vst.msk [vmem:[%s6852_s11] sm:$0xff] %vm4173_vm4, %v4165_v17  ;;  %v4095_v11 = vadd.f32 %v4541_v29, %v4020_v1 }
0x30f9   :  { %v4170_v10 = vadd.f32 %v4579_v16, %v4095_v11 }
0x30fb   :  { %4175 = vst.msk [vmem:[%s6852_s11 + $0x8] sm:$0xff] %vm4173_vm4, %v4170_v10 }

</bundles_post_ra>
